<compile_context>
chip_gen: v5e
topology: v5e:2x2
jax: 0.10.0
libtpu: 0.0.40
codegen_flags: <defaults>
</compile_context>

<pallas_src>
import jax
import jax.numpy as jnp
from jax.experimental import pallas as pl
from jax.experimental.pallas import tpu as pltpu

BN_EPS = 1e-5


def _round_up(x, m):
    return ((x + m - 1) // m) * m


def _vmem_capacity_bytes():
    try:
        return int(pltpu.get_tpu_info().vmem_capacity_bytes)
    except Exception:
        return 64 * 1024 * 1024          # v7x-safe fallback (64 MiB per TensorCore)


def _pick_tile_h(H, W, KH, KW, c_in_pad, c_out_pad, budget_bytes):
    """Largest output-row tile whose full per-grid-step VMEM footprint fits the budget."""
    k_all = KH * KW * c_in_pad
    wp = W + KW - 1

    def footprint(th):
        tin = th + KH - 1
        thw = th * W
        in_tile = 2 * tin * wp * c_in_pad * 2     # double-buffered bf16 input tile
        w_bytes = 2 * k_all * c_out_pad * 2       # double-buffered bf16 weights
        patches = thw * k_all * 2                 # in-VMEM im2col slab (bf16)
        acc = thw * c_out_pad * 4                 # f32 MXU accumulator
        out_tile = 2 * thw * c_out_pad * 4        # double-buffered f32 output tile
        return in_tile + w_bytes + patches + acc + out_tile

    cands = [th for th in range(H, 0, -1)
             if H % th == 0 and (th == H or (th * W) % 8 == 0)]
    for th in cands:
        if footprint(th) <= budget_bytes:
            return th
    return cands[-1]   # smallest legal tile; may still exceed budget only for extreme W*c_out


def conv_block_forward(x, weight, bias, gamma, beta, *, padding=1):
    """x: (N, C_in, H, W) f32; weight: (C_out, C_in, KH, KW); bias/gamma/beta: (C_out,).
    Returns ReLU(BatchNorm2d(Conv2d(x))) as (N, C_out, H, W) f32."""
    N, C_in, H, W = x.shape
    C_out, C_in_w, KH, KW = weight.shape
    assert C_in_w == C_in
    assert KH == KW and KH == 2 * padding + 1, "only stride-1 'same' convolutions supported"

    c_in_pad = _round_up(max(C_in, 8), 8)      # aligned contraction pieces
    c_out_pad = _round_up(C_out, 128)          # lane-dense MXU N-dim / epilogue / stores
    k_all = KH * KW * c_in_pad
    wp = W + KW - 1

    vmem_cap = _vmem_capacity_bytes()
    vmem_limit = max(32 * 1024 * 1024, min(int(vmem_cap * 0.75), 100 * 1024 * 1024))
    tile_budget = int(vmem_limit * 0.8)

    tile_h = _pick_tile_h(H, W, KH, KW, c_in_pad, c_out_pad, tile_budget)
    hb = H // tile_h
    tile_hw = tile_h * W
    tin = tile_h + KH - 1                      # input rows per tile (with halo)

    # ------------- host-side prep: touches only the small C_in-channel tensor -------------
    x_nhwc = jnp.transpose(x, (0, 2, 3, 1)).astype(jnp.bfloat16)   # bf16 halves input DMA bytes
    xp = jnp.pad(x_nhwc, ((0, 0), (padding, padding), (padding, padding),
                          (0, c_in_pad - C_in)))
    if hb == 1:
        x_blk = xp[:, None]                    # (N, 1, tin, wp, c_in_pad) -- no copy
    else:
        # TODO(synk): a pl.Element-indexed row dimension on xp would avoid materializing
        #             these overlapping halo'd row blocks (one extra input HBM round trip).
        x_blk = jnp.stack([xp[:, i * tile_h:i * tile_h + tin] for i in range(hb)], axis=1)

    # tap-folded weights: w_flat[(ki*KW + kj)*c_in_pad + c, co] = weight[co, c, ki, kj]
    w = jnp.transpose(weight, (2, 3, 1, 0))                         # (KH, KW, C_in, C_out)
    w = jnp.pad(w, ((0, 0), (0, 0), (0, c_in_pad - C_in), (0, c_out_pad - C_out)))
    w_flat = w.reshape(k_all, c_out_pad).astype(jnp.bfloat16)

    # ------------------------ kernels (close over static geometry) ------------------------
    def _conv_acc(x_ref, w_ref):
        # x_ref: (tin, wp, c_in_pad) bf16 ; w_ref: (k_all, c_out_pad) bf16
        cols = []
        for ki in range(KH):
            for kj in range(KW):
                cols.append(x_ref[ki:ki + tile_h, kj:kj + W, :])    # (tile_h, W, c_in_pad)
        patches = jnp.concatenate(cols, axis=-1)                    # (tile_h, W, k_all)
        patches = patches.reshape(tile_hw, k_all)
        # single MXU matmul, K = KH*KW*c_in_pad, f32 accumulation
        return jnp.dot(patches, w_ref[...], preferred_element_type=jnp.float32)

    def stats_kernel(x_ref, w_ref, stats_ref):
        acc = _conv_acc(x_ref, w_ref)                               # (tile_hw, c_out_pad)
        mean = jnp.mean(acc, axis=0, keepdims=True)
        diff = acc - mean                                           # stable: center then square
        m2 = jnp.sum(diff * diff, axis=0, keepdims=True)
        stats_ref[...] = jnp.concatenate([mean, m2], axis=0)        # (2, c_out_pad)

    def apply_kernel(x_ref, w_ref, scale_ref, shift_ref, o_ref):
        acc = _conv_acc(x_ref, w_ref)
        # folded BN + ReLU in the MXU-native layout; lane-dense (1, c_out_pad) scale/shift
        y = acc * scale_ref[...] + shift_ref[...]
        o_ref[...] = jnp.maximum(y, 0.0)                            # unmasked lane-dense store
        # TODO(synk): a bf16 output option would halve store/HBM bytes (esp. v5e).

    x_spec = pl.BlockSpec((None, None, tin, wp, c_in_pad), lambda n, h: (n, h, 0, 0, 0))
    w_spec = pl.BlockSpec((k_all, c_out_pad), lambda n, h: (0, 0))
    cparams = pltpu.CompilerParams(
        dimension_semantics=("parallel", "parallel"),
        vmem_limit_bytes=vmem_limit,
    )
    conv_flops = 2 * N * H * W * k_all * c_out_pad
    in_bytes = x_blk.size * 2 + w_flat.size * 2

    # -------- pass 1: conv + per-block BN statistics (tiny output) --------
    stats = pl.pallas_call(
        stats_kernel,
        out_shape=jax.ShapeDtypeStruct((N, hb, 2, c_out_pad), jnp.float32),
        grid=(N, hb),
        in_specs=[x_spec, w_spec],
        out_specs=pl.BlockSpec((None, None, 2, c_out_pad), lambda n, h: (n, h, 0, 0)),
        compiler_params=cparams,
        cost_estimate=pl.CostEstimate(flops=conv_flops, transcendentals=0,
                                      bytes_accessed=in_bytes + N * hb * 2 * c_out_pad * 4),
    )(x_blk, w_flat)

    # -------- exact global merge of per-block statistics (all blocks have equal count) --------
    mean_b = stats[:, :, 0, :C_out].reshape(-1, C_out)              # (G, C_out)
    m2_b = stats[:, :, 1, :C_out].reshape(-1, C_out)
    groups, cnt = mean_b.shape[0], tile_hw
    mu = jnp.mean(mean_b, axis=0)
    m2 = jnp.sum(m2_b, axis=0) + cnt * jnp.sum((mean_b - mu) ** 2, axis=0)
    var = m2 / (groups * cnt)                                       # biased var (BN normalization)
    scale = gamma.astype(jnp.float32) * jax.lax.rsqrt(var + BN_EPS)
    shift = beta.astype(jnp.float32) - mu * scale
    # NOTE: the Conv2d bias cancels exactly against the train-mode BN batch-mean subtraction.
    del bias
    scale_p = jnp.pad(scale, (0, c_out_pad - C_out)).reshape(1, c_out_pad)
    shift_p = jnp.pad(shift, (0, c_out_pad - C_out)).reshape(1, c_out_pad)

    # -------- pass 2: conv recompute + BN FMA + ReLU, lane-dense NHWC-style slab --------
    # TODO(synk): for large C_in*KH*KW (esp. v7x) storing the pass-1 conv in bf16 and making
    #             pass 2 a pure VPU FMA would beat recomputing the matmul.
    out_slab = pl.pallas_call(
        apply_kernel,
        out_shape=jax.ShapeDtypeStruct((N, H * W, c_out_pad), jnp.float32),
        grid=(N, hb),
        in_specs=[
            x_spec,
            w_spec,
            pl.BlockSpec((1, c_out_pad), lambda n, h: (0, 0)),
            pl.BlockSpec((1, c_out_pad), lambda n, h: (0, 0)),
        ],
        out_specs=pl.BlockSpec((None, tile_hw, c_out_pad), lambda n, h: (n, h, 0)),
        compiler_params=cparams,
        cost_estimate=pl.CostEstimate(
            flops=conv_flops, transcendentals=0,
            bytes_accessed=in_bytes + 8 * c_out_pad + N * H * W * c_out_pad * 4),
    )(x_blk, w_flat, scale_p, shift_p)

    # cheap channel-slice + NHWC -> NCHW transpose outside the kernel
    out = out_slab[:, :, :C_out].reshape(N, H, W, C_out)
    return jnp.transpose(out, (0, 3, 1, 2))


def _reference(x, weight, bias, gamma, beta, padding):
    """Pure-JAX f32 reference of the PyTorch module forward (train-mode BN)."""
    conv = jax.lax.conv_general_dilated(
        x, weight, window_strides=(1, 1),
        padding=((padding, padding), (padding, padding)),
        dimension_numbers=("NCHW", "OIHW", "NCHW"),
        precision=jax.lax.Precision.HIGHEST)
    conv = conv + bias[None, :, None, None]
    mean = jnp.mean(conv, axis=(0, 2, 3), keepdims=True)
    var = jnp.mean((conv - mean) ** 2, axis=(0, 2, 3), keepdims=True)
    xhat = (conv - mean) * jax.lax.rsqrt(var + BN_EPS)
    y = xhat * gamma[None, :, None, None] + beta[None, :, None, None]
    return jnp.maximum(y, 0.0)


if __name__ == "__main__":
    key = jax.random.PRNGKey(0)
    k_x, k_w, k_b, k_g, k_bt = jax.random.split(key, 5)

    N, C_in, H, W = 2, 4, 16, 16
    C_out, KH, KW = 8, 3, 3

    x = jax.random.normal(k_x, (N, C_in, H, W), dtype=jnp.float32)
    fan_in = C_in * KH * KW
    bound = 1.0 / (fan_in ** 0.5)
    weight = jax.random.uniform(k_w, (C_out, C_in, KH, KW),
                                minval=-bound, maxval=bound, dtype=jnp.float32)
    bias = jax.random.uniform(k_b, (C_out,), minval=-bound, maxval=bound, dtype=jnp.float32)
    gamma = 1.0 + 0.1 * jax.random.normal(k_g, (C_out,), dtype=jnp.float32)
    beta = 0.1 * jax.random.normal(k_bt, (C_out,), dtype=jnp.float32)

    fwd = jax.jit(conv_block_forward, static_argnames=("padding",))
    out = fwd(x, weight, bias, gamma, beta, padding=1)
    out = jax.block_until_ready(out)

    # correctness vs pure-JAX reference computed on the same bf16-quantized conv inputs
    # (intentional precision choice: conv operands are bf16, accumulation is f32)
    xq = x.astype(jnp.bfloat16).astype(jnp.float32)
    wq = weight.astype(jnp.bfloat16).astype(jnp.float32)
    ref = _reference(xq, wq, bias, gamma, beta, 1)

    assert out.shape == (N, C_out, H, W)
    assert bool(jnp.all(jnp.isfinite(out)))
    assert bool(jnp.all(out >= 0.0))                                # ReLU
    assert float(jnp.max(jnp.abs(out - ref))) < 1e-3
    print("KERNEL_OK")
</pallas_src>

<mosaic_0001>
module attributes {stable_mosaic.version = 11 : i64} {
  func.func @stats_kernel(%arg0: i32, %arg1: i32, %arg2: memref<1x1x18x18x8xbf16, #tpu.memory_space<vmem>>, %arg3: memref<72x128xbf16, #tpu.memory_space<vmem>>, %arg4: memref<1x1x2x128xf32, #tpu.memory_space<vmem>>) attributes {dimension_semantics = [#tpu.dimension_semantics<parallel>, #tpu.dimension_semantics<parallel>], iteration_bounds = array<i64: 2, 1>, scalar_prefetch = 0 : i64, scratch_operands = 0 : i64, tpu.core_type = #tpu.core_type<tc>, window_params = [{transform_indices = @transform_0, window_bounds = array<i64: 1, 1, 18, 18, 8>}, {pipeline_mode = #tpu.pipeline_mode<synchronous>, transform_indices = @transform_1, window_bounds = array<i64: 72, 128>}, {transform_indices = @transform_2, window_bounds = array<i64: 1, 1, 2, 128>}]} {
    %c0 = arith.constant 0 : index
    %c0_0 = arith.constant 0 : index
    %c0_1 = arith.constant 0 : index
    %c0_2 = arith.constant 0 : index
    %c0_3 = arith.constant 0 : index
    %0 = vector.load %arg2[%c0, %c0_0, %c0_1, %c0_2, %c0_3] : memref<1x1x18x18x8xbf16, #tpu.memory_space<vmem>>, vector<1x1x16x16x8xbf16>
    %1 = vector.shape_cast %0 : vector<1x1x16x16x8xbf16> to vector<16x16x8xbf16>
    %c0_4 = arith.constant 0 : index
    %c0_5 = arith.constant 0 : index
    %c0_6 = arith.constant 0 : index
    %c1 = arith.constant 1 : index
    %c0_7 = arith.constant 0 : index
    %2 = vector.load %arg2[%c0_4, %c0_5, %c0_6, %c1, %c0_7] : memref<1x1x18x18x8xbf16, #tpu.memory_space<vmem>>, vector<1x1x16x16x8xbf16>
    %3 = vector.shape_cast %2 : vector<1x1x16x16x8xbf16> to vector<16x16x8xbf16>
    %c0_8 = arith.constant 0 : index
    %c0_9 = arith.constant 0 : index
    %c0_10 = arith.constant 0 : index
    %c2 = arith.constant 2 : index
    %c0_11 = arith.constant 0 : index
    %4 = vector.load %arg2[%c0_8, %c0_9, %c0_10, %c2, %c0_11] : memref<1x1x18x18x8xbf16, #tpu.memory_space<vmem>>, vector<1x1x16x16x8xbf16>
    %5 = vector.shape_cast %4 : vector<1x1x16x16x8xbf16> to vector<16x16x8xbf16>
    %c0_12 = arith.constant 0 : index
    %c0_13 = arith.constant 0 : index
    %c1_14 = arith.constant 1 : index
    %c0_15 = arith.constant 0 : index
    %c0_16 = arith.constant 0 : index
    %6 = vector.load %arg2[%c0_12, %c0_13, %c1_14, %c0_15, %c0_16] : memref<1x1x18x18x8xbf16, #tpu.memory_space<vmem>>, vector<1x1x16x16x8xbf16>
    %7 = vector.shape_cast %6 : vector<1x1x16x16x8xbf16> to vector<16x16x8xbf16>
    %c0_17 = arith.constant 0 : index
    %c0_18 = arith.constant 0 : index
    %c1_19 = arith.constant 1 : index
    %c1_20 = arith.constant 1 : index
    %c0_21 = arith.constant 0 : index
    %8 = vector.load %arg2[%c0_17, %c0_18, %c1_19, %c1_20, %c0_21] : memref<1x1x18x18x8xbf16, #tpu.memory_space<vmem>>, vector<1x1x16x16x8xbf16>
    %9 = vector.shape_cast %8 : vector<1x1x16x16x8xbf16> to vector<16x16x8xbf16>
    %c0_22 = arith.constant 0 : index
    %c0_23 = arith.constant 0 : index
    %c1_24 = arith.constant 1 : index
    %c2_25 = arith.constant 2 : index
    %c0_26 = arith.constant 0 : index
    %10 = vector.load %arg2[%c0_22, %c0_23, %c1_24, %c2_25, %c0_26] : memref<1x1x18x18x8xbf16, #tpu.memory_space<vmem>>, vector<1x1x16x16x8xbf16>
    %11 = vector.shape_cast %10 : vector<1x1x16x16x8xbf16> to vector<16x16x8xbf16>
    %c0_27 = arith.constant 0 : index
    %c0_28 = arith.constant 0 : index
    %c2_29 = arith.constant 2 : index
    %c0_30 = arith.constant 0 : index
    %c0_31 = arith.constant 0 : index
    %12 = vector.load %arg2[%c0_27, %c0_28, %c2_29, %c0_30, %c0_31] : memref<1x1x18x18x8xbf16, #tpu.memory_space<vmem>>, vector<1x1x16x16x8xbf16>
    %13 = vector.shape_cast %12 : vector<1x1x16x16x8xbf16> to vector<16x16x8xbf16>
    %c0_32 = arith.constant 0 : index
    %c0_33 = arith.constant 0 : index
    %c2_34 = arith.constant 2 : index
    %c1_35 = arith.constant 1 : index
    %c0_36 = arith.constant 0 : index
    %14 = vector.load %arg2[%c0_32, %c0_33, %c2_34, %c1_35, %c0_36] : memref<1x1x18x18x8xbf16, #tpu.memory_space<vmem>>, vector<1x1x16x16x8xbf16>
    %15 = vector.shape_cast %14 : vector<1x1x16x16x8xbf16> to vector<16x16x8xbf16>
    %c0_37 = arith.constant 0 : index
    %c0_38 = arith.constant 0 : index
    %c2_39 = arith.constant 2 : index
    %c2_40 = arith.constant 2 : index
    %c0_41 = arith.constant 0 : index
    %16 = vector.load %arg2[%c0_37, %c0_38, %c2_39, %c2_40, %c0_41] : memref<1x1x18x18x8xbf16, #tpu.memory_space<vmem>>, vector<1x1x16x16x8xbf16>
    %17 = vector.shape_cast %16 : vector<1x1x16x16x8xbf16> to vector<16x16x8xbf16>
    %18 = tpu.concatenate %1, %3, %5, %7, %9, %11, %13, %15, %17 in 2 : vector<16x16x8xbf16>, vector<16x16x8xbf16>, vector<16x16x8xbf16>, vector<16x16x8xbf16>, vector<16x16x8xbf16>, vector<16x16x8xbf16>, vector<16x16x8xbf16>, vector<16x16x8xbf16>, vector<16x16x8xbf16> -> vector<16x16x72xbf16>
    %19 = vector.shape_cast %18 : vector<16x16x72xbf16> to vector<256x72xbf16>
    %c0_42 = arith.constant 0 : index
    %c0_43 = arith.constant 0 : index
    %20 = vector.load %arg3[%c0_42, %c0_43] : memref<72x128xbf16, #tpu.memory_space<vmem>>, vector<72x128xbf16>
    %cst = arith.constant dense<0.000000e+00> : vector<256x128xf32>
    %21 = tpu.matmul %19, %20, %cst {dimension_numbers = #tpu.dot_dimension_numbers<[1], [0], [0], [1], [0, 0, 1, 1], [], []>} : vector<256x72xbf16>, vector<72x128xbf16>, vector<256x128xf32> -> vector<256x128xf32>
    %cst_44 = arith.constant dense<0.000000e+00> : vector<128xf32>
    %22 = vector.multi_reduction <add>, %21, %cst_44 [0] : vector<256x128xf32> to vector<128xf32>
    %23 = vector.shape_cast %22 : vector<128xf32> to vector<1x128xf32>
    %cst_45 = arith.constant 2.560000e+02 : f32
    %24 = vector.broadcast %cst_45 : f32 to vector<1x128xf32>
    %25 = arith.divf %23, %24 : vector<1x128xf32>
    %26 = vector.broadcast %25 : vector<1x128xf32> to vector<256x128xf32>
    %27 = arith.subf %21, %26 : vector<256x128xf32>
    %28 = arith.mulf %27, %27 : vector<256x128xf32>
    %cst_46 = arith.constant dense<0.000000e+00> : vector<128xf32>
    %29 = vector.multi_reduction <add>, %28, %cst_46 [0] : vector<256x128xf32> to vector<128xf32>
    %30 = vector.shape_cast %29 : vector<128xf32> to vector<1x128xf32>
    %31 = tpu.concatenate %25, %30 in 0 : vector<1x128xf32>, vector<1x128xf32> -> vector<2x128xf32>
    %c0_47 = arith.constant 0 : index
    %c0_48 = arith.constant 0 : index
    %c0_49 = arith.constant 0 : index
    %c0_50 = arith.constant 0 : index
    %32 = vector.load %arg4[%c0_47, %c0_48, %c0_49, %c0_50] : memref<1x1x2x128xf32, #tpu.memory_space<vmem>>, vector<1x1x2x128xf32>
    %33 = vector.shape_cast %32 : vector<1x1x2x128xf32> to vector<2x128xf32>
    %34 = vector.shape_cast %31 : vector<2x128xf32> to vector<1x1x2x128xf32>
    tpu.vector_store %arg4[%c0_47, %c0_48, %c0_49, %c0_50], %34 {strides = array<i32>} : memref<1x1x2x128xf32, #tpu.memory_space<vmem>>, vector<1x1x2x128xf32>,
    return
  }
  func.func @transform_0(%arg0: i32, %arg1: i32) -> (i32, i32, i32, i32, i32) {
    %c0_i32 = arith.constant 0 : i32
    %c0_i32_0 = arith.constant 0 : i32
    %c0_i32_1 = arith.constant 0 : i32
    %c0_i32_2 = arith.constant 0 : i32
    return %arg0, %arg1, %c0_i32, %c0_i32_0, %c0_i32_1 : i32, i32, i32, i32, i32
  }
  func.func @transform_1(%arg0: i32, %arg1: i32) -> (i32, i32) {
    %c0_i32 = arith.constant 0 : i32
    %c0_i32_0 = arith.constant 0 : i32
    %c0_i32_1 = arith.constant 0 : i32
    return %c0_i32, %c0_i32_0 : i32, i32
  }
  func.func @transform_2(%arg0: i32, %arg1: i32) -> (i32, i32, i32, i32) {
    %c0_i32 = arith.constant 0 : i32
    %c0_i32_0 = arith.constant 0 : i32
    %c0_i32_1 = arith.constant 0 : i32
    return %arg0, %arg1, %c0_i32, %c0_i32_0 : i32, i32, i32, i32
  }
}

module attributes {stable_mosaic.version = 11 : i64} {
  func.func @apply_kernel(%arg0: i32, %arg1: i32, %arg2: memref<1x1x18x18x8xbf16, #tpu.memory_space<vmem>>, %arg3: memref<72x128xbf16, #tpu.memory_space<vmem>>, %arg4: memref<1x128xf32, #tpu.memory_space<vmem>>, %arg5: memref<1x128xf32, #tpu.memory_space<vmem>>, %arg6: memref<1x256x128xf32, #tpu.memory_space<vmem>>) attributes {dimension_semantics = [#tpu.dimension_semantics<parallel>, #tpu.dimension_semantics<parallel>], iteration_bounds = array<i64: 2, 1>, scalar_prefetch = 0 : i64, scratch_operands = 0 : i64, tpu.core_type = #tpu.core_type<tc>, window_params = [{transform_indices = @transform_0, window_bounds = array<i64: 1, 1, 18, 18, 8>}, {pipeline_mode = #tpu.pipeline_mode<synchronous>, transform_indices = @transform_1, window_bounds = array<i64: 72, 128>}, {pipeline_mode = #tpu.pipeline_mode<synchronous>, transform_indices = @transform_2, window_bounds = array<i64: 1, 128>}, {pipeline_mode = #tpu.pipeline_mode<synchronous>, transform_indices = @transform_3, window_bounds = array<i64: 1, 128>}, {transform_indices = @transform_4, window_bounds = array<i64: 1, 256, 128>}]} {
    %c0 = arith.constant 0 : index
    %c0_0 = arith.constant 0 : index
    %c0_1 = arith.constant 0 : index
    %c0_2 = arith.constant 0 : index
    %c0_3 = arith.constant 0 : index
    %0 = vector.load %arg2[%c0, %c0_0, %c0_1, %c0_2, %c0_3] : memref<1x1x18x18x8xbf16, #tpu.memory_space<vmem>>, vector<1x1x16x16x8xbf16>
    %1 = vector.shape_cast %0 : vector<1x1x16x16x8xbf16> to vector<16x16x8xbf16>
    %c0_4 = arith.constant 0 : index
    %c0_5 = arith.constant 0 : index
    %c0_6 = arith.constant 0 : index
    %c1 = arith.constant 1 : index
    %c0_7 = arith.constant 0 : index
    %2 = vector.load %arg2[%c0_4, %c0_5, %c0_6, %c1, %c0_7] : memref<1x1x18x18x8xbf16, #tpu.memory_space<vmem>>, vector<1x1x16x16x8xbf16>
    %3 = vector.shape_cast %2 : vector<1x1x16x16x8xbf16> to vector<16x16x8xbf16>
    %c0_8 = arith.constant 0 : index
    %c0_9 = arith.constant 0 : index
    %c0_10 = arith.constant 0 : index
    %c2 = arith.constant 2 : index
    %c0_11 = arith.constant 0 : index
    %4 = vector.load %arg2[%c0_8, %c0_9, %c0_10, %c2, %c0_11] : memref<1x1x18x18x8xbf16, #tpu.memory_space<vmem>>, vector<1x1x16x16x8xbf16>
    %5 = vector.shape_cast %4 : vector<1x1x16x16x8xbf16> to vector<16x16x8xbf16>
    %c0_12 = arith.constant 0 : index
    %c0_13 = arith.constant 0 : index
    %c1_14 = arith.constant 1 : index
    %c0_15 = arith.constant 0 : index
    %c0_16 = arith.constant 0 : index
    %6 = vector.load %arg2[%c0_12, %c0_13, %c1_14, %c0_15, %c0_16] : memref<1x1x18x18x8xbf16, #tpu.memory_space<vmem>>, vector<1x1x16x16x8xbf16>
    %7 = vector.shape_cast %6 : vector<1x1x16x16x8xbf16> to vector<16x16x8xbf16>
    %c0_17 = arith.constant 0 : index
    %c0_18 = arith.constant 0 : index
    %c1_19 = arith.constant 1 : index
    %c1_20 = arith.constant 1 : index
    %c0_21 = arith.constant 0 : index
    %8 = vector.load %arg2[%c0_17, %c0_18, %c1_19, %c1_20, %c0_21] : memref<1x1x18x18x8xbf16, #tpu.memory_space<vmem>>, vector<1x1x16x16x8xbf16>
    %9 = vector.shape_cast %8 : vector<1x1x16x16x8xbf16> to vector<16x16x8xbf16>
    %c0_22 = arith.constant 0 : index
    %c0_23 = arith.constant 0 : index
    %c1_24 = arith.constant 1 : index
    %c2_25 = arith.constant 2 : index
    %c0_26 = arith.constant 0 : index
    %10 = vector.load %arg2[%c0_22, %c0_23, %c1_24, %c2_25, %c0_26] : memref<1x1x18x18x8xbf16, #tpu.memory_space<vmem>>, vector<1x1x16x16x8xbf16>
    %11 = vector.shape_cast %10 : vector<1x1x16x16x8xbf16> to vector<16x16x8xbf16>
    %c0_27 = arith.constant 0 : index
    %c0_28 = arith.constant 0 : index
    %c2_29 = arith.constant 2 : index
    %c0_30 = arith.constant 0 : index
    %c0_31 = arith.constant 0 : index
    %12 = vector.load %arg2[%c0_27, %c0_28, %c2_29, %c0_30, %c0_31] : memref<1x1x18x18x8xbf16, #tpu.memory_space<vmem>>, vector<1x1x16x16x8xbf16>
    %13 = vector.shape_cast %12 : vector<1x1x16x16x8xbf16> to vector<16x16x8xbf16>
    %c0_32 = arith.constant 0 : index
    %c0_33 = arith.constant 0 : index
    %c2_34 = arith.constant 2 : index
    %c1_35 = arith.constant 1 : index
    %c0_36 = arith.constant 0 : index
    %14 = vector.load %arg2[%c0_32, %c0_33, %c2_34, %c1_35, %c0_36] : memref<1x1x18x18x8xbf16, #tpu.memory_space<vmem>>, vector<1x1x16x16x8xbf16>
    %15 = vector.shape_cast %14 : vector<1x1x16x16x8xbf16> to vector<16x16x8xbf16>
    %c0_37 = arith.constant 0 : index
    %c0_38 = arith.constant 0 : index
    %c2_39 = arith.constant 2 : index
    %c2_40 = arith.constant 2 : index
    %c0_41 = arith.constant 0 : index
    %16 = vector.load %arg2[%c0_37, %c0_38, %c2_39, %c2_40, %c0_41] : memref<1x1x18x18x8xbf16, #tpu.memory_space<vmem>>, vector<1x1x16x16x8xbf16>
    %17 = vector.shape_cast %16 : vector<1x1x16x16x8xbf16> to vector<16x16x8xbf16>
    %18 = tpu.concatenate %1, %3, %5, %7, %9, %11, %13, %15, %17 in 2 : vector<16x16x8xbf16>, vector<16x16x8xbf16>, vector<16x16x8xbf16>, vector<16x16x8xbf16>, vector<16x16x8xbf16>, vector<16x16x8xbf16>, vector<16x16x8xbf16>, vector<16x16x8xbf16>, vector<16x16x8xbf16> -> vector<16x16x72xbf16>
    %19 = vector.shape_cast %18 : vector<16x16x72xbf16> to vector<256x72xbf16>
    %c0_42 = arith.constant 0 : index
    %c0_43 = arith.constant 0 : index
    %20 = vector.load %arg3[%c0_42, %c0_43] : memref<72x128xbf16, #tpu.memory_space<vmem>>, vector<72x128xbf16>
    %cst = arith.constant dense<0.000000e+00> : vector<256x128xf32>
    %21 = tpu.matmul %19, %20, %cst {dimension_numbers = #tpu.dot_dimension_numbers<[1], [0], [0], [1], [0, 0, 1, 1], [], []>} : vector<256x72xbf16>, vector<72x128xbf16>, vector<256x128xf32> -> vector<256x128xf32>
    %c0_44 = arith.constant 0 : index
    %c0_45 = arith.constant 0 : index
    %22 = vector.load %arg4[%c0_44, %c0_45] : memref<1x128xf32, #tpu.memory_space<vmem>>, vector<1x128xf32>
    %23 = vector.broadcast %22 : vector<1x128xf32> to vector<256x128xf32>
    %24 = arith.mulf %21, %23 : vector<256x128xf32>
    %c0_46 = arith.constant 0 : index
    %c0_47 = arith.constant 0 : index
    %25 = vector.load %arg5[%c0_46, %c0_47] : memref<1x128xf32, #tpu.memory_space<vmem>>, vector<1x128xf32>
    %26 = vector.broadcast %25 : vector<1x128xf32> to vector<256x128xf32>
    %27 = arith.addf %24, %26 : vector<256x128xf32>
    %cst_48 = arith.constant 0.000000e+00 : f32
    %28 = vector.broadcast %cst_48 : f32 to vector<256x128xf32>
    %29 = arith.maximumf %27, %28 : vector<256x128xf32>
    %c0_49 = arith.constant 0 : index
    %c0_50 = arith.constant 0 : index
    %c0_51 = arith.constant 0 : index
    %30 = vector.load %arg6[%c0_49, %c0_50, %c0_51] : memref<1x256x128xf32, #tpu.memory_space<vmem>>, vector<1x256x128xf32>
    %31 = vector.shape_cast %30 : vector<1x256x128xf32> to vector<256x128xf32>
    %32 = vector.shape_cast %29 : vector<256x128xf32> to vector<1x256x128xf32>
    tpu.vector_store %arg6[%c0_49, %c0_50, %c0_51], %32 {strides = array<i32>} : memref<1x256x128xf32, #tpu.memory_space<vmem>>, vector<1x256x128xf32>,
    return
  }
  func.func @transform_0(%arg0: i32, %arg1: i32) -> (i32, i32, i32, i32, i32) {
    %c0_i32 = arith.constant 0 : i32
    %c0_i32_0 = arith.constant 0 : i32
    %c0_i32_1 = arith.constant 0 : i32
    %c0_i32_2 = arith.constant 0 : i32
    return %arg0, %arg1, %c0_i32, %c0_i32_0, %c0_i32_1 : i32, i32, i32, i32, i32
  }
  func.func @transform_1(%arg0: i32, %arg1: i32) -> (i32, i32) {
    %c0_i32 = arith.constant 0 : i32
    %c0_i32_0 = arith.constant 0 : i32
    %c0_i32_1 = arith.constant 0 : i32
    return %c0_i32, %c0_i32_0 : i32, i32
  }
  func.func @transform_2(%arg0: i32, %arg1: i32) -> (i32, i32) {
    %c0_i32 = arith.constant 0 : i32
    %c0_i32_0 = arith.constant 0 : i32
    %c0_i32_1 = arith.constant 0 : i32
    return %c0_i32, %c0_i32_0 : i32, i32
  }
  func.func @transform_3(%arg0: i32, %arg1: i32) -> (i32, i32) {
    %c0_i32 = arith.constant 0 : i32
    %c0_i32_0 = arith.constant 0 : i32
    %c0_i32_1 = arith.constant 0 : i32
    return %c0_i32, %c0_i32_0 : i32, i32
  }
  func.func @transform_4(%arg0: i32, %arg1: i32) -> (i32, i32, i32) {
    %c0_i32 = arith.constant 0 : i32
    %c0_i32_0 = arith.constant 0 : i32
    return %arg0, %arg1, %c0_i32 : i32, i32, i32
  }
}

</mosaic_0001>

<bundles_post_ra>
// kernel: conv_block_forward.2
= control target key start
LH: loop header
LB: loop body
LE: loop exit
PB: predicated region body
PF: predicated region fallthrough
CT: control target
= control target key end

     0   :  { %s3072_s9 = smov 0   ;;  %s3074_s10 = smov 0   ;;  %s4285_s0 = inlined_call_operand.vmem [shape: bf16[2,1,18,18,8], index: 0, kind: input, shape index: {}]   ;;  %s4286_s1 = inlined_call_operand.vmem [shape: bf16[72,128], index: 1, kind: input, shape index: {}]   ;;  %s4287_s2 = inlined_call_operand.vmem [shape: f32[2,1,2,128], index: 2, kind: output, shape index: {}]  }
   0x1   :  { %s3076_s11 = smov 0  }
   0x2 LB: > { %s24_s12 = sadd.s32 1, %s3042_s10  ;;  %p2536_p0 = scmp.ge.s32.totalorder %s3046_s11, 1  ;;  %s3046_s11 = sphi %s3076_s11, %s12_s11   ;;  %s3042_s10 = sphi %s3074_s10, %s4289_s10   ;;  %s3038_s9 = sphi %s3072_s9, %s4288_s9  }
   0x3   : > { %p26_p1 = scmp.ge.s32.totalorder %s24_s12, 2  ;;  %p132_p2 = scmp.lt.s32.totalorder %s3046_s11, 3 }
   0x5   : > { %s4291_s12 = smov (%p26_p1, %s24_s12), 0  ;;  %p133_p3 = pnand %p2536_p0, %p132_p2 }
   0x6   : > { %p160_p4 = scmp.lt.s32.totalorder (!%p133_p3), %s3038_s9, 1  ;;  %s3048_s17 = smov (!%p133_p3), 24  }
   0x7   : > { %136 = sbr.rel (%p133_p3) target bundleno = 714 (0x2ca), region = 28  ;;  %s3049_s18 = smov (!%p133_p3), 8  }
   0x8   : > { %s3050_s19 = smov (!%p133_p3), 16   ;;  %s3051_s20 = smov (!%p133_p3), 40  }
   0x9   : > { %s3052_s21 = smov (!%p133_p3), 32   ;;  %s3053_s22 = smov (!%p133_p3), 48  }
   0xa   : > { %s3054_s23 = smov (!%p133_p3), 56   ;;  %s3055_s24 = smov (!%p133_p3), 64  }
   0xc   : > { %s4293_s9 = smov (!%p160_p4, %s3038_s9), 1  ;;  %vm499_vm0 = vsmask.f32 7424  ;;  %vm772_vm1 = vcmask 1046528   ;;  %vm2210_vm2 = vcmask 1043456   ;;  %vm1877_vm3 = vcmask 64512  }
   0xd   : > { %s2911_s13 = smul.u32 216, %s4293_s9  ;;  %vm1910_vm4 = vcmask 130048   ;;  %vm1943_vm5 = vcmask 195584   ;;  %vm1976_vm6 = vcmask 261120   ;;  %vm2009_vm7 = vcmask 326656   ;;  %s2538_s7 = sshll.u32 %s4293_s9, 1 }
   0xe   : > { %vm2042_vm8 = vcmask 392192   ;;  %vm2075_vm9 = vcmask 457728   ;;  %vm2108_vm10 = vcmask 523264   ;;  %vm2177_vm11 = vcmask 588800   ;;  %s175_s14 = scalar_lea.vmem %s4287_s2, %s2538_s7 }
   0xf   : > { %s3096_s16 = scalar_lea.vmem %s4285_s0, %s2911_s13  ;;  %vm2449_vm13 = vcmask 1040384  }
  0x10   : > { %v3099_v0 = vld [vmem:[%s3096_s16 + $0xc] sm:$0xff]   ;;  %v3105_v2 = vld [vmem:[%s3096_s16 + $0x18] sm:$0xff]   ;;  %v211_v3 = vld [vmem:[%s3096_s16 + $0x20] sm:$0x1] }
  0x11   : > { %v3102_v1 = vld [vmem:[%s3096_s16 + $0xc] sm:$0xf0]  ;;  %v469_v4 = vunpack.c.l.b16 %v211_v3  ;;  %v525_v5 = vshrl.u32 %v3105_v2, 16  ;;  %v3110_v6 = vld [vmem:[%s3096_s16] sm:$0xff]   ;;  %v209_v7 = vld [vmem:[%s3096_s16 + $0x8] sm:$0x1]  ;;  %933 = vrot.lane.b32.xlu0 %v3099_v0, %s3048_s17 }
  0x12   : > { %v3114_v8 = vld [vmem:[%s3096_s16 + $0x24] sm:$0xff]   ;;  %v527_v10 = vshll.u32 %v3105_v2, 16  ;;  %v467_v11 = vunpack.c.l.b16 %v209_v7  ;;  %v501_v12 = vshrl.u32 %v3110_v6, 16  ;;  %v503_v13 = vshll.u32 %v3110_v6, 16  ;;  %v212_v14 = vld [vmem:[%s3096_s16 + $0x2c] sm:$0x1] }
  0x13   : > { %v3117_v9 = vld [vmem:[%s3096_s16 + $0x24] sm:$0xf0]  ;;  %v3124_v15 = vld [vmem:[%s3096_s16 + $0xc] sm:$0xff]   ;;  %v3129_v17 = vpack.c.b16 %v469_v4, %v469_v4  ;;  %v470_v21 = vunpack.c.l.b16 %v212_v14  ;;  %v210_v22 = vld [vmem:[%s3096_s16 + $0x14] sm:$0x1]  ;;  %v1016_v23 = vshll.u32 %v3099_v0, 16 }
  0x14   : > { %v3127_v16 = vld [vmem:[%s3096_s16 + $0xc] sm:$0xf0]  ;;  %v529_v18 = vrot.slane %v527_v10, 1  ;;  %v483_v19 = vpack.c.b16 %v467_v11, %v467_v11  ;;  %v505_v20 = vrot.slane %v503_v13, 1  ;;  %v2824_v25 = vld [vmem:[%s3096_s16] sm:$0xf0]  ;;  %v468_v36 = vunpack.c.l.b16 %v210_v22 }
  0x15   : > { %v532_v24 = vshll.u32 %v3129_v17, 16  ;;  %v2825_v26 = vld [vmem:[%s3096_s16] sm:$0xe]  ;;  %v3140_v30 = vpack.c.b16 %v470_v21, %v470_v21  ;;  %v537_v32 = vshrl.u32 %v3114_v8, 16  ;;  %v539_v33 = vshll.u32 %v3114_v8, 16 }
  0x16   : > { %v3138_v27 = vor.u32 %v529_v18, %v525_v5  ;;  %v506_v28 = vor.u32 %v505_v20, %v501_v12  ;;  %v508_v29 = vshll.u32 %v483_v19, 16  ;;  %v2826_v37 = vor.u32 %v2825_v26, %v2824_v25  ;;  %v2571_v38 = vld [vmem:[%s3096_s16 + $0x14] sm:$0x1]  ;;  %v2953_v46 = vld [vmem:[%s3096_s16 + $0xc] sm:$0xe] }
  0x17   : > { %v534_v31 = vrot.slane %v532_v24, 1  ;;  %v544_v35 = vshll.u32 %v3140_v30, 16  ;;  %v541_v40 = vrot.slane %v539_v33, 1  ;;  %v774_v41 = vrot.slane %v483_v19, 1  ;;  %v2635_v51 = vld [vmem:[%s3096_s16 + $0x20] sm:$0x1] }
  0x18   : > { %v510_v34 = vrot.slane %v508_v29, 1  ;;  %v3150_v44 = vpack.c.b16 %v468_v36, %v468_v36  ;;  %v773_v45 = vrot.slane %v2826_v37, 1  ;;  %v513_v48 = vshrl.u32 %v3124_v15, 16  ;;  %v213_v57 = vld [vmem:[%s3096_s16 + $0x38] sm:$0x1]  ;;  %v3165_v5 = vld [vmem:[%s3096_s16 + $0x30] sm:$0xff]  }
  0x19   : > { %v535_v39 = vsel %vm499_vm0, %v3138_v27, %v534_v31  ;;  %v546_v43 = vrot.slane %v544_v35, 1  ;;  %v542_v47 = vor.u32 %v541_v40, %v537_v32  ;;  %v515_v49 = vshll.u32 %v3124_v15, 16  ;;  %v2956_v20 = vld [vmem:[%s3096_s16 + $0xc] sm:$0xe]  ;;  %v2873_v29 = vld [vmem:[%s3096_s16 + $0x18] sm:$0xe] }
  0x1a   : > { %696 = vrot.lane.b32.xlu1 %v535_v39, %s3049_s18  ;;  %v511_v42 = vsel %vm499_vm0, %v506_v28, %v510_v34  ;;  %v981_v50 = vunpack.c.l.b16 %v2571_v38  ;;  %v520_v52 = vshll.u32 %v3150_v44, 16  ;;  %v775_v53 = vsel %vm772_vm1, %v773_v45, %v774_v41  ;;  %v2872_v28 = vld [vmem:[%s3096_s16 + $0x18] sm:$0xf0]  ;;  %v2830_v35 = vld [vmem:[%s3096_s16 + $0x30] sm:$0xf0] }
  0x1b   : > { %692 = vrot.lane.b32.xlu0 %v511_v42, %s3049_s18  ;;  %v517_v54 = vrot.slane %v515_v49, 1  ;;  %821 = vrot.lane.b32.xlu2 %v775_v53, %s3050_s19  ;;  %v1014_v56 = vshrl.u32 %v3099_v0, 16  ;;  %v547_v58 = vsel %vm499_vm0, %v542_v47, %v546_v43  ;;  %v1018_v60 = vrot.slane %v1016_v23, 1  ;;  %v2831_v36 = vld [vmem:[%s3096_s16 + $0x30] sm:$0xe]  ;;  %v2547_v38 = vld [vmem:[%s3096_s16 + $0x3c] sm:$0xff]  }
  0x1c   : > { %v997_v55 = vpack.c.b16 %v981_v50, %v981_v50  ;;  %v522_v59 = vrot.slane %v520_v52, 1  ;;  %v1493_v61 = vunpack.c.l.b16 %v2635_v51  ;;  %v2954_v3 = vor.u32 %v2953_v46, %v3102_v1  ;;  %v2572_v37 = vld [vmem:[%s3096_s16 + $0x20] sm:$0x1]  ;;  %v2575_v47 = vld [vmem:[%s3096_s16 + $0x44] sm:$0x1] }
  0x1d   : > { %v518_v62 = vor.u32 %v517_v54, %v513_v48  ;;  %v471_v7 = vunpack.c.l.b16 %v213_v57  ;;  %v549_v12 = vshrl.u32 %v3165_v5, 16  ;;  %v551_v13 = vshll.u32 %v3165_v5, 16  ;;  %v2958_v39 = vld [vmem:[%s3096_s16 + $0x3c] sm:$0xf0]  ;;  %v2849_v57 = vld [vmem:[%s3096_s16 + $0x18] sm:$0xe] }
  0x1e   : > { %v1021_v63 = vshll.u32 %v997_v55, 16  ;;  %v1286_v4 = vrot.slane %v997_v55, 1  ;;  %v1285_v10 = vrot.slane %v2954_v3, 1  ;;  %v1019_v14 = vor.u32 %v1018_v60, %v1014_v56  ;;  %v2848_v56 = vld [vmem:[%s3096_s16 + $0x18] sm:$0xf0]  ;;  %v2605_v60 = vld [vmem:[%s3096_s16 + $0x24] sm:$0xff]  }
  0x1f   : > { %v523_v0 = vsel %vm499_vm0, %v518_v62, %v522_v59  ;;  %v487_v11 = vpack.c.b16 %v471_v7, %v471_v7  ;;  %v1509_v19 = vpack.c.b16 %v1493_v61, %v1493_v61  ;;  %v553_v21 = vrot.slane %v551_v13, 1  ;;  %v2961_v61 = vld [vmem:[%s3096_s16 + $0x24] sm:$0xf0] }
  0x20   : > { %v1023_v18 = vrot.slane %v1021_v63, 1  ;;  %v1287_v1 = vsel %vm772_vm1, %v1285_v10, %v1286_v4  ;;  %v2957_v31 = vor.u32 %v2956_v20, %v3127_v16  ;;  %v2874_v33 = vor.u32 %v2873_v29, %v2872_v28  ;;  %v2636_v10 = vld [vmem:[%s3096_s16 + $0x2c] sm:$0x1] }
  0x21   : > { %v556_v22 = vshll.u32 %v487_v11, 16  ;;  %v3175_v23 = vor.u32 %v553_v21, %v549_v12  ;;  %v1533_v26 = vshll.u32 %v1509_v19, 16  ;;  %v777_v16 = vrot.slane %v3150_v44, 1 }
  0x22   : > { %698 = vrot.lane.b32.xlu1 %v547_v58, %s3049_s18  ;;  %v1024_v25 = vsel %vm499_vm0, %v1019_v14, %v1023_v18  ;;  %v776_v40 = vrot.slane %v2957_v31, 1  ;;  %v1797_v41 = vrot.slane %v2874_v33, 1  ;;  %v1798_v42 = vrot.slane %v1509_v19, 1  ;;  %v2959_v58 = vld [vmem:[%s3096_s16 + $0x3c] sm:$0xe] }
  0x23   : > { %694 = vrot.lane.b32.xlu0 %v523_v0, %s3049_s18  ;;  %1333 = vrot.lane.b32.xlu2 %v1287_v1, %s3051_s20  ;;  %v558_v24 = vrot.slane %v556_v22, 1  ;;  %v1535_v34 = vrot.slane %v1533_v26, 1  ;;  %v2832_v45 = vor.u32 %v2831_v36, %v2830_v35  ;;  %v982_v46 = vunpack.c.l.b16 %v2572_v37  ;;  %v2639_v19 = vld [vmem:[%s3096_s16 + $0x50] sm:$0x1]  ;;  %v2962_v26 = vld [vmem:[%s3096_s16 + $0x24] sm:$0xe] }
  0x24   : > { %v778_v48 = vsel %vm772_vm1, %v776_v40, %v777_v16  ;;  %v1799_v49 = vsel %vm772_vm1, %v1797_v41, %v1798_v42  ;;  %v786_v50 = vrot.slane %v487_v11, 1  ;;  %v985_v52 = vunpack.c.l.b16 %v2575_v47  ;;  %v217_v36 = vld [vmem:[%s3096_s16 + $0x68] sm:$0x1]  ;;  %v3230_v16 = vld [vmem:[%s3096_s16 + $0x60] sm:$0xff]  }
  0x25   : > { %v559_v32 = vsel %vm499_vm0, %v3175_v23, %v558_v24  ;;  %v1536_v43 = vsel %vm499_vm0, %v3138_v27, %v1535_v34  ;;  %v785_v44 = vrot.slane %v2832_v45, 1  ;;  %v998_v51 = vpack.c.b16 %v982_v46, %v982_v46  ;;  %v2878_v45 = vld [vmem:[%s3096_s16 + $0x48] sm:$0xf0]  ;;  %v2879_v46 = vld [vmem:[%s3096_s16 + $0x48] sm:$0xe] }
  0x26   : > { %v1064_v53 = vshll.u32 %v2547_v38, 16  ;;  %v1001_v59 = vpack.c.b16 %v985_v52, %v985_v52  ;;  %v2850_v62 = vor.u32 %v2849_v57, %v2848_v56  ;;  %v1062_v63 = vshrl.u32 %v2547_v38, 16  ;;  %v2836_v47 = vld [vmem:[%s3096_s16 + $0x60] sm:$0xf0] }
  0x27   : > { %v787_v54 = vsel %vm772_vm1, %v785_v44, %v786_v50  ;;  %v1033_v55 = vshll.u32 %v998_v51, 16  ;;  %v1289_v11 = vrot.slane %v998_v51, 1  ;;  %v2960_v18 = vor.u32 %v2959_v58, %v2958_v39  ;;  %v2964_v44 = vld [vmem:[%s3096_s16 + $0x6c] sm:$0xf0] }
  0x28   : > { %v1066_v3 = vrot.slane %v1064_v53, 1  ;;  %v1069_v4 = vshll.u32 %v1001_v59, 16  ;;  %v1288_v0 = vrot.slane %v2850_v62, 1  ;;  %v1494_v1 = vunpack.c.l.b16 %v2636_v10 }
  0x29   : > { %v1035_v7 = vrot.slane %v1033_v55, 1  ;;  %v1298_v22 = vrot.slane %v1001_v59, 1  ;;  %v1497_v28 = vunpack.c.l.b16 %v2639_v19  ;;  %v2963_v39 = vor.u32 %v2962_v26, %v2961_v61  ;;  %v2579_v59 = vld [vmem:[%s3096_s16 + $0x74] sm:$0x1] }
  0x2a   : > { %1205 = vrot.lane.b32.xlu1 %v1024_v25, %s3052_s21  ;;  %v1067_v12 = vor.u32 %v1066_v3, %v1062_v63  ;;  %v1071_v13 = vrot.slane %v1069_v4, 1  ;;  %v1290_v20 = vsel %vm772_vm1, %v1288_v0, %v1289_v11  ;;  %v1510_v24 = vpack.c.b16 %v1494_v1, %v1494_v1  ;;  %v2965_v4 = vld [vmem:[%s3096_s16 + $0x6c] sm:$0xe]  ;;  %v3253_v0 = vld [vmem:[%s3096_s16 + $0x3c] sm:$0xff]  }
  0x2b   : > { %1445 = vrot.lane.b32.xlu0 %v3105_v2, %s3053_s22  ;;  %700 = vrot.lane.b32.xlu2 %v559_v32, %s3049_s18  ;;  %v1036_v14 = vsel %vm499_vm0, %v3138_v27, %v1035_v7  ;;  %v1540_v25 = vshll.u32 %v2605_v60, 16  ;;  %v3221_v27 = vld [vmem:[%s3096_s16 + $0x48] sm:$0xff]   ;;  %v1538_v32 = vshrl.u32 %v2605_v60, 16  ;;  %v1513_v35 = vpack.c.b16 %v1497_v28, %v1497_v28  ;;  %v3256_v11 = vld [vmem:[%s3096_s16 + $0x3c] sm:$0xf0] }
  0x2c   : > { %v1072_v21 = vsel %vm499_vm0, %v1067_v12, %v1071_v13  ;;  %v1576_v29 = vshll.u32 %v3221_v27, 16  ;;  %v1545_v34 = vshll.u32 %v1510_v24, 16  ;;  %v1574_v37 = vshrl.u32 %v3221_v27, 16 }
  0x2d   : > { %v1542_v33 = vrot.slane %v1540_v25, 1  ;;  %v1581_v40 = vshll.u32 %v1513_v35, 16  ;;  %v599_v50 = vshll.u32 %v3230_v16, 16  ;;  %v1800_v52 = vrot.slane %v2963_v39, 1 }
  0x2e   : > { %v1547_v42 = vrot.slane %v1545_v34, 1  ;;  %v1801_v53 = vrot.slane %v1510_v24, 1  ;;  %v2880_v56 = vor.u32 %v2879_v46, %v2878_v45  ;;  %v1810_v10 = vrot.slane %v1513_v35, 1 }
  0x2f   : > { %v1543_v41 = vor.u32 %v1542_v33, %v1538_v32  ;;  %v601_v61 = vrot.slane %v599_v50, 1  ;;  %v2966_v25 = vor.u32 %v2965_v4, %v2964_v44  ;;  %v561_v44 = vshrl.u32 %v3253_v0, 16 }
  0x30   : > { %v1802_v63 = vsel %vm772_vm1, %v1800_v52, %v1801_v53  ;;  %v1809_v7 = vrot.slane %v2880_v56, 1  ;;  %v3282_v53 = vld [vmem:[%s3096_s16 + $0x24] sm:$0xff]   ;;  %v2827_v56 = vld [vmem:[%s3096_s16 + $0x18] sm:$0xf0] }
  0x31   : > { %v1548_v55 = vsel %vm499_vm0, %v1543_v41, %v1547_v42  ;;  %v1309_v35 = vrot.slane %v2966_v25, 1  ;;  %v563_v42 = vshll.u32 %v3253_v0, 16 }
  0x32   : > { %1717 = vrot.lane.b32.xlu1 %v1536_v43, %s3054_s23  ;;  %v475_v43 = vunpack.c.l.b16 %v217_v36 }
  0x33   : > { %823 = vrot.lane.b32.xlu0 %v778_v48, %s3050_s19  ;;  %1845 = vrot.lane.b32.xlu2 %v1799_v49, %s3055_s24  ;;  %v2837_v48 = vld [vmem:[%s3096_s16 + $0x60] sm:$0xe]  ;;  %v2555_v49 = vld [vmem:[%s3096_s16 + $0x6c] sm:$0xff]   ;;  %v565_v50 = vrot.slane %v563_v42, 1 }
  0x34   : > { %v491_v57 = vpack.c.b16 %v475_v43, %v475_v43  ;;  %v2838_v58 = vor.u32 %v2837_v48, %v2836_v47  ;;  %v1112_v19 = vshll.u32 %v2555_v49, 16  ;;  %v2854_v42 = vld [vmem:[%s3096_s16 + $0x48] sm:$0xf0] }
  0x36   : > { %v604_v62 = vshll.u32 %v491_v57, 16  ;;  %v797_v12 = vrot.slane %v2838_v58, 1  ;;  %v798_v13 = vrot.slane %v491_v57, 1  ;;  %v1114_v32 = vrot.slane %v1112_v19, 1  ;;  %v2828_v57 = vld [vmem:[%s3096_s16 + $0x18] sm:$0xe] }
  0x37   : > { %v2576_v19 = vld [vmem:[%s3096_s16 + $0x50] sm:$0x1] }
  0x38   : > { %v606_v1 = vrot.slane %v604_v62, 1 }
  0x3a   : > { %829 = vrot.lane.b32.xlu1 %v787_v54, %s3050_s19  ;;  %v1583_v54 = vrot.slane %v1581_v40, 1 }
  0x3b   : > { %941 = vrot.lane.b32.xlu0 %v2547_v38, %s3048_s17  ;;  %935 = vrot.lane.b32.xlu2 %v3105_v2, %s3048_s17  ;;  %v1297_v2 = vrot.slane %v2960_v18, 1  ;;  %v1578_v38 = vrot.slane %v1576_v29, 1  ;;  %v1110_v29 = vshrl.u32 %v2555_v49, 16 }
  0x3d   : > { %v1299_v31 = vsel %vm772_vm1, %v1297_v2, %v1298_v22  ;;  %v3242_v51 = vor.u32 %v1578_v38, %v1574_v37  ;;  %v214_v2 = vld [vmem:[%s3096_s16 + $0x44] sm:$0x1]  ;;  %v799_v22 = vsel %vm772_vm1, %v797_v12, %v798_v13  ;;  %v1115_v39 = vor.u32 %v1114_v32, %v1110_v29 }
  0x3e   : > { %v472_v34 = vunpack.c.l.b16 %v214_v2  ;;  %v1040_v2 = vshll.u32 %v3282_v53, 16  ;;  %v1038_v32 = vshrl.u32 %v3282_v53, 16 }
  0x3f   : > { %v1584_v3 = vsel %vm499_vm0, %v3242_v51, %v1583_v54  ;;  %v3285_v54 = vld [vmem:[%s3096_s16 + $0x24] sm:$0xf0] }
  0x40   : > { %v488_v41 = vpack.c.b16 %v472_v34, %v472_v34  ;;  %v1042_v34 = vrot.slane %v1040_v2, 1 }
  0x42   : > { %1207 = vrot.lane.b32.xlu1 %v1036_v14, %s3052_s21  ;;  %v989_v14 = vunpack.c.l.b16 %v2579_v59  ;;  %v568_v52 = vshll.u32 %v488_v41, 16  ;;  %v789_v25 = vrot.slane %v488_v41, 1 }
  0x43   : > { %1335 = vrot.lane.b32.xlu0 %v1290_v20, %s3051_s20  ;;  %1213 = vrot.lane.b32.xlu2 %v1072_v21, %s3052_s21  ;;  %v2643_v20 = vld [vmem:[%s3096_s16 + $0x80] sm:$0x1]  ;;  %v1811_v21 = vsel %vm772_vm1, %v1809_v7, %v1810_v10 }
  0x44   : > { %v1005_v24 = vpack.c.b16 %v989_v14, %v989_v14  ;;  %v1501_v28 = vunpack.c.l.b16 %v2643_v20  ;;  %v570_v62 = vrot.slane %v568_v52, 1 }
  0x46   : > { %v1117_v33 = vshll.u32 %v1005_v24, 16  ;;  %v1310_v36 = vrot.slane %v1005_v24, 1  ;;  %v1517_v38 = vpack.c.b16 %v1501_v28, %v1501_v28 }
  0x48   : > { %v1119_v40 = vrot.slane %v1117_v33, 1  ;;  %v1311_v43 = vsel %vm772_vm1, %v1309_v35, %v1310_v36  ;;  %v1629_v47 = vshll.u32 %v1517_v38, 16 }
  0x4a   : > { %1341 = vrot.lane.b32.xlu1 %v1299_v31, %s3051_s20  ;;  %v3270_v31 = vld [vmem:[%s3096_s16 + $0x78] sm:$0xff]   ;;  %v1120_v48 = vsel %vm499_vm0, %v1115_v39, %v1119_v40  ;;  %v1631_v59 = vrot.slane %v1629_v47, 1  ;;  %v1043_v40 = vor.u32 %v1042_v34, %v1038_v32  ;;  %v2875_v32 = vld [vmem:[%s3096_s16 + $0x30] sm:$0xf0] }
  0x4b   : > { %1453 = vrot.lane.b32.xlu0 %v3221_v27, %s3053_s22  ;;  %1447 = vrot.lane.b32.xlu2 %v2605_v60, %s3053_s22  ;;  %v597_v60 = vshrl.u32 %v3230_v16, 16  ;;  %v1624_v37 = vshll.u32 %v3270_v31, 16  ;;  %v1622_v45 = vshrl.u32 %v3270_v31, 16 }
  0x4d   : > { %v3260_v18 = vor.u32 %v601_v61, %v597_v60  ;;  %v1626_v46 = vrot.slane %v1624_v37, 1  ;;  %v2885_v60 = vld [vmem:[%s3096_s16 + $0x78] sm:$0xe]  ;;  %v566_v61 = vor.u32 %v565_v50, %v561_v44 }
  0x4e   : > { %v3331_v44 = vld [vmem:[%s3096_s16 + $0x54] sm:$0xff]  }
  0x4f   : > { %v607_v26 = vsel %vm499_vm0, %v3260_v18, %v606_v1  ;;  %v3291_v58 = vor.u32 %v1626_v46, %v1622_v45  ;;  %v571_v10 = vsel %vm499_vm0, %v566_v61, %v570_v62  ;;  %v780_v1 = vrot.slane %v3129_v17, 1  ;;  %v2704_v45 = vld [vmem:[%s4286_s1 + $0x18] sm:$0xff] }
  0x50   : > { %v3334_v50 = vld [vmem:[%s3096_s16 + $0x54] sm:$0xf0] }
  0x51   : > { %v1632_v4 = vsel %vm499_vm0, %v3291_v58, %v1631_v59  ;;  %v2703_v59 = vld [vmem:[%s4286_s1 + $0x10] sm:$0xff] }
  0x52   : > { %1719 = vrot.lane.b32.xlu1 %v1548_v55, %s3054_s23  ;;  %v2968_v55 = vld [vmem:[%s3096_s16 + $0x3c] sm:$0xe] }
  0x53   : > { %1847 = vrot.lane.b32.xlu0 %v1802_v63, %s3055_s24  ;;  %1725 = vrot.lane.b32.xlu2 %v1584_v3, %s3054_s23  ;;  %v2829_v63 = vor.u32 %v2828_v57, %v2827_v56  ;;  %v2573_v3 = vld [vmem:[%s3096_s16 + $0x2c] sm:$0x1]  ;;  %v2969_v13 = vor.u32 %v2968_v55, %v3256_v11  ;;  %v2149_v11 = vld [vmem:[%s4286_s1 + $0x20] sm:$0xf] }
  0x54   : > { %v983_v12 = vunpack.c.l.b16 %v2573_v3  ;;  %v2167_v28 = vunpack.c.l.b16 %v2149_v11  ;;  %v3351_v3 = vld [vmem:[%s3096_s16 + $0x6c] sm:$0xff]   ;;  %v1586_v11 = vshrl.u32 %v3331_v44, 16 }
  0x55   : > { %v779_v14 = vrot.slane %v2829_v63, 1  ;;  %v788_v24 = vrot.slane %v2969_v13, 1  ;;  %v2974_v13 = vld [vmem:[%s3096_s16 + $0x54] sm:$0xe] }
  0x56   : > { %v2172_v33 = vpack.c.b16 %v2167_v28, %v2167_v28  ;;  %v2975_v34 = vor.u32 %v2974_v13, %v3334_v50  ;;  %v2842_v13 = vld [vmem:[%s3096_s16 + $0x90] sm:$0xf0] }
  0x57   : > { %v781_v17 = vsel %vm772_vm1, %v779_v14, %v780_v1  ;;  %v790_v36 = vsel %vm772_vm1, %v788_v24, %v789_v25 }
  0x58   : > { %v2212_v39 = vsel %vm2210_vm2, %v2172_v33, 0  ;;  %v2876_v33 = vld [vmem:[%s3096_s16 + $0x30] sm:$0xe] }
  0x59   : > { %2217 = vmatpush.bf16.msra.mxu0 %v2212_v39  ;;  %2896 = vmatpush.bf16.msra.mxu1 %v2212_v39 }
  0x5a   : > { %1853 = vrot.lane.b32.xlu1 %v1811_v21, %s3055_s24  ;;  %v1822_v21 = vrot.slane %v1517_v38, 1  ;;  %v2971_v38 = vld [vmem:[%s3096_s16 + $0x24] sm:$0xe]  ;;  %2897 = vmatpush.bf16.msra.mxu2 %v2212_v39 }
  0x5b   : > { %837 = vrot.lane.b32.xlu0 %v799_v22, %s3050_s19  ;;  %708 = vrot.lane.b32.xlu2 %v607_v26, %s3049_s18  ;;  %v3308_v22 = vpack.c.b16 %v983_v12, %v983_v12  ;;  %v986_v26 = vunpack.c.l.b16 %v2576_v19  ;;  %v2972_v57 = vor.u32 %v2971_v38, %v3285_v54 }
  0x5c   : > { %2898 = vmatpush.bf16.msra.mxu3 %v2212_v39  ;;  %v2977_v39 = vld [vmem:[%s3096_s16 + $0x6c] sm:$0xe] }
  0x5d   : > { %v1045_v35 = vshll.u32 %v3308_v22, 16  ;;  %v1002_v37 = vpack.c.b16 %v986_v26, %v986_v26  ;;  %2218 = vmatpush.bf16.msra.mxu0 %v2704_v45  ;;  %2899 = vmatpush.bf16.msra.mxu1 %v2704_v45  ;;  %v1291_v62 = vrot.slane %v2972_v57, 1  ;;  %v1292_v63 = vrot.slane %v3308_v22, 1 }
  0x5e   : > { %2900 = vmatpush.bf16.msra.mxu2 %v2704_v45  ;;  %v1588_v22 = vshll.u32 %v3331_v44, 16 }
  0x5f   : > { %v1047_v41 = vrot.slane %v1045_v35, 1  ;;  %v1081_v47 = vshll.u32 %v1002_v37, 16  ;;  %v1301_v61 = vrot.slane %v1002_v37, 1  ;;  %v1293_v19 = vsel %vm772_vm1, %v1291_v62, %v1292_v63  ;;  %v221_v37 = vld [vmem:[%s3096_s16 + $0x98] sm:$0x1] }
  0x60   : > { %2901 = vmatpush.bf16.msra.mxu3 %v2704_v45  ;;  %v1590_v28 = vrot.slane %v1588_v22, 1  ;;  %v479_v50 = vunpack.c.l.b16 %v221_v37 }
  0x61   : > { %v1048_v55 = vsel %vm499_vm0, %v1043_v40, %v1047_v41  ;;  %2219 = vmatpush.bf16.msra.mxu0 %v2703_v59  ;;  %2902 = vmatpush.bf16.msra.mxu1 %v2703_v59  ;;  %v2877_v40 = vor.u32 %v2876_v33, %v2875_v32 }
  0x62   : > { %949 = vrot.lane.b32.xlu1 %v2555_v49, %s3048_s17  ;;  %v2884_v49 = vld [vmem:[%s3096_s16 + $0x78] sm:$0xf0]  ;;  %2903 = vmatpush.bf16.msra.mxu2 %v2703_v59  ;;  %v1591_v41 = vor.u32 %v1590_v28, %v1586_v11 }
  0x63   : > { %1349 = vrot.lane.b32.xlu0 %v1311_v43, %s3051_s20  ;;  %1221 = vrot.lane.b32.xlu2 %v1120_v48, %s3052_s21  ;;  %v2886_v7 = vor.u32 %v2885_v60, %v2884_v49  ;;  %v2855_v43 = vld [vmem:[%s3096_s16 + $0x48] sm:$0xe]  ;;  %v2637_v48 = vld [vmem:[%s3096_s16 + $0x38] sm:$0x1]  ;;  %v1083_v49 = vrot.slane %v1081_v47, 1  ;;  %v1812_v47 = vrot.slane %v2975_v34, 1 }
  0x64   : > { %v2856_v52 = vor.u32 %v2855_v43, %v2854_v42  ;;  %v1495_v56 = vunpack.c.l.b16 %v2637_v48  ;;  %v2640_v60 = vld [vmem:[%s3096_s16 + $0x5c] sm:$0x1]  ;;  %2904 = vmatpush.bf16.msra.mxu3 %v2703_v59  ;;  %v3391_v43 = vld [vmem:[%s3096_s16 + $0x90] sm:$0xff]   ;;  %v2583_v34 = vld [vmem:[%s3096_s16 + $0xa4] sm:$0x1] }
  0x65   : > { %v1821_v20 = vrot.slane %v2886_v7, 1  ;;  %v2702_v7 = vld [vmem:[%s4286_s1 + $0x8] sm:$0xff]  ;;  %v1498_v12 = vunpack.c.l.b16 %v2640_v60  ;;  %v647_v57 = vshll.u32 %v3391_v43, 16 }
  0x66   : > { %v3347_v54 = vpack.c.b16 %v1495_v56, %v1495_v56  ;;  %2220 = vmatpush.bf16.msra.mxu0 %v2702_v7  ;;  %2905 = vmatpush.bf16.msra.mxu1 %v2702_v7 }
  0x67   : > { %v1823_v29 = vsel %vm772_vm1, %v1821_v20, %v1822_v21  ;;  %v218_v20 = vld [vmem:[%s3096_s16 + $0x74] sm:$0x1]  ;;  %v2701_v21 = vld [vmem:[%s4286_s1] sm:$0xff]  ;;  %2906 = vmatpush.bf16.msra.mxu2 %v2702_v7  ;;  %v1514_v2 = vpack.c.b16 %v1498_v12, %v1498_v12 }
  0x68   : > { %v1557_v1 = vshll.u32 %v3347_v54, 16  ;;  %2907 = vmatpush.bf16.msra.mxu3 %v2702_v7  ;;  %v476_v24 = vunpack.c.l.b16 %v218_v20  ;;  %v1804_v56 = vrot.slane %v3347_v54, 1  ;;  %v645_v7 = vshrl.u32 %v3391_v43, 16  ;;  %v3417_v20 = vld [vmem:[%s3096_s16 + $0x9c] sm:$0xf0] }
  0x69   : > { %v1813_v48 = vrot.slane %v1514_v2, 1 }
  0x6a   : > { %1461 = vrot.lane.b32.xlu1 %v3270_v31, %s3053_s22  ;;  %2221 = vmatpush.bf16.msra.mxu0 %v2701_v21  ;;  %v1559_v25 = vrot.slane %v1557_v1, 1  ;;  %v492_v35 = vpack.c.b16 %v476_v24, %v476_v24 }
  0x6b   : > { %1733 = vrot.lane.b32.xlu0 %v1632_v4, %s3054_s23  ;;  %702 = vrot.lane.b32.xlu2 %v571_v10, %s3049_s18  ;;  %v3354_v4 = vld [vmem:[%s3096_s16 + $0x6c] sm:$0xf0]  ;;  %v1084_v10 = vsel %vm499_vm0, %v3242_v51, %v1083_v49 }
  0x6c   : > { %2908 = vmatpush.bf16.msra.mxu1 %v2701_v21  ;;  %2909 = vmatpush.bf16.msra.mxu2 %v2701_v21  ;;  %v1560_v38 = vsel %vm499_vm0, %v3175_v23, %v1559_v25  ;;  %v616_v23 = vshll.u32 %v492_v35, 16  ;;  %v2978_v63 = vor.u32 %v2977_v39, %v3354_v4  ;;  %v801_v22 = vrot.slane %v492_v35, 1 }
  0x6d   : > { %2910 = vmatpush.bf16.msra.mxu3 %v2701_v21  ;;  %v2580_v21 = vld [vmem:[%s3096_s16 + $0x80] sm:$0x1] }
  0x6e   : > { %v618_v62 = vrot.slane %v616_v23, 1  ;;  %v990_v33 = vunpack.c.l.b16 %v2580_v21 }
  0x70   : > { %v1006_v39 = vpack.c.b16 %v990_v33, %v990_v33  ;;  %v2644_v33 = vld [vmem:[%s3096_s16 + $0x8c] sm:$0x1] }
  0x72   : > { %825 = vrot.lane.b32.xlu1 %v781_v17, %s3050_s19 }
  0x73   : > { %1861 = vrot.lane.b32.xlu0 %v1823_v29, %s3055_s24  ;;  %831 = vrot.lane.b32.xlu2 %v790_v36, %s3050_s19  ;;  %v1593_v29 = vshll.u32 %v1514_v2, 16  ;;  %v611_v36 = vshll.u32 %v3351_v3, 16  ;;  %v800_v2 = vrot.slane %v2978_v63, 1  ;;  %v3456_v63 = vld [vmem:[%s3096_s16 + $0x84] sm:$0xf0] }
  0x75   : > { %v3327_v46 = vpop.permute.xlu2 %821  ;;  %v1595_v42 = vrot.slane %v1593_v29, 1  ;;  %v802_v35 = vsel %vm772_vm1, %v800_v2, %v801_v22 }
  0x77   : > { %v1596_v49 = vsel %vm499_vm0, %v1591_v41, %v1595_v42  ;;  %v993_v41 = vunpack.c.l.b16 %v2583_v34 }
  0x7a   : > { %937 = vrot.lane.b32.xlu1 %v3282_v53, %s3048_s17  ;;  %v1300_v53 = vrot.slane %v2856_v52, 1  ;;  %v613_v52 = vrot.slane %v611_v36, 1 }
  0x7b   : > { %1209 = vrot.lane.b32.xlu0 %v1048_v55, %s3052_s21  ;;  %943 = vrot.lane.b32.xlu2 %v3221_v27, %s3048_s17  ;;  %v1803_v55 = vrot.slane %v2877_v40, 1 }
  0x7c   : > { %v1302_v14 = vsel %vm772_vm1, %v1300_v53, %v1301_v61  ;;  %v1814_v53 = vsel %vm772_vm1, %v1812_v47, %v1813_v48  ;;  %v2860_v48 = vld [vmem:[%s3096_s16 + $0x78] sm:$0xf0] }
  0x7d   : > { %v3361_v27 = vpop.permute.xlu2 %1333  ;;  %v1805_v54 = vsel %vm772_vm1, %v1803_v55, %v1804_v56  ;;  %v1129_v55 = vshll.u32 %v1006_v39, 16  ;;  %v1009_v56 = vpack.c.b16 %v993_v41, %v993_v41 }
  0x82   : > { %1215 = vrot.lane.b32.xlu1 %v1084_v10, %s3052_s21  ;;  %v649_v10 = vrot.slane %v647_v57, 1 }
  0x83   : > { %1343 = vrot.lane.b32.xlu0 %v1302_v14, %s3051_s20  ;;  %1337 = vrot.lane.b32.xlu2 %v1293_v19, %s3051_s20  ;;  %v3376_v17 = vpop.permute.xlu0 %933  ;;  %v2843_v14 = vld [vmem:[%s3096_s16 + $0x90] sm:$0xe]  ;;  %v3414_v19 = vld [vmem:[%s3096_s16 + $0x9c] sm:$0xff]  }
  0x84   : > { %v2844_v24 = vor.u32 %v2843_v14, %v2842_v13  ;;  %v3423_v25 = vor.u32 %v649_v10, %v645_v7  ;;  %v215_v10 = vld [vmem:[%s3096_s16 + $0x50] sm:$0x1]  ;;  %v1313_v13 = vrot.slane %v1006_v39, 1 }
  0x85   : > { %v3378_v26 = vpop.permute.xlu2 %700 }
  0x86   : > { %v809_v37 = vrot.slane %v2844_v24, 1 }
  0x8a   : > { %1449 = vrot.lane.b32.xlu1 %v3165_v5, %s3053_s22  ;;  %v609_v5 = vshrl.u32 %v3351_v3, 16 }
  0x8b   : > { %1721 = vrot.lane.b32.xlu0 %v1560_v38, %s3054_s23  ;;  %1455 = vrot.lane.b32.xlu2 %v3331_v44, %s3053_s22  ;;  %v495_v44 = vpack.c.b16 %v479_v50, %v479_v50  ;;  %v2861_v50 = vld [vmem:[%s3096_s16 + $0x78] sm:$0xe] }
  0x8c   : > { %v3393_v45 = vpop.permute.xlu1 %696  ;;  %v614_v61 = vor.u32 %v613_v52, %v609_v5 }
  0x8d   : > { %v693_v59 = vpop.permute.xlu0 %692  ;;  %v3402_v60 = vpop.permute.xlu2 %1845  ;;  %v652_v12 = vshll.u32 %v495_v44, 16  ;;  %v810_v38 = vrot.slane %v495_v44, 1 }
  0x8e   : > { %v619_v4 = vsel %vm499_vm0, %v614_v61, %v618_v62  ;;  %v1879_v28 = vsel %vm1877_vm3, %v3110_v6, %v693_v59  ;;  %v2862_v59 = vor.u32 %v2861_v50, %v2860_v48  ;;  %v1131_v61 = vrot.slane %v1129_v55, 1  ;;  %v2621_v62 = vld [vmem:[%s3096_s16 + $0x84] sm:$0xff]  }
  0x8f   : > { %v654_v11 = vrot.slane %v652_v12, 1  ;;  %v1912_v36 = vsel %vm1910_vm4, %v1879_v28, %v3327_v46  ;;  %v1160_v46 = vshll.u32 %v3414_v19, 16  ;;  %v811_v52 = vsel %vm772_vm1, %v809_v37, %v810_v38  ;;  %v2647_v28 = vld [vmem:[%s3096_s16 + $0xb0] sm:$0x1]  ;;  %v2983_v50 = vld [vmem:[%s3096_s16 + $0x24] sm:$0xe] }
  0x90   : > { %v1945_v42 = vsel %vm1943_vm5, %v1912_v36, %v3376_v17  ;;  %v2980_v17 = vld [vmem:[%s3096_s16 + $0x9c] sm:$0xe]  ;;  %v1312_v12 = vrot.slane %v2862_v59, 1  ;;  %v1132_v22 = vsel %vm499_vm0, %v3291_v58, %v1131_v61  ;;  %v1505_v36 = vunpack.c.l.b16 %v2647_v28  ;;  %v2890_v28 = vld [vmem:[%s3096_s16 + $0xa8] sm:$0xf0] }
  0x91   : > { %v655_v6 = vsel %vm499_vm0, %v3423_v25, %v654_v11  ;;  %v1162_v44 = vrot.slane %v1160_v46, 1  ;;  %v473_v11 = vunpack.c.l.b16 %v215_v10  ;;  %v1322_v58 = vrot.slane %v1009_v56, 1 }
  0x92   : > { %1727 = vrot.lane.b32.xlu1 %v1596_v49, %s3054_s23  ;;  %v1158_v49 = vshrl.u32 %v3414_v19, 16  ;;  %v3490_v39 = vpack.c.b16 %v1505_v36, %v1505_v36 }
  0x93   : > { %1855 = vrot.lane.b32.xlu0 %v1814_v53, %s3055_s24  ;;  %1849 = vrot.lane.b32.xlu2 %v1805_v54, %s3055_s24  ;;  %v1165_v53 = vshll.u32 %v1009_v56, 16  ;;  %v3483_v37 = vpack.c.b16 %v473_v11, %v473_v11  ;;  %v1634_v56 = vshrl.u32 %v2621_v62, 16 }
  0x94   : > { %v3411_v1 = vpop.permute.xlu1 %698  ;;  %v1163_v14 = vor.u32 %v1162_v44, %v1158_v49  ;;  %v1677_v55 = vshll.u32 %v3490_v39, 16 }
  0x95   : > { %v3427_v29 = vpop.permute.xlu0 %694  ;;  %v3429_v32 = vpop.permute.xlu2 %935  ;;  %v580_v48 = vshll.u32 %v3483_v37, 16 }
  0x96   : > { %v1679_v61 = vrot.slane %v1677_v55, 1  ;;  %v2577_v55 = vld [vmem:[%s3096_s16 + $0x5c] sm:$0x1] }
  0x97   : > { %v582_v49 = vrot.slane %v580_v48, 1  ;;  %v2809_v48 = vld [vmem:[%s3096_s16 + $0x30] sm:$0xff]  }
  0x9a   : > { %710 = vrot.lane.b32.xlu1 %v619_v4, %s3049_s18  ;;  %v1167_v4 = vrot.slane %v1165_v53, 1 }
  0x9b   : > { %839 = vrot.lane.b32.xlu0 %v802_v35, %s3050_s19  ;;  %716 = vrot.lane.b32.xlu2 %v655_v6, %s3049_s18  ;;  %v1502_v35 = vunpack.c.l.b16 %v2644_v33  ;;  %v2891_v33 = vld [vmem:[%s3096_s16 + $0xa8] sm:$0xe] }
  0x9c   : > { %v1206_v40 = vpop.permute.xlu1 %1205  ;;  %v1168_v34 = vsel %vm499_vm0, %v1163_v14, %v1167_v4  ;;  %v2833_v14 = vld [vmem:[%s3096_s16 + $0x48] sm:$0xf0] }
  0x9d   : > { %v1978_v47 = vsel %vm1976_vm6, %v1945_v42, %v1206_v40  ;;  %v1446_v5 = vpop.permute.xlu0 %1445  ;;  %v3447_v23 = vpop.permute.xlu2 %1213  ;;  %v1636_v40 = vshll.u32 %v2621_v62, 16  ;;  %v1518_v41 = vpack.c.b16 %v1502_v35, %v1502_v35  ;;  %v3530_v35 = vld [vmem:[%s3096_s16 + $0x54] sm:$0xff]  }
  0x9e   : > { %v2011_v57 = vsel %vm2009_vm7, %v1978_v47, %v3361_v27 }
  0x9f   : > { %v2044_v54 = vsel %vm2042_vm8, %v2011_v57, %v1446_v5  ;;  %v1638_v57 = vrot.slane %v1636_v40, 1  ;;  %v1641_v59 = vshll.u32 %v1518_v41, 16  ;;  %v1825_v36 = vrot.slane %v1518_v41, 1 }
  0xa0   : > { %v792_v40 = vrot.slane %v3483_v37, 1 }
  0xa2   : > { %845 = vrot.lane.b32.xlu1 %v811_v52, %s3050_s19 }
  0xa3   : > { %957 = vrot.lane.b32.xlu0 %v3414_v19, %s3048_s17  ;;  %951 = vrot.lane.b32.xlu2 %v3270_v31, %s3048_s17  ;;  %v2981_v19 = vor.u32 %v2980_v17, %v3417_v20  ;;  %v1314_v31 = vsel %vm772_vm1, %v1312_v12, %v1313_v13  ;;  %v2986_v17 = vld [vmem:[%s3096_s16 + $0x84] sm:$0xe]  ;;  %v2984_v13 = vor.u32 %v2983_v50, %v3117_v9  ;;  %v2947_v50 = vld [vmem:[%s3096_s16 + $0x30] sm:$0xff]  }
  0xa4   : > { %v1718_v7 = vpop.permute.xlu1 %1717 }
  0xa5   : > { %v2077_v27 = vsel %vm2075_vm9, %v2044_v54, %v1718_v7  ;;  %v3468_v2 = vpop.permute.xlu0 %823  ;;  %v3472_v24 = vpop.permute.xlu2 %1447  ;;  %v1321_v6 = vrot.slane %v2981_v19, 1  ;;  %v1639_v54 = vor.u32 %v1638_v57, %v1634_v56  ;;  %v1643_v7 = vrot.slane %v1641_v59, 1 }
  0xa6   : > { %v2110_v21 = vsel %vm2108_vm10, %v2077_v27, %v3402_v60  ;;  %v3480_v60 = vld [vmem:[%s3096_s16 + $0xa8] sm:$0xff]   ;;  %v583_v27 = vsel %vm499_vm0, %v3242_v51, %v582_v49  ;;  %v782_v11 = vrot.slane %v2984_v13, 1  ;;  %v783_v51 = vrot.slane %v3140_v30, 1  ;;  %v3533_v30 = vld [vmem:[%s3096_s16 + $0x54] sm:$0xf0] }
  0xa7   : > { %2683 = vmatmul.msk.bf16.vlgmr.msra.gmra.mxu0 %vm2177_vm11, %v2110_v21  ;;  %v1672_v20 = vshll.u32 %v3480_v60, 16  ;;  %v1323_v46 = vsel %vm772_vm1, %v1321_v6, %v1322_v58  ;;  %v1670_v5 = vshrl.u32 %v3480_v60, 16  ;;  %v2834_v21 = vld [vmem:[%s3096_s16 + $0x48] sm:$0xe]  ;;  %v2892_v58 = vor.u32 %v2891_v33, %v2890_v28  ;;  %v2852_v13 = vld [vmem:[%s3096_s16 + $0x30] sm:$0xe] }
  0xa8   : > { %v2835_v19 = vor.u32 %v2834_v21, %v2833_v14  ;;  %v1834_v56 = vrot.slane %v3490_v39, 1  ;;  %v1052_v49 = vshll.u32 %v2809_v48, 16  ;;  %v3575_v28 = vld [vmem:[%s3096_s16 + $0x3c] sm:$0xff]  }
  0xa9   : > { %v1674_v52 = vrot.slane %v1672_v20, 1  ;;  %v1833_v37 = vrot.slane %v2892_v58, 1  ;;  %v2991_v33 = vld [vmem:[%s3096_s16 + $0x3c] sm:$0xf0] }
  0xaa   : > { %1223 = vrot.lane.b32.xlu1 %v1132_v22, %s3052_s21  ;;  %v1644_v22 = vsel %vm499_vm0, %v1639_v54, %v1643_v7  ;;  %v791_v20 = vrot.slane %v2835_v19, 1  ;;  %v987_v54 = vunpack.c.l.b16 %v2577_v55  ;;  %v1088_v7 = vshll.u32 %v3530_v35, 16 }
  0xab   : > { %1351 = vrot.lane.b32.xlu0 %v1314_v31, %s3051_s20  ;;  %1229 = vrot.lane.b32.xlu2 %v1168_v34, %s3052_s21  ;;  %v3506_v53 = vor.u32 %v1674_v52, %v1670_v5  ;;  %v2574_v31 = vld [vmem:[%s3096_s16 + $0x38] sm:$0x1]  ;;  %v1887_v5 = vsel %vm1877_vm3, %v2947_v50, %v3378_v26 }
  0xac   : > { %v3485_v38 = vpop.permute.xlu1 %829  ;;  %v984_v41 = vunpack.c.l.b16 %v2574_v31  ;;  %v793_v57 = vsel %vm772_vm1, %v791_v20, %v792_v40  ;;  %v2638_v40 = vld [vmem:[%s3096_s16 + $0x44] sm:$0x1] }
  0xad   : > { %v3492_v42 = vpop.permute.xlu0 %941  ;;  %v3495_v47 = vpop.permute.xlu2 %1725  ;;  %v1680_v4 = vsel %vm499_vm0, %v3506_v53, %v1679_v61  ;;  %v1920_v26 = vsel %vm1910_vm4, %v1887_v5, %v3485_v38  ;;  %v1835_v38 = vsel %vm772_vm1, %v1833_v37, %v1834_v56  ;;  %v2992_v37 = vld [vmem:[%s3096_s16 + $0x3c] sm:$0xe] }
  0xae   : > { %v1953_v61 = vsel %vm1943_vm5, %v1920_v26, %v3492_v42 }
  0xaf   : > { %v1986_v42 = vsel %vm1976_vm6, %v1953_v61, %v3447_v23 }
  0xb2   : > { %1357 = vrot.lane.b32.xlu1 %v1323_v46, %s3051_s20 }
  0xb3   : > { %1469 = vrot.lane.b32.xlu0 %v3480_v60, %s3053_s22  ;;  %1463 = vrot.lane.b32.xlu2 %v2621_v62, %s3053_s22  ;;  %v2987_v62 = vor.u32 %v2986_v17, %v3456_v63  ;;  %v1881_v63 = vsel %vm1877_vm3, %v3124_v15, %v3427_v29  ;;  %v784_v29 = vsel %vm772_vm1, %v782_v11, %v783_v51 }
  0xb4   : > { %v1208_v44 = vpop.permute.xlu1 %1207  ;;  %v1914_v6 = vsel %vm1910_vm4, %v1881_v63, %v3468_v2  ;;  %v1003_v51 = vpack.c.b16 %v987_v54, %v987_v54  ;;  %v1086_v63 = vshrl.u32 %v3530_v35, 16 }
  0xb5   : > { %v1336_v10 = vpop.permute.xlu0 %1335  ;;  %v3510_v12 = vpop.permute.xlu2 %708  ;;  %v1824_v34 = vrot.slane %v2987_v62, 1  ;;  %v1947_v52 = vsel %vm1943_vm5, %v1914_v6, %v3429_v32  ;;  %v1000_v32 = vpack.c.b16 %v984_v41, %v984_v41 }
  0xb6   : > { %v1980_v17 = vsel %vm1976_vm6, %v1947_v52, %v1208_v44 }
  0xb7   : > { %v1826_v2 = vsel %vm772_vm1, %v1824_v34, %v1825_v36  ;;  %v2013_v59 = vsel %vm2009_vm7, %v1980_v17, %v1336_v10  ;;  %v1050_v10 = vshrl.u32 %v2809_v48, 16  ;;  %v1090_v34 = vrot.slane %v1088_v7, 1  ;;  %v2641_v17 = vld [vmem:[%s3096_s16 + $0x68] sm:$0x1] }
  0xb8   : > { %v2046_v39 = vsel %vm2042_vm8, %v2013_v59, %v3472_v24  ;;  %v2989_v24 = vld [vmem:[%s3096_s16 + $0x54] sm:$0xe]  ;;  %v1093_v36 = vshll.u32 %v1003_v51, 16  ;;  %v1295_v41 = vrot.slane %v1000_v32, 1  ;;  %v3603_v59 = vld [vmem:[%s3096_s16 + $0x9c] sm:$0xf0]  ;;  %v1499_v61 = vunpack.c.l.b16 %v2641_v17 }
  0xb9   : > { %v2990_v50 = vor.u32 %v2989_v24, %v3533_v30  ;;  %v1091_v5 = vor.u32 %v1090_v34, %v1086_v63  ;;  %v3600_v30 = vld [vmem:[%s3096_s16 + $0x9c] sm:$0xff]  }
  0xba   : > { %704 = vrot.lane.b32.xlu1 %v583_v27, %s3049_s18  ;;  %v2851_v27 = vld [vmem:[%s3096_s16 + $0x30] sm:$0xf0]  ;;  %v1095_v52 = vrot.slane %v1093_v36, 1  ;;  %v2881_v36 = vld [vmem:[%s3096_s16 + $0x60] sm:$0xf0] }
  0xbb   : > { %1741 = vrot.lane.b32.xlu0 %v1680_v4, %s3054_s23  ;;  %1735 = vrot.lane.b32.xlu2 %v1644_v22, %s3054_s23  ;;  %v1054_v4 = vrot.slane %v1052_v49, 1  ;;  %v1057_v22 = vshll.u32 %v1000_v32, 16  ;;  %v2853_v23 = vor.u32 %v2852_v13, %v2851_v27  ;;  %v1303_v56 = vrot.slane %v2990_v50, 1 }
  0xbc   : > { %v1342_v9 = vpop.permute.xlu1 %1341  ;;  %v1096_v26 = vsel %vm499_vm0, %v1091_v5, %v1095_v52  ;;  %v1564_v49 = vshll.u32 %v3575_v28, 16  ;;  %v657_v5 = vshrl.u32 %v3600_v30, 16 }
  0xbd   : > { %v1454_v15 = vpop.permute.xlu0 %1453  ;;  %v3539_v46 = vpop.permute.xlu2 %1221  ;;  %v2019_v19 = vsel %vm2009_vm7, %v1986_v42, %v1342_v9  ;;  %v1055_v6 = vor.u32 %v1054_v4, %v1050_v10  ;;  %v1059_v9 = vrot.slane %v1057_v22, 1  ;;  %v1562_v10 = vshrl.u32 %v3575_v28, 16  ;;  %v219_v22 = vld [vmem:[%s3096_s16 + $0x80] sm:$0x1] }
  0xbe   : > { %v2052_v31 = vsel %vm2042_vm8, %v2019_v19, %v1454_v15  ;;  %v1566_v27 = vrot.slane %v1564_v49, 1  ;;  %v1515_v42 = vpack.c.b16 %v1499_v61, %v1499_v61  ;;  %v2839_v49 = vld [vmem:[%s3096_s16 + $0x78] sm:$0xf0]  ;;  %v2840_v61 = vld [vmem:[%s3096_s16 + $0x78] sm:$0xe] }
  0xbf   : > { %v2085_v20 = vsel %vm2075_vm9, %v2052_v31, %v3495_v47 }
  0xc0   : > { %v1605_v24 = vshll.u32 %v1515_v42, 16  ;;  %v1567_v19 = vor.u32 %v1566_v27, %v1562_v10  ;;  %v2584_v10 = vld [vmem:[%s3096_s16 + $0xb0] sm:$0x1] }
  0xc2   : > { %827 = vrot.lane.b32.xlu1 %v784_v29, %s3050_s19  ;;  %v1294_v29 = vrot.slane %v2853_v23, 1 }
  0xc3   : > { %1863 = vrot.lane.b32.xlu0 %v1826_v2, %s3055_s24  ;;  %833 = vrot.lane.b32.xlu2 %v793_v57, %s3050_s19  ;;  %v1060_v2 = vsel %vm499_vm0, %v1055_v6, %v1059_v9  ;;  %v1304_v57 = vrot.slane %v1003_v51, 1  ;;  %v3619_v51 = vld [vmem:[%s3096_s16 + $0x78] sm:$0xff]   ;;  %v477_v6 = vunpack.c.l.b16 %v219_v22  ;;  %v659_v9 = vshll.u32 %v3600_v30, 16 }
  0xc4   : > { %v1720_v44 = vpop.permute.xlu1 %1719  ;;  %v621_v17 = vshrl.u32 %v3619_v51, 16  ;;  %v2841_v22 = vor.u32 %v2840_v61, %v2839_v49  ;;  %v2866_v49 = vld [vmem:[%s3096_s16 + $0xa8] sm:$0xf0]  ;;  %v2867_v61 = vld [vmem:[%s3096_s16 + $0xa8] sm:$0xe] }
  0xc5   : > { %v2079_v14 = vsel %vm2075_vm9, %v2046_v39, %v1720_v44  ;;  %v1848_v21 = vpop.permute.xlu0 %1847  ;;  %v3569_v62 = vpop.permute.xlu2 %702  ;;  %v1305_v54 = vsel %vm772_vm1, %v1303_v56, %v1304_v57  ;;  %v222_v39 = vld [vmem:[%s3096_s16 + $0xa4] sm:$0x1]  ;;  %v661_v52 = vrot.slane %v659_v9, 1  ;;  %v1816_v57 = vrot.slane %v1515_v42, 1 }
  0xc6   : > { %v2112_v11 = vsel %vm2108_vm10, %v2079_v14, %v1848_v21  ;;  %v2993_v14 = vor.u32 %v2992_v37, %v2991_v33  ;;  %v1895_v21 = vsel %vm1877_vm3, %v3230_v16, %v3510_v12  ;;  %v480_v4 = vunpack.c.l.b16 %v222_v39  ;;  %v2882_v33 = vld [vmem:[%s3096_s16 + $0x60] sm:$0xe]  ;;  %v2997_v39 = vld [vmem:[%s3096_s16 + $0x84] sm:$0xf0] }
  0xc7   : > { %2684 = vmatmul.msk.bf16.gmra.mxu0 %vm2177_vm11, %v2112_v11  ;;  %v2883_v50 = vor.u32 %v2882_v33, %v2881_v36 }
  0xc8   : > { %v1806_v63 = vrot.slane %v2993_v14, 1  ;;  %v3628_v12 = vpack.c.b16 %v480_v4, %v480_v4 }
  0xc9   : > { %v1815_v56 = vrot.slane %v2883_v50, 1 }
  0xca   : > { %1869 = vrot.lane.b32.xlu1 %v1835_v38, %s3055_s24 }
  0xcb   : > { %945 = vrot.lane.b32.xlu0 %v3530_v35, %s3048_s17  ;;  %939 = vrot.lane.b32.xlu2 %v2809_v48, %s3048_s17  ;;  %v1496_v35 = vunpack.c.l.b16 %v2638_v40  ;;  %v1296_v48 = vsel %vm772_vm1, %v1294_v29, %v1295_v41  ;;  %v1817_v4 = vsel %vm772_vm1, %v1815_v56, %v1816_v57  ;;  %v2645_v56 = vld [vmem:[%s3096_s16 + $0x98] sm:$0x1] }
  0xcc   : > { %v1854_v58 = vpop.permute.xlu1 %1853 }
  0xcd   : > { %v2118_v15 = vsel %vm2108_vm10, %v2085_v20, %v1854_v58  ;;  %v838_v47 = vpop.permute.xlu0 %837  ;;  %v3592_v55 = vpop.permute.xlu2 %831  ;;  %v1512_v32 = vpack.c.b16 %v1496_v35, %v1496_v35  ;;  %v1607_v58 = vrot.slane %v1605_v24, 1  ;;  %v623_v20 = vshll.u32 %v3619_v51, 16 }
  0xce   : > { %2687 = vmatmul.msk.bf16.vlgmr.msra.gmra.mxu1 %vm2177_vm11, %v2118_v15  ;;  %v1928_v31 = vsel %vm1910_vm4, %v1895_v21, %v838_v47  ;;  %v664_v47 = vshll.u32 %v3628_v12, 16 }
  0xcf   : > { %v1569_v13 = vshll.u32 %v1512_v32, 16  ;;  %v1807_v34 = vrot.slane %v1512_v32, 1  ;;  %v625_v37 = vrot.slane %v623_v20, 1  ;;  %v2998_v20 = vld [vmem:[%s3096_s16 + $0x84] sm:$0xe] }
  0xd1   : > { %v1571_v11 = vrot.slane %v1569_v13, 1  ;;  %v626_v13 = vor.u32 %v625_v37, %v621_v17 }
  0xd2   : > { %1211 = vrot.lane.b32.xlu1 %v1060_v2, %s3052_s21  ;;  %v1608_v2 = vsel %vm499_vm0, %v3260_v18, %v1607_v58 }
  0xd3   : > { %1339 = vrot.lane.b32.xlu0 %v1296_v48, %s3051_s20  ;;  %1217 = vrot.lane.b32.xlu2 %v1096_v26, %s3052_s21  ;;  %v1572_v29 = vsel %vm499_vm0, %v1567_v19, %v1571_v11  ;;  %v2995_v26 = vld [vmem:[%s3096_s16 + $0x9c] sm:$0xe]  ;;  %v994_v19 = vunpack.c.l.b16 %v2584_v10  ;;  %v2581_v11 = vld [vmem:[%s3096_s16 + $0x8c] sm:$0x1] }
  0xd4   : > { %v950_v44 = vpop.permute.xlu1 %949  ;;  %v991_v9 = vunpack.c.l.b16 %v2581_v11  ;;  %v2948_v10 = vld [vmem:[%s3096_s16 + $0x18] sm:$0xff]  }
  0xd5   : > { %v1350_v38 = vpop.permute.xlu0 %1349  ;;  %v3610_v7 = vpop.permute.xlu2 %943  ;;  %v1961_v40 = vsel %vm1943_vm5, %v1928_v31, %v950_v44  ;;  %v666_v44 = vrot.slane %v664_v47, 1 }
  0xd6   : > { %v1994_v35 = vsel %vm1976_vm6, %v1961_v40, %v3539_v46  ;;  %v662_v46 = vor.u32 %v661_v52, %v657_v5 }
  0xd7   : > { %v2027_v18 = vsel %vm2009_vm7, %v1994_v35, %v1350_v38  ;;  %v3682_v35 = vld [vmem:[%s3096_s16 + $0x54] sm:$0xf0] }
  0xd8   : > { %v667_v31 = vsel %vm499_vm0, %v662_v46, %v666_v44  ;;  %v216_v44 = vld [vmem:[%s3096_s16 + $0x5c] sm:$0x1] }
  0xda   : > { %1345 = vrot.lane.b32.xlu1 %v1305_v54, %s3051_s20  ;;  %v2559_v54 = vld [vmem:[%s3096_s16 + $0x84] sm:$0xff]  }
  0xdb   : > { %1457 = vrot.lane.b32.xlu0 %v3230_v16, %s3053_s22  ;;  %1451 = vrot.lane.b32.xlu2 %v3575_v28, %s3053_s22  ;;  %v1808_v16 = vsel %vm772_vm1, %v1806_v63, %v1807_v34  ;;  %v493_v28 = vpack.c.b16 %v477_v6, %v477_v6  ;;  %v2996_v63 = vor.u32 %v2995_v26, %v3603_v59  ;;  %v803_v34 = vrot.slane %v2841_v22, 1 }
  0xdc   : > { %v1462_v23 = vpop.permute.xlu1 %1461  ;;  %v3668_v6 = vpack.c.b16 %v994_v19, %v994_v19  ;;  %v1136_v58 = vshll.u32 %v2559_v54, 16  ;;  %v1134_v52 = vshrl.u32 %v2559_v54, 16  ;;  %v2868_v22 = vor.u32 %v2867_v61, %v2866_v49  ;;  %v2578_v61 = vld [vmem:[%s3096_s16 + $0x68] sm:$0x1] }
  0xdd   : > { %v1734_v15 = vpop.permute.xlu0 %1733  ;;  %v3634_v41 = vpop.permute.xlu2 %1337  ;;  %v628_v48 = vshll.u32 %v493_v28, 16  ;;  %v2060_v27 = vsel %vm2042_vm8, %v2027_v18, %v1462_v23  ;;  %v804_v36 = vrot.slane %v493_v28, 1  ;;  %v812_v40 = vrot.slane %v2996_v63, 1 }
  0xde   : > { %v2093_v14 = vsel %vm2075_vm9, %v2060_v27, %v1734_v15  ;;  %v813_v15 = vrot.slane %v3628_v12, 1  ;;  %v1007_v28 = vpack.c.b16 %v991_v9, %v991_v9  ;;  %v1138_v47 = vrot.slane %v1136_v58, 1  ;;  %v3679_v12 = vld [vmem:[%s3096_s16 + $0x54] sm:$0xff]  }
  0xdf   : > { %v630_v42 = vrot.slane %v628_v48, 1  ;;  %v805_v59 = vsel %vm772_vm1, %v803_v34, %v804_v36  ;;  %v2999_v48 = vor.u32 %v2998_v20, %v2997_v39  ;;  %v1883_v27 = vsel %vm1877_vm3, %v2948_v10, %v3393_v45 }
  0xe0   : > { %v814_v5 = vsel %vm772_vm1, %v812_v40, %v813_v15  ;;  %v1139_v57 = vor.u32 %v1138_v47, %v1134_v52  ;;  %v1316_v19 = vrot.slane %v1007_v28, 1  ;;  %v1325_v63 = vrot.slane %v3668_v6, 1 }
  0xe1   : > { %v631_v23 = vsel %vm499_vm0, %v626_v13, %v630_v42  ;;  %v3701_v13 = vld [vmem:[%s3096_s16 + $0xb4] sm:$0xff]  }
  0xe2   : > { %1723 = vrot.lane.b32.xlu1 %v1572_v29, %s3054_s23  ;;  %v3704_v42 = vld [vmem:[%s3096_s16 + $0xb4] sm:$0xf0]  ;;  %v1684_v52 = vshll.u32 %v3701_v13, 16 }
  0xe3   : > { %1851 = vrot.lane.b32.xlu0 %v1808_v16, %s3055_s24  ;;  %1729 = vrot.lane.b32.xlu2 %v1608_v2, %s3054_s23  ;;  %v1177_v16 = vshll.u32 %v3668_v6, 16  ;;  %v1141_v2 = vshll.u32 %v1007_v28, 16  ;;  %v585_v28 = vshrl.u32 %v3679_v12, 16 }
  0xe4   : > { %v3646_v32 = vpop.permute.xlu1 %825 }
  0xe5   : > { %v1862_v21 = vpop.permute.xlu0 %1861  ;;  %v3659_v38 = vpop.permute.xlu2 %1455  ;;  %v1179_v37 = vrot.slane %v1177_v16, 1  ;;  %v1143_v26 = vrot.slane %v1141_v2, 1  ;;  %v3001_v2 = vld [vmem:[%s3096_s16 + $0x54] sm:$0xe] }
  0xe6   : > { %v2126_v24 = vsel %vm2108_vm10, %v2093_v14, %v1862_v21  ;;  %v1916_v14 = vsel %vm1910_vm4, %v1883_v27, %v3646_v32  ;;  %v1315_v21 = vrot.slane %v2999_v48, 1  ;;  %v2887_v48 = vld [vmem:[%s3096_s16 + $0x90] sm:$0xf0]  ;;  %v1686_v27 = vrot.slane %v1684_v52, 1  ;;  %v3802_v52 = vld [vmem:[%s3096_s16 + $0x84] sm:$0xf0] }
  0xe7   : > { %2691 = vmatmul.msk.bf16.vlgmr.msra.gmra.mxu2 %vm2177_vm11, %v2126_v24  ;;  %v1180_v39 = vsel %vm499_vm0, %v3506_v53, %v1179_v37 }
  0xe8   : > { %v1317_v20 = vsel %vm772_vm1, %v1315_v21, %v1316_v19  ;;  %v988_v21 = vunpack.c.l.b16 %v2578_v61  ;;  %v3770_v19 = vld [vmem:[%s3096_s16 + $0x6c] sm:$0xff]  }
  0xea   : > { %1857 = vrot.lane.b32.xlu1 %v1817_v4, %s3055_s24  ;;  %v1503_v4 = vunpack.c.l.b16 %v2645_v56 }
  0xeb   : > { %718 = vrot.lane.b32.xlu0 %v667_v31, %s3049_s18  ;;  %712 = vrot.lane.b32.xlu2 %v631_v23, %s3049_s18  ;;  %v2648_v31 = vld [vmem:[%s3096_s16 + $0xbc] sm:$0x1]  ;;  %v1324_v23 = vrot.slane %v2868_v22, 1 }
  0xec   : > { %v938_v33 = vpop.permute.xlu1 %937  ;;  %v3716_v32 = vpack.c.b16 %v1503_v4, %v1503_v4  ;;  %v1506_v15 = vunpack.c.l.b16 %v2648_v31 }
  0xed   : > { %v1210_v29 = vpop.permute.xlu0 %1209  ;;  %v1850_v50 = vpop.permute.xlu2 %1849  ;;  %v1949_v45 = vsel %vm1943_vm5, %v1916_v14, %v938_v33  ;;  %v587_v33 = vshll.u32 %v3679_v12, 16 }
  0xee   : > { %v1982_v24 = vsel %vm1976_vm6, %v1949_v45, %v1210_v29  ;;  %v1653_v29 = vshll.u32 %v3716_v32, 16  ;;  %v3743_v47 = vpack.c.b16 %v1506_v15, %v1506_v15  ;;  %v2811_v45 = vld [vmem:[%s3096_s16 + $0x60] sm:$0xff]  }
  0xef   : > { %v2015_v34 = vsel %vm2009_vm7, %v1982_v24, %v3634_v41  ;;  %v1098_v15 = vshrl.u32 %v2811_v45, 16 }
  0xf2   : > { %841 = vrot.lane.b32.xlu1 %v805_v59, %s3050_s19  ;;  %v1326_v59 = vsel %vm772_vm1, %v1324_v23, %v1325_v63  ;;  %v1828_v23 = vrot.slane %v3716_v32, 1  ;;  %v1100_v63 = vshll.u32 %v2811_v45, 16 }
  0xf3   : > { %953 = vrot.lane.b32.xlu0 %v2559_v54, %s3048_s17  ;;  %847 = vrot.lane.b32.xlu2 %v814_v5, %s3050_s19  ;;  %v1889_v54 = vsel %vm1877_vm3, %v3253_v0, %v3569_v62  ;;  %v1144_v0 = vsel %vm499_vm0, %v1139_v57, %v1143_v26  ;;  %v474_v62 = vunpack.c.l.b16 %v216_v44  ;;  %v589_v5 = vrot.slane %v587_v33, 1  ;;  %v2888_v57 = vld [vmem:[%s3096_s16 + $0x90] sm:$0xe] }
  0xf4   : > { %v1216_v17 = vpop.permute.xlu1 %1215  ;;  %v2889_v14 = vor.u32 %v2888_v57, %v2887_v48  ;;  %v1102_v32 = vrot.slane %v1100_v63, 1 }
  0xf5   : > { %v1344_v18 = vpop.permute.xlu0 %1343  ;;  %v3689_v46 = vpop.permute.xlu2 %716  ;;  %v3723_v36 = vpack.c.b16 %v474_v62, %v474_v62  ;;  %v590_v26 = vor.u32 %v589_v5, %v585_v28  ;;  %v2858_v28 = vld [vmem:[%s3096_s16 + $0x60] sm:$0xe] }
  0xf6   : > { %v1103_v5 = vor.u32 %v1102_v32, %v1098_v15  ;;  %v3836_v32 = vld [vmem:[%s3096_s16 + $0xb4] sm:$0xf0] }
  0xfa   : > { %959 = vrot.lane.b32.xlu1 %v3480_v60, %s3048_s17  ;;  %v1922_v60 = vsel %vm1910_vm4, %v1889_v54, %v3592_v55  ;;  %v1689_v54 = vshll.u32 %v3743_v47, 16 }
  0xfb   : > { %1231 = vrot.lane.b32.xlu0 %v1180_v39, %s3052_s21  ;;  %1225 = vrot.lane.b32.xlu2 %v1144_v0, %s3052_s21  ;;  %v1955_v55 = vsel %vm1943_vm5, %v1922_v60, %v3610_v7  ;;  %v592_v7 = vshll.u32 %v3723_v36, 16  ;;  %v3002_v0 = vor.u32 %v3001_v2, %v3682_v35  ;;  %v795_v35 = vrot.slane %v3723_v36, 1 }
  0xfc   : > { %v1450_v11 = vpop.permute.xlu1 %1449  ;;  %v1988_v16 = vsel %vm1976_vm6, %v1955_v55, %v1216_v17  ;;  %v1655_v17 = vrot.slane %v1653_v29, 1  ;;  %v1691_v24 = vrot.slane %v1689_v54, 1 }
  0xfd   : > { %v2048_v9 = vsel %vm2042_vm8, %v2015_v34, %v1450_v11  ;;  %v1722_v58 = vpop.permute.xlu0 %1721  ;;  %v3728_v40 = vpop.permute.xlu2 %951  ;;  %v594_v49 = vrot.slane %v592_v7, 1  ;;  %v3773_v11 = vld [vmem:[%s3096_s16 + $0x6c] sm:$0xf0]  ;;  %v794_v60 = vrot.slane %v3002_v0, 1 }
  0xfe   : > { %v2081_v6 = vsel %vm2075_vm9, %v2048_v9, %v1722_v58  ;;  %v1656_v4 = vsel %vm499_vm0, %v3423_v25, %v1655_v17  ;;  %v1004_v25 = vpack.c.b16 %v988_v21, %v988_v21 }
  0xff   : > { %v2114_v41 = vsel %vm2108_vm10, %v2081_v6, %v1850_v50  ;;  %v2021_v50 = vsel %vm2009_vm7, %v1988_v16, %v1344_v18  ;;  %v595_v22 = vsel %vm499_vm0, %v590_v26, %v594_v49  ;;  %v796_v55 = vsel %vm772_vm1, %v794_v60, %v795_v35  ;;  %v3007_v26 = vld [vmem:[%s3096_s16 + $0x6c] sm:$0xe] }
 0x100   : > { %2685 = vmatmul.msk.bf16.gmra.mxu0 %vm2177_vm11, %v2114_v41  ;;  %v2054_v56 = vsel %vm2042_vm8, %v2021_v50, %v3659_v38  ;;  %v3004_v38 = vld [vmem:[%s3096_s16 + $0xb4] sm:$0xe]  ;;  %v1105_v6 = vshll.u32 %v1004_v25, 16  ;;  %v3799_v50 = vld [vmem:[%s3096_s16 + $0x84] sm:$0xff]  }
 0x101   : > { %v3005_v58 = vor.u32 %v3004_v38, %v3704_v42  ;;  %v2857_v42 = vld [vmem:[%s3096_s16 + $0x60] sm:$0xf0]  ;;  %v635_v0 = vshll.u32 %v3799_v50, 16  ;;  %v633_v35 = vshrl.u32 %v3799_v50, 16 }
 0x102   : > { %1353 = vrot.lane.b32.xlu1 %v1317_v20, %s3051_s20  ;;  %v2642_v20 = vld [vmem:[%s3096_s16 + $0x74] sm:$0x1]  ;;  %v1107_v7 = vrot.slane %v1105_v6, 1  ;;  %v2859_v57 = vor.u32 %v2858_v28, %v2857_v42 }
 0x103   : > { %1465 = vrot.lane.b32.xlu0 %v3391_v43, %s3053_s22  ;;  %1359 = vrot.lane.b32.xlu2 %v1326_v59, %s3051_s20  ;;  %v1682_v43 = vshrl.u32 %v3701_v13, 16  ;;  %v1500_v41 = vunpack.c.l.b16 %v2642_v20  ;;  %v1836_v29 = vrot.slane %v3005_v58, 1  ;;  %v1837_v59 = vrot.slane %v3743_v47, 1  ;;  %v223_v47 = vld [vmem:[%s3096_s16 + $0xb0] sm:$0x1] }
 0x104   : > { %v1728_v37 = vpop.permute.xlu1 %1727  ;;  %v1108_v49 = vsel %vm499_vm0, %v1103_v5, %v1107_v7  ;;  %v481_v61 = vunpack.c.l.b16 %v223_v47  ;;  %v1306_v54 = vrot.slane %v2859_v57, 1  ;;  %v2585_v5 = vld [vmem:[%s3096_s16 + $0xbc] sm:$0x1]  ;;  %v2845_v7 = vld [vmem:[%s3096_s16 + $0xa8] sm:$0xf0] }
 0x105   : > { %v2087_v18 = vsel %vm2075_vm9, %v2054_v56, %v1728_v37  ;;  %v1856_v44 = vpop.permute.xlu0 %1855  ;;  %v3755_v10 = vpop.permute.xlu2 %1229  ;;  %v1687_v62 = vor.u32 %v1686_v27, %v1682_v43  ;;  %v1516_v2 = vpack.c.b16 %v1500_v41, %v1500_v41  ;;  %v1612_v37 = vshll.u32 %v3770_v19, 16  ;;  %v2582_v47 = vld [vmem:[%s3096_s16 + $0x98] sm:$0x1] }
 0x106   : > { %v2120_v39 = vsel %vm2108_vm10, %v2087_v18, %v1856_v44  ;;  %v1838_v48 = vsel %vm772_vm1, %v1836_v29, %v1837_v59  ;;  %v220_v18 = vld [vmem:[%s3096_s16 + $0x8c] sm:$0x1]  ;;  %v1610_v44 = vshrl.u32 %v3770_v19, 16  ;;  %v3820_v21 = vpack.c.b16 %v481_v61, %v481_v61 }
 0x107   : > { %2688 = vmatmul.msk.bf16.gmra.mxu1 %vm2177_vm11, %v2120_v39  ;;  %v1692_v33 = vsel %vm499_vm0, %v1687_v62, %v1691_v24  ;;  %v1614_v43 = vrot.slane %v1612_v37, 1  ;;  %v1617_v27 = vshll.u32 %v1516_v2, 16  ;;  %v1307_v39 = vrot.slane %v1004_v25, 1  ;;  %v3010_v25 = vld [vmem:[%s3096_s16 + $0x84] sm:$0xe] }
 0x108   : > { %v676_v60 = vshll.u32 %v3820_v21, 16  ;;  %v1819_v15 = vrot.slane %v1516_v2, 1  ;;  %v3011_v42 = vor.u32 %v3010_v25, %v3802_v52  ;;  %v2846_v2 = vld [vmem:[%s3096_s16 + $0xa8] sm:$0xe] }
 0x109   : > { %v1308_v24 = vsel %vm772_vm1, %v1306_v54, %v1307_v39  ;;  %v2847_v57 = vor.u32 %v2846_v2, %v2845_v7 }
 0x10a   : > { %1471 = vrot.lane.b32.xlu1 %v3701_v13, %s3053_s22  ;;  %v1827_v13 = vrot.slane %v2889_v14, 1  ;;  %v478_v14 = vunpack.c.l.b16 %v220_v18 }
 0x10b   : > { %1737 = vrot.lane.b32.xlu0 %v1656_v4, %s3054_s23  ;;  %706 = vrot.lane.b32.xlu2 %v595_v22, %s3049_s18  ;;  %v1615_v4 = vor.u32 %v1614_v43, %v1610_v44  ;;  %v1619_v22 = vrot.slane %v1617_v27, 1  ;;  %v992_v44 = vunpack.c.l.b16 %v2582_v47 }
 0x10c   : > { %v3775_v31 = vpop.permute.xlu1 %710  ;;  %v1829_v36 = vsel %vm772_vm1, %v1827_v13, %v1828_v23  ;;  %v3008_v13 = vor.u32 %v3007_v26, %v3773_v11  ;;  %v494_v63 = vpack.c.b16 %v478_v14, %v478_v14  ;;  %v3833_v11 = vld [vmem:[%s3096_s16 + $0xb4] sm:$0xff]   ;;  %v806_v26 = vrot.slane %v3011_v42, 1  ;;  %v2649_v42 = vld [vmem:[%s3096_s16 + $0xc8] sm:$0x1] }
 0x10d   : > { %v3781_v34 = vpop.permute.xlu0 %839  ;;  %v3784_v9 = vpop.permute.xlu2 %1463  ;;  %v1897_v52 = vsel %vm1877_vm3, %v3351_v3, %v3775_v31  ;;  %v1184_v27 = vshll.u32 %v3833_v11, 16  ;;  %v815_v3 = vrot.slane %v2847_v57, 1  ;;  %v816_v31 = vrot.slane %v3820_v21, 1 }
 0x10e   : > { %v640_v58 = vshll.u32 %v494_v63, 16  ;;  %v1818_v20 = vrot.slane %v3008_v13, 1  ;;  %v1930_v61 = vsel %vm1910_vm4, %v1897_v52, %v3781_v34  ;;  %v1008_v13 = vpack.c.b16 %v992_v44, %v992_v44  ;;  %v2646_v52 = vld [vmem:[%s3096_s16 + $0xa4] sm:$0x1] }
 0x10f   : > { %v1963_v39 = vsel %vm1943_vm5, %v1930_v61, %v3728_v40  ;;  %v1507_v57 = vunpack.c.l.b16 %v2649_v42  ;;  %v3925_v61 = vld [vmem:[%s3096_s16 + $0xb4] sm:$0xff]  }
 0x110   : > { %v642_v41 = vrot.slane %v640_v58, 1  ;;  %v1820_v59 = vsel %vm772_vm1, %v1818_v20, %v1819_v15  ;;  %v2863_v20 = vld [vmem:[%s3096_s16 + $0x90] sm:$0xf0]  ;;  %v2864_v15 = vld [vmem:[%s3096_s16 + $0x90] sm:$0xe] }
 0x111   : > { %v2865_v2 = vor.u32 %v2864_v15, %v2863_v20  ;;  %v683_v20 = vshll.u32 %v3925_v61, 16 }
 0x112   : > { %1743 = vrot.lane.b32.xlu1 %v1692_v33, %s3054_s23  ;;  %v637_v33 = vrot.slane %v635_v0, 1 }
 0x113   : > { %1865 = vrot.lane.b32.xlu0 %v1829_v36, %s3055_s24  ;;  %835 = vrot.lane.b32.xlu2 %v796_v55, %s3050_s19  ;;  %v678_v36 = vrot.slane %v676_v60, 1  ;;  %v1186_v60 = vrot.slane %v1184_v27, 1  ;;  %v1319_v27 = vrot.slane %v1008_v13, 1 }
 0x114   : > { %v3792_v16 = vpop.permute.xlu1 %845  ;;  %v638_v55 = vor.u32 %v637_v33, %v633_v35  ;;  %v1153_v35 = vshll.u32 %v1008_v13, 16 }
 0x115   : > { %v3806_v17 = vpop.permute.xlu0 %957  ;;  %v3809_v56 = vpop.permute.xlu2 %1735  ;;  %v679_v37 = vsel %vm499_vm0, %v3506_v53, %v678_v36  ;;  %v2813_v53 = vld [vmem:[%s3096_s16 + $0x90] sm:$0xff]  }
 0x116   : > { %v1148_v43 = vshll.u32 %v2813_v53, 16  ;;  %v1146_v25 = vshrl.u32 %v2813_v53, 16 }
 0x118   : > { %v1150_v40 = vrot.slane %v1148_v43, 1  ;;  %v1318_v43 = vrot.slane %v2865_v2, 1  ;;  %v3019_v2 = vld [vmem:[%s3096_s16 + $0xb4] sm:$0xe] }
 0x11a   : > { %1871 = vrot.lane.b32.xlu1 %v1838_v48, %s3055_s24  ;;  %v643_v48 = vsel %vm499_vm0, %v638_v55, %v642_v41  ;;  %v1151_v55 = vor.u32 %v1150_v40, %v1146_v25  ;;  %v3899_v41 = vld [vmem:[%s3096_s16 + $0x9c] sm:$0xff]  }
 0x11b   : > { %1219 = vrot.lane.b32.xlu0 %v1108_v49, %s3052_s21  ;;  %947 = vrot.lane.b32.xlu2 %v2811_v45, %s3048_s17  ;;  %v1620_v45 = vsel %vm499_vm0, %v1615_v4, %v1619_v22  ;;  %v807_v49 = vrot.slane %v494_v63, 1  ;;  %v2949_v22 = vld [vmem:[%s3096_s16 + $0x90] sm:$0xff]   ;;  %v1182_v63 = vshrl.u32 %v3833_v11, 16  ;;  %v3016_v25 = vld [vmem:[%s3096_s16 + $0x9c] sm:$0xe] }
 0x11c   : > { %v3816_v38 = vpop.permute.xlu1 %1223  ;;  %v1903_v0 = vsel %vm1877_vm3, %v2949_v22, %v3689_v46  ;;  %v817_v46 = vsel %vm772_vm1, %v815_v3, %v816_v31  ;;  %v1504_v31 = vunpack.c.l.b16 %v2646_v52 }
 0x11d   : > { %v1352_v62 = vpop.permute.xlu0 %1351  ;;  %v3825_v23 = vpop.permute.xlu2 %833  ;;  %v808_v14 = vsel %vm772_vm1, %v806_v26, %v807_v49  ;;  %v1936_v33 = vsel %vm1910_vm4, %v1903_v0, %v3792_v16  ;;  %v1187_v16 = vor.u32 %v1186_v60, %v1182_v63 }
 0x11e   : > { %v1969_v36 = vsel %vm1943_vm5, %v1936_v33, %v3806_v17  ;;  %v1520_v40 = vpack.c.b16 %v1504_v31, %v1504_v31 }
 0x122   : > { %1347 = vrot.lane.b32.xlu1 %v1308_v24, %s3051_s20  ;;  %v1996_v24 = vsel %vm1976_vm6, %v1963_v39, %v3816_v38  ;;  %v3013_v38 = vld [vmem:[%s3096_s16 + $0xb4] sm:$0xe] }
 0x123   : > { %1731 = vrot.lane.b32.xlu0 %v1620_v45, %s3054_s23  ;;  %1459 = vrot.lane.b32.xlu2 %v3770_v19, %s3053_s22  ;;  %v995_v19 = vunpack.c.l.b16 %v2585_v5  ;;  %v2029_v21 = vsel %vm2009_vm7, %v1996_v24, %v1352_v62  ;;  %v1155_v5 = vrot.slane %v1153_v35, 1  ;;  %v1320_v24 = vsel %vm772_vm1, %v1318_v43, %v1319_v27  ;;  %v3981_v43 = vld [vmem:[%s3096_s16 + $0xcc] sm:$0xf0] }
 0x124   : > { %v3838_v6 = vpop.permute.xlu1 %1357  ;;  %v2062_v62 = vsel %vm2042_vm8, %v2029_v21, %v3784_v9  ;;  %v1885_v27 = vsel %vm1877_vm3, %v3114_v8, %v3411_v1  ;;  %v2650_v1 = vld [vmem:[%s3096_s16 + $0xd4] sm:$0x1] }
 0x125   : > { %v3843_v29 = vpop.permute.xlu0 %1469  ;;  %v3847_v28 = vpop.permute.xlu2 %939  ;;  %v3868_v54 = vpack.c.b16 %v995_v19, %v995_v19  ;;  %v2095_v17 = vsel %vm2075_vm9, %v2062_v62, %v3809_v56  ;;  %v2002_v19 = vsel %vm1976_vm6, %v1969_v36, %v3755_v10  ;;  %v1156_v49 = vsel %vm499_vm0, %v1151_v55, %v1155_v5  ;;  %v3928_v10 = vld [vmem:[%s3096_s16 + $0xb4] sm:$0xf0]  ;;  %v2586_v55 = vld [vmem:[%s3096_s16 + $0xc8] sm:$0x1] }
 0x126   : > { %v2035_v26 = vsel %vm2009_vm7, %v2002_v19, %v3838_v6  ;;  %v685_v19 = vrot.slane %v683_v20, 1  ;;  %v996_v52 = vunpack.c.l.b16 %v2586_v55 }
 0x127   : > { %v1189_v45 = vshll.u32 %v3868_v54, 16  ;;  %v2068_v44 = vsel %vm2042_vm8, %v2035_v26, %v3843_v29  ;;  %v224_v29 = vld [vmem:[%s3096_s16 + $0xbc] sm:$0x1] }
 0x129   : > { %v1191_v9 = vrot.slane %v1189_v45, 1  ;;  %v482_v45 = vunpack.c.l.b16 %v224_v29 }
 0x12a   : > { %1859 = vrot.lane.b32.xlu1 %v1820_v59, %s3055_s24  ;;  %v3902_v59 = vld [vmem:[%s3096_s16 + $0x9c] sm:$0xf0] }
 0x12b   : > { %720 = vrot.lane.b32.xlu0 %v679_v37, %s3049_s18  ;;  %714 = vrot.lane.b32.xlu2 %v643_v48, %s3049_s18  ;;  %v3915_v48 = vld [vmem:[%s3096_s16 + $0xc0] sm:$0xff]   ;;  %v1192_v56 = vsel %vm499_vm0, %v1187_v16, %v1191_v9  ;;  %v3957_v62 = vpack.c.b16 %v482_v45, %v482_v45  ;;  %v3017_v5 = vor.u32 %v3016_v25, %v3902_v59 }
 0x12c   : > { %v3862_v18 = vpop.permute.xlu1 %704  ;;  %v1694_v21 = vshrl.u32 %v3915_v48, 16 }
 0x12d   : > { %v1742_v34 = vpop.permute.xlu0 %1741  ;;  %v3874_v4 = vpop.permute.xlu2 %1217 }
 0x12e   : > { %v2101_v6 = vsel %vm2075_vm9, %v2068_v44, %v1742_v34  ;;  %v1328_v34 = vrot.slane %v3868_v54, 1  ;;  %v1658_v54 = vshrl.u32 %v3899_v41, 16  ;;  %v3978_v44 = vld [vmem:[%s3096_s16 + $0xcc] sm:$0xff]  }
 0x12f   : > { %v1708_v55 = vshll.u32 %v3978_v44, 16 }
 0x132   : > { %843 = vrot.lane.b32.xlu1 %v808_v14, %s3050_s19  ;;  %v3937_v14 = vpack.c.b16 %v1507_v57, %v1507_v57  ;;  %v688_v57 = vshll.u32 %v3957_v62, 16 }
 0x133   : > { %955 = vrot.lane.b32.xlu0 %v2813_v53, %s3048_s17  ;;  %849 = vrot.lane.b32.xlu2 %v817_v46, %s3050_s19  ;;  %v3014_v53 = vor.u32 %v3013_v38, %v3836_v32  ;;  %v1660_v32 = vshll.u32 %v3899_v41, 16  ;;  %v1665_v38 = vshll.u32 %v1520_v40, 16 }
 0x134   : > { %v3891_v58 = vpop.permute.xlu1 %827  ;;  %v1701_v60 = vshll.u32 %v3937_v14, 16  ;;  %v690_v31 = vrot.slane %v688_v57, 1  ;;  %v1840_v29 = vrot.slane %v3937_v14, 1 }
 0x135   : > { %v1864_v7 = vpop.permute.xlu0 %1863  ;;  %v3908_v37 = vpop.permute.xlu2 %1451  ;;  %v1327_v22 = vrot.slane %v3014_v53, 1  ;;  %v1662_v35 = vrot.slane %v1660_v32, 1  ;;  %v1667_v9 = vrot.slane %v1665_v38, 1  ;;  %v1831_v53 = vrot.slane %v1520_v40, 1  ;;  %v2869_v38 = vld [vmem:[%s3096_s16 + $0xc0] sm:$0xf0] }
 0x136   : > { %v2128_v47 = vsel %vm2108_vm10, %v2095_v17, %v1864_v7  ;;  %v1703_v36 = vrot.slane %v1701_v60, 1  ;;  %v2894_v7 = vld [vmem:[%s3096_s16 + $0xc0] sm:$0xe] }
 0x137   : > { %2692 = vmatmul.msk.bf16.gmra.mxu2 %vm2177_vm11, %v2128_v47  ;;  %v1329_v46 = vsel %vm772_vm1, %v1327_v22, %v1328_v34  ;;  %v1663_v16 = vor.u32 %v1662_v35, %v1658_v54  ;;  %v681_v47 = vshrl.u32 %v3925_v61, 16 }
 0x139   : > { %v1668_v59 = vsel %vm499_vm0, %v1663_v16, %v1667_v9 }
 0x13a   : > { %961 = vrot.lane.b32.xlu1 %v3833_v11, %s3048_s17  ;;  %v1696_v11 = vshll.u32 %v3915_v48, 16 }
 0x13b   : > { %1233 = vrot.lane.b32.xlu0 %v1192_v56, %s3052_s21  ;;  %1227 = vrot.lane.b32.xlu2 %v1156_v49, %s3052_s21  ;;  %v1830_v49 = vrot.slane %v3017_v5, 1 }
 0x13c   : > { %v1870_v3 = vpop.permute.xlu1 %1869  ;;  %v1698_v63 = vrot.slane %v1696_v11, 1  ;;  %v686_v11 = vor.u32 %v685_v19, %v681_v47  ;;  %v1706_v47 = vshrl.u32 %v3978_v44, 16  ;;  %v1710_v19 = vrot.slane %v1708_v55, 1 }
 0x13d   : > { %v2134_v39 = vsel %vm2108_vm10, %v2101_v6, %v1870_v3  ;;  %v3944_v0 = vpop.permute.xlu0 %945  ;;  %v3947_v13 = vpop.permute.xlu2 %1729  ;;  %v1918_v3 = vsel %vm1910_vm4, %v1885_v27, %v3891_v58  ;;  %v1832_v34 = vsel %vm772_vm1, %v1830_v49, %v1831_v53  ;;  %v2950_v58 = vld [vmem:[%s3096_s16 + $0x48] sm:$0xff]  }
 0x13e   : > { %2695 = vmatmul.msk.bf16.vlgmr.msra.gmra.mxu3 %vm2177_vm11, %v2134_v39  ;;  %v3961_v15 = vor.u32 %v1698_v63, %v1694_v21  ;;  %v1012_v39 = vpack.c.b16 %v996_v52, %v996_v52  ;;  %v1891_v21 = vsel %vm1877_vm3, %v2950_v58, %v3862_v18  ;;  %v1951_v25 = vsel %vm1943_vm5, %v1918_v3, %v3847_v28 }
 0x13f   : > { %v691_v40 = vsel %vm499_vm0, %v686_v11, %v690_v31  ;;  %v1924_v45 = vsel %vm1910_vm4, %v1891_v21, %v3825_v23  ;;  %v819_v18 = vrot.slane %v3957_v62, 1 }
 0x140   : > { %v1704_v26 = vsel %vm499_vm0, %v3961_v15, %v1703_v36  ;;  %v1201_v14 = vshll.u32 %v1012_v39, 16  ;;  %v1957_v28 = vsel %vm1943_vm5, %v1924_v45, %v3944_v0 }
 0x141   : > { %v1990_v62 = vsel %vm1976_vm6, %v1957_v28, %v3874_v4 }
 0x142   : > { %1355 = vrot.lane.b32.xlu1 %v1320_v24, %s3051_s20  ;;  %v3020_v24 = vor.u32 %v3019_v2, %v3928_v10  ;;  %v1508_v10 = vunpack.c.l.b16 %v2650_v1  ;;  %v1203_v23 = vrot.slane %v1201_v14, 1  ;;  %v3022_v2 = vld [vmem:[%s3096_s16 + $0xcc] sm:$0xe] }
 0x143   : > { %1467 = vrot.lane.b32.xlu0 %v3899_v41, %s3053_s22  ;;  %1361 = vrot.lane.b32.xlu2 %v1329_v46, %s3051_s20  ;;  %v2893_v41 = vld [vmem:[%s3096_s16 + $0xc0] sm:$0xf0]  ;;  %v3023_v3 = vor.u32 %v3022_v2, %v3981_v43 }
 0x144   : > { %v1212_v33 = vpop.permute.xlu1 %1211  ;;  %v2895_v56 = vor.u32 %v2894_v7, %v2893_v41  ;;  %v818_v54 = vrot.slane %v3020_v24, 1  ;;  %v1524_v36 = vpack.c.b16 %v1508_v10, %v1508_v10  ;;  %v1204_v4 = vsel %vm499_vm0, %v3961_v15, %v1203_v23 }
 0x145   : > { %v1340_v42 = vpop.permute.xlu0 %1339  ;;  %v3965_v17 = vpop.permute.xlu2 %712  ;;  %v1984_v63 = vsel %vm1976_vm6, %v1951_v25, %v1212_v33  ;;  %v2870_v33 = vld [vmem:[%s3096_s16 + $0xc0] sm:$0xe]  ;;  %v1711_v15 = vor.u32 %v1710_v19, %v1706_v47  ;;  %v1842_v31 = vrot.slane %v3023_v3, 1 }
 0x146   : > { %v1839_v32 = vrot.slane %v2895_v56, 1  ;;  %v2017_v46 = vsel %vm2009_vm7, %v1984_v63, %v1340_v42  ;;  %v820_v9 = vsel %vm772_vm1, %v818_v54, %v819_v18  ;;  %v2871_v42 = vor.u32 %v2870_v33, %v2869_v38 }
 0x147   : > { %v2050_v20 = vsel %vm2042_vm8, %v2017_v46, %v3908_v37  ;;  %v1713_v57 = vshll.u32 %v1524_v36, 16 }
 0x148   : > { %v1841_v60 = vsel %vm772_vm1, %v1839_v32, %v1840_v29  ;;  %v1330_v52 = vrot.slane %v2871_v42, 1 }
 0x149   : > { %v1715_v53 = vrot.slane %v1713_v57, 1 }
 0x14a   : > { %1473 = vrot.lane.b32.xlu1 %v3915_v48, %s3053_s22 }
 0x14b   : > { %1745 = vrot.lane.b32.xlu0 %v1704_v26, %s3054_s23  ;;  %1739 = vrot.lane.b32.xlu2 %v1668_v59, %s3054_s23  ;;  %v1331_v26 = vrot.slane %v1012_v39, 1  ;;  %v1843_v39 = vrot.slane %v1524_v36, 1 }
 0x14c   : > { %v1346_v6 = vpop.permute.xlu1 %1345 }
 0x14d   : > { %v1458_v22 = vpop.permute.xlu0 %1457  ;;  %v3993_v8 = vpop.permute.xlu2 %847  ;;  %v2023_v41 = vsel %vm2009_vm7, %v1990_v62, %v1346_v6  ;;  %v1332_v6 = vsel %vm772_vm1, %v1330_v52, %v1331_v26  ;;  %v1844_v29 = vsel %vm772_vm1, %v1842_v31, %v1843_v39 }
 0x14e   : > { %v2056_v37 = vsel %vm2042_vm8, %v2023_v41, %v1458_v22 }
 0x14f   : > { %v2089_v56 = vsel %vm2075_vm9, %v2056_v37, %v3947_v13  ;;  %v1716_v13 = vsel %vm499_vm0, %v1711_v15, %v1715_v53 }
 0x152   : > { %1867 = vrot.lane.b32.xlu1 %v1832_v34, %s3055_s24 }
 0x153   : > { %722 = vrot.lane.b32.xlu0 %v691_v40, %s3049_s18  ;;  %1873 = vrot.lane.b32.xlu2 %v1841_v60, %s3055_s24  ;;  %v1899_v40 = vsel %vm1877_vm3, %v3619_v51, %v3965_v17 }
 0x154   : > { %v1724_v35 = vpop.permute.xlu1 %1723 }
 0x155   : > { %v2083_v0 = vsel %vm2075_vm9, %v2050_v20, %v1724_v35  ;;  %v1852_v16 = vpop.permute.xlu0 %1851  ;;  %v1226_v5 = vpop.permute.xlu2 %1225 }
 0x156   : > { %v2116_v7 = vsel %vm2108_vm10, %v2083_v0, %v1852_v16 }
 0x157   : > { %2686 = vmatmul.msk.bf16.gmra.mxu0 %vm2177_vm11, %v2116_v7 }
 0x15a   : > { %851 = vrot.lane.b32.xlu1 %v820_v9, %s3050_s19 }
 0x15b   : > { %1235 = vrot.lane.b32.xlu0 %v1204_v4, %s3052_s21  ;;  %963 = vrot.lane.b32.xlu2 %v3915_v48, %s3048_s17 }
 0x15c   : > { %v1858_v59 = vpop.permute.xlu1 %1857 }
 0x15d   : > { %v2122_v49 = vsel %vm2108_vm10, %v2089_v56, %v1858_v59  ;;  %v719_v27 = vpop.permute.xlu0 %718  ;;  %v1360_v11 = vpop.permute.xlu2 %1359 }
 0x15e   : > { %2689 = vmatmul.msk.bf16.gmra.mxu1 %vm2177_vm11, %v2122_v49  ;;  %v1905_v10 = vsel %vm1877_vm3, %v3600_v30, %v719_v27  ;;  %v2951_v27 = vld [vmem:[%s3096_s16 + $0xa8] sm:$0xff]  }
 0x15f   : > { %v1938_v54 = vsel %vm1910_vm4, %v1905_v10, %v3993_v8 }
 0x162   : > { %1363 = vrot.lane.b32.xlu1 %v1332_v6, %s3051_s20 }
 0x163   : > { %1747 = vrot.lane.b32.xlu0 %v1716_v13, %s3054_s23  ;;  %1475 = vrot.lane.b32.xlu2 %v3978_v44, %s3053_s22 }
 0x164   : > { %v842_v32 = vpop.permute.xlu1 %841 }
 0x165   : > { %v954_v48 = vpop.permute.xlu0 %953  ;;  %v707_v22 = vpop.permute.xlu2 %706  ;;  %v1932_v44 = vsel %vm1910_vm4, %v1899_v40, %v842_v32 }
 0x166   : > { %v1965_v63 = vsel %vm1943_vm5, %v1932_v44, %v954_v48  ;;  %v1893_v62 = vsel %vm1877_vm3, %v3679_v12, %v707_v22 }
 0x167   : > { %v1998_v45 = vsel %vm1976_vm6, %v1965_v63, %v1226_v5 }
 0x16a   : > { %1875 = vrot.lane.b32.xlu1 %v1844_v29, %s3055_s24 }
 0x16c   : > { %v960_v43 = vpop.permute.xlu1 %959 }
 0x16d   : > { %v1232_v34 = vpop.permute.xlu0 %1231  ;;  %v836_v24 = vpop.permute.xlu2 %835  ;;  %v1971_v28 = vsel %vm1943_vm5, %v1938_v54, %v960_v43 }
 0x16e   : > { %v2004_v17 = vsel %vm1976_vm6, %v1971_v28, %v1232_v34  ;;  %v1926_v16 = vsel %vm1910_vm4, %v1893_v62, %v836_v24 }
 0x16f   : > { %v2037_v33 = vsel %vm2009_vm7, %v2004_v17, %v1360_v11 }
 0x174   : > { %v1354_v1 = vpop.permute.xlu1 %1353 }
 0x175   : > { %v1466_v58 = vpop.permute.xlu0 %1465  ;;  %v948_v21 = vpop.permute.xlu2 %947  ;;  %v2031_v18 = vsel %vm2009_vm7, %v1998_v45, %v1354_v1 }
 0x176   : > { %v2064_v51 = vsel %vm2042_vm8, %v2031_v18, %v1466_v58  ;;  %v1959_v9 = vsel %vm1943_vm5, %v1926_v16, %v948_v21 }
 0x17c   : > { %v1472_v25 = vpop.permute.xlu1 %1471 }
 0x17d   : > { %v1738_v14 = vpop.permute.xlu0 %1737  ;;  %v1460_v60 = vpop.permute.xlu2 %1459  ;;  %v2070_v20 = vsel %vm2042_vm8, %v2037_v33, %v1472_v25 }
 0x17e   : > { %v2097_v35 = vsel %vm2075_vm9, %v2064_v51, %v1738_v14 }
 0x184   : > { %v1744_v46 = vpop.permute.xlu1 %1743 }
 0x185   : > { %v1866_v38 = vpop.permute.xlu0 %1865  ;;  %v2103_v8 = vsel %vm2075_vm9, %v2070_v20, %v1744_v46  ;;  %v715_v36 = vpop.permute.xlu2 %714 }
 0x186   : > { %v2130_v30 = vsel %vm2108_vm10, %v2097_v35, %v1866_v38  ;;  %v1901_v11 = vsel %vm1877_vm3, %v3799_v50, %v715_v36  ;;  %v4105_v38 = vpop.f32.mrf.mxu0 }
 0x187   : > { %2693 = vmatmul.msk.bf16.gmra.mxu2 %vm2177_vm11, %v2130_v30 }
 0x18c   : > { %v1872_v23 = vpop.permute.xlu1 %1871 }
 0x18d   : > { %v2136_v55 = vsel %vm2108_vm10, %v2103_v8, %v1872_v23  ;;  %v1220_v0 = vpop.permute.xlu0 %1219  ;;  %v850_v7 = vpop.permute.xlu2 %849 }
 0x18e   : > { %2696 = vmatmul.msk.bf16.gmra.mxu3 %vm2177_vm11, %v2136_v55  ;;  %v1992_v5 = vsel %vm1976_vm6, %v1959_v9, %v1220_v0  ;;  %v4111_v23 = vpop.f32.mrf.mxu0  ;;  %v4115_v55 = vpop.f32.mrf.mxu1 }
 0x194   : > { %v1348_v42 = vpop.permute.xlu1 %1347 }
 0x195   : > { %v2025_v41 = vsel %vm2009_vm7, %v1992_v5, %v1348_v42  ;;  %v1732_v2 = vpop.permute.xlu0 %1731  ;;  %v1228_v57 = vpop.permute.xlu2 %1227 }
 0x196   : > { %v2058_v37 = vsel %vm2042_vm8, %v2025_v41, %v1460_v60  ;;  %v4113_v36 = vpop.f32.mrf.mxu0  ;;  %v4121_v16 = vpop.f32.mrf.mxu1  ;;  %v2303_v41 = vadd.f32 %v4111_v23, %v4105_v38 }
 0x197   : > { %v2091_v4 = vsel %vm2075_vm9, %v2058_v37, %v1732_v2 }
 0x198   : > { %v2304_v2 = vadd.f32 %v2303_v41, %v4113_v36 }
 0x19c   : > { %v1860_v12 = vpop.permute.xlu1 %1859 }
 0x19d   : > { %v2124_v47 = vsel %vm2108_vm10, %v2091_v4, %v1860_v12  ;;  %v721_v19 = vpop.permute.xlu0 %720  ;;  %v1362_v59 = vpop.permute.xlu2 %1361 }
 0x19e   : > { %2690 = vmatmul.msk.bf16.gmra.mxu1 %vm2177_vm11, %v2124_v47  ;;  %v1907_v6 = vsel %vm1877_vm3, %v2951_v27, %v721_v19  ;;  %v4117_v62 = vpop.f32.mrf.mxu0  ;;  %v4123_v9 = vpop.f32.mrf.mxu1 }
 0x19f   : > { %v1940_v13 = vsel %vm1910_vm4, %v1907_v6, %v850_v7  ;;  %v2305_v37 = vadd.f32 %v2304_v2, %v4117_v62  ;;  %v4135_v4 = vpop.f32.mrf.mxu2 }
 0x1a4   : > { %v844_v52 = vpop.permute.xlu1 %843 }
 0x1a5   : > { %v956_v26 = vpop.permute.xlu0 %955  ;;  %v1740_v53 = vpop.permute.xlu2 %1739  ;;  %v1934_v39 = vsel %vm1910_vm4, %v1901_v11, %v844_v52 }
 0x1a6   : > { %v1967_v48 = vsel %vm1943_vm5, %v1934_v39, %v956_v26  ;;  %v4119_v0 = vpop.f32.mrf.mxu0  ;;  %v4131_v7 = vpop.f32.mrf.mxu1 }
 0x1a7   : > { %v2000_v34 = vsel %vm1976_vm6, %v1967_v48, %v1228_v57  ;;  %v2306_v12 = vadd.f32 %v2305_v37, %v4119_v0 }
 0x1ac   : > { %v962_v56 = vpop.permute.xlu1 %961 }
 0x1ad   : > { %v1234_v49 = vpop.permute.xlu0 %1233  ;;  %v1973_v31 = vsel %vm1943_vm5, %v1940_v13, %v962_v56  ;;  %v1874_v43 = vpop.permute.xlu2 %1873 }
 0x1ae   : > { %v2006_v32 = vsel %vm1976_vm6, %v1973_v31, %v1234_v49  ;;  %v4125_v42 = vpop.f32.mrf.mxu0 }
 0x1af   : > { %v2039_v22 = vsel %vm2009_vm7, %v2006_v32, %v1362_v59  ;;  %v2307_v47 = vadd.f32 %v2306_v12, %v4125_v42  ;;  %v4145_v59 = vpop.f32.mrf.mxu2 }
 0x1b4   : > { %v1356_v15 = vpop.permute.xlu1 %1355 }
 0x1b5   : > { %v1468_v3 = vpop.permute.xlu0 %1467  ;;  %v2033_v50 = vsel %vm2009_vm7, %v2000_v34, %v1356_v15  ;;  %v964_v45 = vpop.permute.xlu2 %963 }
 0x1b6   : > { %v2066_v21 = vsel %vm2042_vm8, %v2033_v50, %v1468_v3 }
 0x1b7   : > { %v2099_v40 = vsel %vm2075_vm9, %v2066_v21, %v1740_v53 }
 0x1ba   : > { %v4151_v53 = vpop.f32.mrf.mxu2 }
 0x1bc   : > { %v1474_v29 = vpop.permute.xlu1 %1473 }
 0x1bd   : > { %v2072_v24 = vsel %vm2042_vm8, %v2039_v22, %v1474_v29  ;;  %v1746_v1 = vpop.permute.xlu0 %1745  ;;  %v1476_v35 = vpop.permute.xlu2 %1475 }
 0x1be   : > { %v2105_v58 = vsel %vm2075_vm9, %v2072_v24, %v1746_v1 }
 0x1bf   : > { %v2138_v25 = vsel %vm2108_vm10, %v2105_v58, %v1874_v43 }
 0x1c0   : > { %2697 = vmatmul.msk.bf16.gmra.mxu3 %vm2177_vm11, %v2138_v25 }
 0x1c1   : > { %v4157_v11 = vpop.f32.mrf.mxu3 }
 0x1c2   : > { %v4160_v31 = vpop.f32.mrf.mxu2 }
 0x1c4   : > { %v1868_v14 = vpop.permute.xlu1 %1867 }
 0x1c5   : > { %v2132_v44 = vsel %vm2108_vm10, %v2099_v40, %v1868_v14  ;;  %v723_v63 = vpop.permute.xlu0 %722 }
 0x1c6   : > { %2694 = vmatmul.msk.bf16.gmra.mxu2 %vm2177_vm11, %v2132_v44  ;;  %v1909_v10 = vsel %vm1877_vm3, %v3925_v61, %v723_v63 }
 0x1c9   : > { %v4166_v29 = vpop.f32.mrf.mxu3 }
 0x1cc   : > { %v852_v60 = vpop.permute.xlu1 %851 }
 0x1cd   : > { %v1942_v46 = vsel %vm1910_vm4, %v1909_v10, %v852_v60  ;;  %v1236_v54 = vpop.permute.xlu0 %1235 }
 0x1ce   : > { %v1975_v18 = vsel %vm1943_vm5, %v1942_v46, %v964_v45 }
 0x1cf   : > { %v2008_v51 = vsel %vm1976_vm6, %v1975_v18, %v1236_v54 }
 0x1d4   : > { %v1364_v28 = vpop.permute.xlu1 %1363  ;;  %v4127_v5 = vpop.f32.mrf.mxu0 }
 0x1d5   : > { %v2041_v17 = vsel %vm2009_vm7, %v2008_v51, %v1364_v28  ;;  %v1748_v33 = vpop.permute.xlu0 %1747  ;;  %v2308_v52 = vadd.f32 %v2307_v47, %v4127_v5 }
 0x1d6   : > { %v2074_v30 = vsel %vm2042_vm8, %v2041_v17, %v1476_v35 }
 0x1d7   : > { %v2107_v61 = vsel %vm2075_vm9, %v2074_v30, %v1748_v33  ;;  %v3056_v30 = vmov 256.0  }
 0x1d8   : > { %2945 = vrcp.f32 %v3056_v30 }
 0x1db   : > { %v4139_v19 = vpop.f32.mrf.mxu1 }
 0x1dc   : > { %v1876_v20 = vpop.permute.xlu1 %1875  ;;  %v4141_v57 = vpop.f32.mrf.mxu0 }
 0x1dd   : > { %v2140_v8 = vsel %vm2108_vm10, %v2107_v61, %v1876_v20  ;;  %v2309_v26 = vadd.f32 %v2308_v52, %v4141_v57 }
 0x1de   : > { %2698 = vmatmul.msk.bf16.gmra.mxu3 %vm2177_vm11, %v2140_v8  ;;  %v2946_v61 = vpop.eup %2945 }
 0x1df   : > { %v2310_v56 = vadd.f32 %v2309_v26, %v4115_v55  ;;  %v2341_v2 = vmul.f32 256.0, %v2946_v61  ;;  %vm2345_vm12 = vweird.f32 %v2946_v61 }
 0x1e1   : > { %v2311_v15 = vadd.f32 %v2310_v56, %v4121_v16  ;;  %v2342_v47 = vsub.f32 1.0, %v2341_v2 }
 0x1e3   : > { %v4148_v49 = vpop.f32.mrf.mxu1  ;;  %v2312_v27 = vadd.f32 %v2311_v15, %v4123_v9  ;;  %v2343_v56 = vmul.f32 %v2946_v61, %v2342_v47 }
 0x1e5   : > { %v2313_v3 = vadd.f32 %v2312_v27, %v4131_v7  ;;  %v2344_v27 = vadd.f32 %v2946_v61, %v2343_v56 }
 0x1e7   : > { %v2314_v13 = vadd.f32 %v2313_v3, %v4139_v19 }
 0x1e9   : > { %v2315_v39 = vadd.f32 %v2314_v13, %v4148_v49  ;;  %v2346_v13 = vsel %vm2345_vm12, %v2946_v61, %v2344_v27 }
 0x20a   : > { %v4169_v43 = vpop.f32.mrf.mxu2 }
 0x211   : > { %v4172_v24 = vpop.f32.mrf.mxu3 }
 0x212   : > { %v4175_v50 = vpop.f32.mrf.mxu2 }
 0x219   : > { %v4179_v25 = vpop.f32.mrf.mxu3 }
 0x21b   : > { %v4154_v6 = vpop.f32.mrf.mxu1 }
 0x21c   : > { %v2316_v48 = vadd.f32 %v2315_v39, %v4154_v6 }
 0x223   : > { %v4163_v32 = vpop.f32.mrf.mxu1 }
 0x224   : > { %v2317_v22 = vadd.f32 %v2316_v48, %v4163_v32 }
 0x226   : > { %v2318_v34 = vadd.f32 %v2317_v22, %v4135_v4 }
 0x228   : > { %v2319_v1 = vadd.f32 %v2318_v34, %v4145_v59 }
 0x22a   : > { %v2320_v58 = vadd.f32 %v2319_v1, %v4151_v53 }
 0x22c   : > { %v2321_v21 = vadd.f32 %v2320_v58, %v4160_v31 }
 0x22e   : > { %v2322_v14 = vadd.f32 %v2321_v21, %v4169_v43 }
 0x230   : > { %v2323_v44 = vadd.f32 %v2322_v14, %v4175_v50 }
 0x243   : > { %v4185_v63 = vpop.f32.mrf.mxu3 }
 0x249   : > { %v4181_v40 = vpop.f32.mrf.mxu2 }
 0x24a   : > { %v2324_v10 = vadd.f32 %v2323_v44, %v4181_v40 }
 0x24b   : > { %v4193_v18 = vpop.f32.mrf.mxu3 }
 0x251   : > { %v4188_v60 = vpop.f32.mrf.mxu2 }
 0x252   : > { %v2325_v45 = vadd.f32 %v2324_v10, %v4188_v60 }
 0x254   : > { %v2326_v46 = vadd.f32 %v2325_v45, %v4157_v11 }
 0x256   : > { %v2327_v54 = vadd.f32 %v2326_v46, %v4166_v29 }
 0x258   : > { %v2328_v28 = vadd.f32 %v2327_v54, %v4172_v24 }
 0x25a   : > { %v2329_v51 = vadd.f32 %v2328_v28, %v4179_v25 }
 0x25c   : > { %v2330_v35 = vadd.f32 %v2329_v51, %v4185_v63 }
 0x25e   : > { %v2331_v33 = vadd.f32 %v2330_v35, %v4193_v18 }
 0x261   : > { %v4197_v17 = vpop.f32.mrf.mxu3 }
 0x262   : > { %v2332_v20 = vadd.f32 %v2331_v33, %v4197_v17 }
 0x269   : > { %v4202_v8 = vpop.f32.mrf.mxu3 }
 0x26a   : > { %v2333_v41 = vadd.f32 %v2332_v20, %v4202_v8 }
 0x26c   : > { %v2334_v37 = vrot.slane %v2333_v41, 4 }
 0x26e   : > { %v2335_v12 = vadd.f32 %v2334_v37, %v2333_v41 }
 0x270   : > { %v2336_v52 = vrot.slane %v2335_v12, 2 }
 0x272   : > { %v2337_v26 = vadd.f32 %v2336_v52, %v2335_v12 }
 0x274   : > { %v2338_v15 = vrot.slane %v2337_v26, 1 }
 0x276   : > { %v2339_v3 = vadd.f32 %v2338_v15, %v2337_v26 }
 0x278   : > { %v4205_v39 = vmul.f32 %v2346_v13, %v2339_v3 }
 0x27a   : > { %v2348_v48 = vsub.f32 %v4105_v38, %v4205_v39  ;;  %v2349_v22 = vsub.f32 %v4111_v23, %v4205_v39  ;;  %v2350_v34 = vsub.f32 %v4113_v36, %v4205_v39  ;;  %v2351_v21 = vsub.f32 %v4117_v62, %v4205_v39 }
 0x27b   : > { %v2352_v14 = vsub.f32 %v4119_v0, %v4205_v39  ;;  %v2353_v45 = vsub.f32 %v4125_v42, %v4205_v39  ;;  %v2354_v23 = vsub.f32 %v4127_v5, %v4205_v39  ;;  %v2355_v28 = vsub.f32 %v4141_v57, %v4205_v39 }
 0x27c   : > { %v2380_v1 = vmul.f32 %v2348_v48, %v2348_v48  ;;  %v2381_v58 = vmul.f32 %v2349_v22, %v2349_v22  ;;  %v2382_v44 = vmul.f32 %v2350_v34, %v2350_v34  ;;  %v2383_v38 = vmul.f32 %v2351_v21, %v2351_v21 }
 0x27d   : > { %v2384_v54 = vmul.f32 %v2352_v14, %v2352_v14  ;;  %v2385_v51 = vmul.f32 %v2353_v45, %v2353_v45  ;;  %v2356_v0 = vsub.f32 %v4115_v55, %v4205_v39  ;;  %v2386_v35 = vmul.f32 %v2354_v23, %v2354_v23 }
 0x27e   : > { %v2412_v10 = vadd.f32 %v2381_v58, %v2380_v1  ;;  %v2357_v42 = vsub.f32 %v4121_v16, %v4205_v39  ;;  %v2387_v33 = vmul.f32 %v2355_v28, %v2355_v28  ;;  %v2358_v5 = vsub.f32 %v4123_v9, %v4205_v39 }
 0x27f   : > { %v2388_v20 = vmul.f32 %v2356_v0, %v2356_v0  ;;  %v2359_v57 = vsub.f32 %v4131_v7, %v4205_v39  ;;  %v2360_v55 = vsub.f32 %v4139_v19, %v4205_v39  ;;  %v2361_v16 = vsub.f32 %v4148_v49, %v4205_v39 }
 0x280   : > { %v2413_v46 = vadd.f32 %v2412_v10, %v2382_v44  ;;  %v2389_v2 = vmul.f32 %v2357_v42, %v2357_v42  ;;  %v2390_v12 = vmul.f32 %v2358_v5, %v2358_v5  ;;  %v2362_v9 = vsub.f32 %v4154_v6, %v4205_v39 }
 0x281   : > { %v2391_v52 = vmul.f32 %v2359_v57, %v2359_v57  ;;  %v2392_v56 = vmul.f32 %v2360_v55, %v2360_v55  ;;  %v2363_v7 = vsub.f32 %v4163_v32, %v4205_v39  ;;  %v2393_v27 = vmul.f32 %v2361_v16, %v2361_v16 }
 0x282   : > { %v2414_v36 = vadd.f32 %v2413_v46, %v2383_v38  ;;  %v2364_v19 = vsub.f32 %v4135_v4, %v4205_v39  ;;  %v2394_v13 = vmul.f32 %v2362_v9, %v2362_v9  ;;  %v2365_v49 = vsub.f32 %v4145_v59, %v4205_v39 }
 0x283   : > { %v2395_v22 = vmul.f32 %v2363_v7, %v2363_v7  ;;  %v2366_v6 = vsub.f32 %v4151_v53, %v4205_v39  ;;  %v2367_v32 = vsub.f32 %v4160_v31, %v4205_v39  ;;  %v2368_v4 = vsub.f32 %v4169_v43, %v4205_v39 }
 0x284   : > { %v2415_v62 = vadd.f32 %v2414_v36, %v2384_v54  ;;  %v2396_v1 = vmul.f32 %v2364_v19, %v2364_v19  ;;  %v2397_v21 = vmul.f32 %v2365_v49, %v2365_v49  ;;  %v2369_v59 = vsub.f32 %v4175_v50, %v4205_v39 }
 0x285   : > { %v2398_v44 = vmul.f32 %v2366_v6, %v2366_v6  ;;  %v2399_v45 = vmul.f32 %v2367_v32, %v2367_v32  ;;  %v2370_v53 = vsub.f32 %v4181_v40, %v4205_v39  ;;  %v2400_v46 = vmul.f32 %v2368_v4, %v2368_v4 }
 0x286   : > { %v2416_v30 = vadd.f32 %v2415_v62, %v2385_v51  ;;  %v2371_v31 = vsub.f32 %v4188_v60, %v4205_v39  ;;  %v2401_v54 = vmul.f32 %v2369_v59, %v2369_v59  ;;  %v2372_v43 = vsub.f32 %v4157_v11, %v4205_v39 }
 0x287   : > { %v2402_v28 = vmul.f32 %v2370_v53, %v2370_v53  ;;  %v2373_v50 = vsub.f32 %v4166_v29, %v4205_v39  ;;  %v2374_v40 = vsub.f32 %v4172_v24, %v4205_v39  ;;  %v2375_v60 = vsub.f32 %v4179_v25, %v4205_v39 }
 0x288   : > { %v2417_v61 = vadd.f32 %v2416_v30, %v2386_v35  ;;  %v2403_v62 = vmul.f32 %v2371_v31, %v2371_v31  ;;  %v2404_v35 = vmul.f32 %v2372_v43, %v2372_v43  ;;  %v2376_v11 = vsub.f32 %v4185_v63, %v4205_v39 }
 0x289   : > { %v2405_v42 = vmul.f32 %v2373_v50, %v2373_v50  ;;  %v2377_v29 = vsub.f32 %v4193_v18, %v4205_v39  ;;  %v2378_v24 = vsub.f32 %v4197_v17, %v4205_v39  ;;  %v2379_v25 = vsub.f32 %v4202_v8, %v4205_v39 }
 0x28a   : > { %v2418_v41 = vadd.f32 %v2417_v61, %v2387_v33  ;;  %v2406_v61 = vmul.f32 %v2374_v40, %v2374_v40  ;;  %v2408_v57 = vmul.f32 %v2376_v11, %v2376_v11 }
 0x28c   : > { %v2419_v37 = vadd.f32 %v2418_v41, %v2388_v20  ;;  %v2407_v20 = vmul.f32 %v2375_v60, %v2375_v60 }
 0x28e   : > { %v2420_v47 = vadd.f32 %v2419_v37, %v2389_v2  ;;  %v2409_v37 = vmul.f32 %v2377_v29, %v2377_v29 }
 0x290   : > { %v2421_v26 = vadd.f32 %v2420_v47, %v2390_v12  ;;  %v2410_v12 = vmul.f32 %v2378_v24, %v2378_v24  ;;  %v2411_v47 = vmul.f32 %v2379_v25, %v2379_v25 }
 0x292   : > { %v2422_v15 = vadd.f32 %v2421_v26, %v2391_v52 }
 0x294   : > { %v2423_v3 = vadd.f32 %v2422_v15, %v2392_v56 }
 0x296   : > { %v2424_v48 = vadd.f32 %v2423_v3, %v2393_v27 }
 0x298   : > { %v2425_v34 = vadd.f32 %v2424_v48, %v2394_v13 }
 0x29a   : > { %v2426_v58 = vadd.f32 %v2425_v34, %v2395_v22 }
 0x29c   : > { %v2427_v14 = vadd.f32 %v2426_v58, %v2396_v1 }
 0x29e   : > { %v2428_v10 = vadd.f32 %v2427_v14, %v2397_v21 }
 0x2a0   : > { %v2429_v38 = vadd.f32 %v2428_v10, %v2398_v44 }
 0x2a2   : > { %v2430_v23 = vadd.f32 %v2429_v38, %v2399_v45 }
 0x2a4   : > { %v2431_v36 = vadd.f32 %v2430_v23, %v2400_v46 }
 0x2a6   : > { %v2432_v51 = vadd.f32 %v2431_v36, %v2401_v54 }
 0x2a8   : > { %v2433_v0 = vadd.f32 %v2432_v51, %v2402_v28 }
 0x2aa   : > { %v2434_v30 = vadd.f32 %v2433_v0, %v2403_v62 }
 0x2ac   : > { %v2435_v33 = vadd.f32 %v2434_v30, %v2404_v35 }
 0x2ae   : > { %v2436_v5 = vadd.f32 %v2435_v33, %v2405_v42 }
 0x2b0   : > { %v2437_v41 = vadd.f32 %v2436_v5, %v2406_v61 }
 0x2b2   : > { %v2438_v2 = vadd.f32 %v2437_v41, %v2407_v20 }
 0x2b4   : > { %v2439_v55 = vadd.f32 %v2438_v2, %v2408_v57 }
 0x2b6   : > { %v2440_v63 = vadd.f32 %v2439_v55, %v2409_v37 }
 0x2b8   : > { %v2441_v16 = vadd.f32 %v2440_v63, %v2410_v12 }
 0x2ba   : > { %v2442_v52 = vadd.f32 %v2441_v16, %v2411_v47 }
 0x2bc   : > { %v2443_v26 = vrot.slane %v2442_v52, 4 }
 0x2be   : > { %v2444_v18 = vadd.f32 %v2443_v26, %v2442_v52 }
 0x2c0   : > { %v2445_v9 = vrot.slane %v2444_v18, 2 }
 0x2c2   : > { %v2446_v56 = vadd.f32 %v2445_v9, %v2444_v18 }
 0x2c4   : > { %v2447_v15 = vrot.slane %v2446_v56, 1 }
 0x2c6   : > { %v2448_v17 = vadd.f32 %v2447_v15, %v2446_v56 }
 0x2c8   : > { %v2450_v8 = vsel %vm2449_vm13, %v4205_v39, %v2448_v17 }
 0x2c9   : > { %2451 = vst [vmem:[%s175_s14] sm:$0x3] %v2450_v8 }
 0x2ca PF: > { %s12_s11 = sadd.s32 1, %s3046_s11   ;;  %s4288_s9 = smov %s3042_s10 }
 0x2cb   : > { %p9_p5 = scmp.ge.s32.totalorder %s12_s11, 4   ;;  %s4289_s10 = smov %s4291_s12 }
 0x2cd   :  { %11 = sbr.rel (!%p9_p5) target bundleno = 2 (0x2), region = 60 }

// kernel: conv_block_forward.3
= control target key start
LH: loop header
LB: loop body
LE: loop exit
PB: predicated region body
PF: predicated region fallthrough
CT: control target
= control target key end

     0   :  { %s3138_s15 = smov 0   ;;  %s3140_s16 = smov 0   ;;  %s4429_s0 = inlined_call_operand.vmem [shape: bf16[2,1,18,18,8], index: 0, kind: input, shape index: {}]   ;;  %s4430_s1 = inlined_call_operand.vmem [shape: bf16[72,128], index: 1, kind: input, shape index: {}]   ;;  %s4431_s2 = inlined_call_operand.vmem [shape: f32[1,128], index: 2, kind: input, shape index: {}]   ;;  %s4432_s3 = inlined_call_operand.vmem [shape: f32[1,128], index: 3, kind: input, shape index: {}]   ;;  %s4433_s4 = inlined_call_operand.vmem [shape: f32[2,256,128], index: 4, kind: output, shape index: {}]  }
   0x1   :  { %s3142_s17 = smov 0  }
   0x2 LB: > { %s26_s18 = sadd.s32 1, %s3099_s16  ;;  %p2592_p0 = scmp.ge.s32.totalorder %s3103_s17, 1  ;;  %s3103_s17 = sphi %s3142_s17, %s14_s17   ;;  %s3099_s16 = sphi %s3140_s16, %s4441_s16   ;;  %s3095_s15 = sphi %s3138_s15, %s4440_s15  }
   0x3   : > { %p28_p1 = scmp.ge.s32.totalorder %s26_s18, 2  ;;  %p182_p2 = scmp.lt.s32.totalorder %s3103_s17, 3 }
   0x5   : > { %s4443_s18 = smov (%p28_p1, %s26_s18), 0  ;;  %p183_p3 = pnand %p2592_p0, %p182_p2 }
   0x7   : > { %186 = sbr.rel (%p183_p3) target bundleno = 623 (0x26f), region = 36 }
   0xc   : > { %p216_p4 = scmp.lt.s32.totalorder %s3095_s15, 1  ;;  %vm558_vm0 = vsmask.f32 7424  ;;  %s3105_s23 = smov 8   ;;  %vm831_vm1 = vcmask 1046528   ;;  %vm1936_vm2 = vcmask 64512  }
   0xd   : > { %s3106_s24 = smov 16   ;;  %s3107_s25 = smov 24   ;;  %vm1969_vm3 = vcmask 130048   ;;  %vm2002_vm4 = vcmask 195584   ;;  %vm2269_vm5 = vcmask 1043456   ;;  %vm2035_vm6 = vcmask 261120  }
   0xe   : > { %s4445_s15 = smov (!%p216_p4, %s3095_s15), 1  ;;  %s3108_s26 = smov 32   ;;  %vm2068_vm7 = vcmask 326656   ;;  %vm2101_vm8 = vcmask 392192   ;;  %vm2134_vm9 = vcmask 457728   ;;  %vm2167_vm10 = vcmask 523264  }
   0xf   : > { %s2969_s19 = smul.u32 216, %s4445_s15  ;;  %s3109_s27 = smov 48   ;;  %vm2236_vm11 = vcmask 588800  }
  0x10   : > { %s3110_s28 = smov 40   ;;  %s3111_s29 = smov 56  }
  0x11   : > { %s3162_s22 = scalar_lea.vmem %s4429_s0, %s2969_s19  ;;  %s3112_s30 = smov 64  }
  0x12   : > { %v3165_v0 = vld [vmem:[%s3162_s22 + $0x30] sm:$0xff]   ;;  %v272_v1 = vld [vmem:[%s3162_s22 + $0x38] sm:$0x1]  ;;  %v270_v6 = vld [vmem:[%s3162_s22 + $0x20] sm:$0x1] }
  0x13   : > { %v3169_v2 = vld [vmem:[%s3162_s22 + $0x18] sm:$0xff]   ;;  %v530_v3 = vunpack.c.l.b16 %v272_v1  ;;  %v608_v4 = vshrl.u32 %v3165_v0, 16  ;;  %v610_v5 = vshll.u32 %v3165_v0, 16  ;;  %v2764_v8 = vld [vmem:[%s3162_s22] sm:$0xff]   ;;  %v528_v9 = vunpack.c.l.b16 %v270_v6  ;;  %v268_v11 = vld [vmem:[%s3162_s22 + $0x8] sm:$0x1] }
  0x14   : > { %v584_v7 = vshrl.u32 %v3169_v2, 16  ;;  %v586_v10 = vshll.u32 %v3169_v2, 16  ;;  %v560_v12 = vshrl.u32 %v2764_v8, 16  ;;  %v562_v13 = vshll.u32 %v2764_v8, 16  ;;  %v3179_v14 = vld [vmem:[%s3162_s22 + $0x60] sm:$0xff]   ;;  %v3209_v42 = vld [vmem:[%s3162_s22 + $0x48] sm:$0xff]  }
  0x15   : > { %v3181_v15 = vpack.c.b16 %v530_v3, %v530_v3  ;;  %v612_v16 = vrot.slane %v610_v5, 1  ;;  %v526_v17 = vunpack.c.l.b16 %v268_v11  ;;  %v276_v18 = vld [vmem:[%s3162_s22 + $0x68] sm:$0x1]  ;;  %v656_v19 = vshrl.u32 %v3179_v14, 16  ;;  %v271_v30 = vld [vmem:[%s3162_s22 + $0x2c] sm:$0x1] }
  0x16   : > { %v3185_v20 = vpack.c.b16 %v528_v9, %v528_v9  ;;  %v588_v21 = vrot.slane %v586_v10, 1  ;;  %v564_v22 = vrot.slane %v562_v13, 1  ;;  %v534_v23 = vunpack.c.l.b16 %v276_v18  ;;  %v3188_v24 = vld [vmem:[%s3162_s22 + $0x24] sm:$0xff]   ;;  %v274_v35 = vld [vmem:[%s3162_s22 + $0x50] sm:$0x1]  ;;  %v3221_v50 = vld [vmem:[%s3162_s22 + $0x3c] sm:$0xff]  }
  0x17   : > { %v3191_v25 = vld [vmem:[%s3162_s22 + $0x24] sm:$0xf0]  ;;  %v3193_v26 = vor.u32 %v612_v16, %v608_v4  ;;  %v615_v27 = vshll.u32 %v3181_v15, 16  ;;  %v3196_v28 = vpack.c.b16 %v526_v17, %v526_v17  ;;  %v658_v29 = vshll.u32 %v3179_v14, 16  ;;  %v3224_v51 = vld [vmem:[%s3162_s22 + $0x3c] sm:$0xf0] }
  0x18   : > { %v3200_v31 = vor.u32 %v588_v21, %v584_v7  ;;  %v591_v32 = vshll.u32 %v3185_v20, 16  ;;  %v565_v33 = vor.u32 %v564_v22, %v560_v12  ;;  %v3203_v34 = vpack.c.b16 %v534_v23, %v534_v23  ;;  %v273_v56 = vld [vmem:[%s3162_s22 + $0x44] sm:$0x1]  ;;  %v3234_v57 = vld [vmem:[%s3162_s22 + $0x54] sm:$0xff]   ;;  %v275_v3 = vld [vmem:[%s3162_s22 + $0x5c] sm:$0x1] }
  0x19   : > { %4436 = vst [vmem:[#allocation2_spill] sm:$0xff] %v3193_v26  ;;  %v617_v36 = vrot.slane %v615_v27, 1  ;;  %v567_v37 = vshll.u32 %v3196_v28, 16  ;;  %v660_v38 = vrot.slane %v658_v29, 1  ;;  %v529_v41 = vunpack.c.l.b16 %v271_v30  ;;  %v3237_v58 = vld [vmem:[%s3162_s22 + $0x54] sm:$0xf0] }
  0x1a   : > { %v593_v39 = vrot.slane %v591_v32, 1  ;;  %v663_v40 = vshll.u32 %v3203_v34, 16  ;;  %v532_v46 = vunpack.c.l.b16 %v274_v35  ;;  %v632_v54 = vshrl.u32 %v3209_v42, 16  ;;  %v3248_v4 = vld [vmem:[%s3162_s22 + $0xc] sm:$0xff]   ;;  %v269_v16 = vld [vmem:[%s3162_s22 + $0x14] sm:$0x1] }
  0x1b   : > { %v618_v43 = vsel %vm558_vm0, %v3193_v26, %v617_v36  ;;  %v569_v44 = vrot.slane %v567_v37, 1  ;;  %v3213_v45 = vor.u32 %v660_v38, %v656_v19  ;;  %v3218_v49 = vpack.c.b16 %v529_v41, %v529_v41  ;;  %v3251_v5 = vld [vmem:[%s3162_s22 + $0xc] sm:$0xf0]  ;;  %v3263_v21 = vld [vmem:[%s3162_s22 + $0x84] sm:$0xff]   ;;  %v279_v36 = vld [vmem:[%s3162_s22 + $0x8c] sm:$0x1] }
  0x1c   : > { %759 = vrot.lane.b32.xlu2 %v618_v43, %s3105_s23  ;;  %v594_v47 = vsel %vm558_vm0, %v3200_v31, %v593_v39  ;;  %v665_v48 = vrot.slane %v663_v40, 1  ;;  %v3228_v53 = vpack.c.b16 %v532_v46, %v532_v46  ;;  %v634_v55 = vshll.u32 %v3209_v42, 16  ;;  %v3266_v22 = vld [vmem:[%s3162_s22 + $0x84] sm:$0xf0]  ;;  %v278_v43 = vld [vmem:[%s3162_s22 + $0x80] sm:$0x1] }
  0x1d   : > { %4437 = vst [vmem:[#allocation3_spill] sm:$0xff] %v3213_v45  ;;  %755 = vrot.lane.b32.xlu1 %v594_v47, %s3105_s23  ;;  %v570_v52 = vsel %vm558_vm0, %v565_v33, %v569_v44  ;;  %v596_v60 = vshrl.u32 %v3188_v24, 16  ;;  %v598_v61 = vshll.u32 %v3188_v24, 16  ;;  %v603_v62 = vshll.u32 %v3218_v49, 16 }
  0x1e   : > { %751 = vrot.lane.b32.xlu0 %v570_v52, %s3105_s23  ;;  %v666_v59 = vsel %vm558_vm0, %v3213_v45, %v665_v48  ;;  %v636_v63 = vrot.slane %v634_v55, 1  ;;  %v639_v1 = vshll.u32 %v3228_v53, 16  ;;  %v531_v8 = vunpack.c.l.b16 %v273_v56  ;;  %v3287_v56 = vld [vmem:[%s3162_s22 + $0x78] sm:$0xff]   ;;  %v3013_v45 = vld [vmem:[%s3162_s22 + $0x24] sm:$0xe] }
  0x1f   : > { %v600_v6 = vrot.slane %v598_v61, 1  ;;  %v605_v7 = vrot.slane %v603_v62, 1  ;;  %v533_v13 = vunpack.c.l.b16 %v275_v3  ;;  %v620_v18 = vshrl.u32 %v3221_v50, 16  ;;  %v277_v3 = vld [vmem:[%s3162_s22 + $0x74] sm:$0x1] }
  0x20   : > { %v3253_v9 = vor.u32 %v636_v63, %v632_v54  ;;  %v641_v10 = vrot.slane %v639_v1, 1  ;;  %v3255_v12 = vpack.c.b16 %v531_v8, %v531_v8  ;;  %v622_v19 = vshll.u32 %v3221_v50, 16  ;;  %v3293_v63 = vld [vmem:[%s3162_s22 + $0x6c] sm:$0xff]  }
  0x21   : > { %v601_v11 = vor.u32 %v600_v6, %v596_v60  ;;  %v3271_v29 = vpack.c.b16 %v533_v13, %v533_v13  ;;  %v644_v32 = vshrl.u32 %v3234_v57, 16  ;;  %v646_v33 = vshll.u32 %v3234_v57, 16  ;;  %v3296_v1 = vld [vmem:[%s3162_s22 + $0x6c] sm:$0xf0] }
  0x22   : > { %v642_v17 = vsel %vm558_vm0, %v3253_v9, %v641_v10  ;;  %v627_v27 = vshll.u32 %v3255_v12, 16  ;;  %v624_v30 = vrot.slane %v622_v19, 1  ;;  %v527_v35 = vunpack.c.l.b16 %v269_v16 }
  0x23   : > { %v606_v23 = vsel %vm558_vm0, %v601_v11, %v605_v7  ;;  %v651_v38 = vshll.u32 %v3271_v29, 16  ;;  %v648_v40 = vrot.slane %v646_v33, 1  ;;  %v572_v46 = vshrl.u32 %v3248_v4, 16 }
  0x24   : > { %767 = vrot.lane.b32.xlu2 %v666_v59, %s3105_s23  ;;  %v629_v37 = vrot.slane %v627_v27, 1  ;;  %v625_v39 = vor.u32 %v624_v30, %v620_v18  ;;  %v3279_v41 = vpack.c.b16 %v527_v35, %v527_v35  ;;  %v574_v47 = vshll.u32 %v3248_v4, 16  ;;  %v282_v18 = vld [vmem:[%s3162_s22 + $0xb0] sm:$0x1]  ;;  %v3310_v27 = vld [vmem:[%s3162_s22 + $0xa8] sm:$0xff]  }
  0x25   : > { %757 = vrot.lane.b32.xlu1 %v606_v23, %s3105_s23  ;;  %v653_v44 = vrot.slane %v651_v38, 1  ;;  %v537_v48 = vunpack.c.l.b16 %v279_v36  ;;  %v649_v54 = vor.u32 %v648_v40, %v644_v32  ;;  %v536_v61 = vunpack.c.l.b16 %v278_v43  ;;  %v3321_v40 = vld [vmem:[%s3162_s22 + $0x9c] sm:$0xf0] }
  0x26   : > { %763 = vrot.lane.b32.xlu0 %v642_v17, %s3105_s23  ;;  %v630_v52 = vsel %vm558_vm0, %v625_v39, %v629_v37  ;;  %v579_v55 = vshll.u32 %v3279_v41, 16  ;;  %v576_v59 = vrot.slane %v574_v47, 1  ;;  %v680_v62 = vshrl.u32 %v3287_v56, 16  ;;  %v3318_v39 = vld [vmem:[%s3162_s22 + $0x9c] sm:$0xff]  }
  0x27   : > { %v3289_v60 = vpack.c.b16 %v537_v48, %v537_v48  ;;  %v654_v6 = vsel %vm558_vm0, %v649_v54, %v653_v44  ;;  %v692_v8 = vshrl.u32 %v3263_v21, 16  ;;  %v694_v10 = vshll.u32 %v3263_v21, 16  ;;  %v281_v48 = vld [vmem:[%s3162_s22 + $0xa4] sm:$0x1] }
  0x28   : > { %v581_v7 = vrot.slane %v579_v55, 1  ;;  %v577_v11 = vor.u32 %v576_v59, %v572_v46  ;;  %v3304_v16 = vpack.c.b16 %v536_v61, %v536_v61  ;;  %v682_v17 = vshll.u32 %v3287_v56, 16  ;;  %v280_v61 = vld [vmem:[%s3162_s22 + $0x98] sm:$0x1] }
  0x29   : > { %v699_v13 = vshll.u32 %v3289_v60, 16  ;;  %v696_v19 = vrot.slane %v694_v10, 1  ;;  %v535_v23 = vunpack.c.l.b16 %v277_v3  ;;  %v540_v38 = vunpack.c.l.b16 %v282_v18 }
  0x2a   : > { %v582_v30 = vsel %vm558_vm0, %v577_v11, %v581_v7  ;;  %v684_v33 = vrot.slane %v682_v17, 1  ;;  %v687_v35 = vshll.u32 %v3304_v16, 16  ;;  %v728_v46 = vshrl.u32 %v3310_v27, 16  ;;  %v3338_v7 = vld [vmem:[%s3162_s22 + $0x90] sm:$0xff]  }
  0x2b   : > { %v701_v32 = vrot.slane %v699_v13, 1  ;;  %v697_v36 = vor.u32 %v696_v19, %v692_v8  ;;  %v3315_v37 = vpack.c.b16 %v535_v23, %v535_v23  ;;  %v730_v47 = vshll.u32 %v3310_v27, 16  ;;  %v3010_v13 = vld [vmem:[%s3162_s22 + $0xc] sm:$0xe] }
  0x2c   : > { %761 = vrot.lane.b32.xlu2 %v630_v52, %s3105_s23  ;;  %v3323_v43 = vor.u32 %v684_v33, %v680_v62  ;;  %v689_v44 = vrot.slane %v687_v35, 1  ;;  %v668_v54 = vshrl.u32 %v3293_v63, 16  ;;  %v670_v55 = vshll.u32 %v3293_v63, 16 }
  0x2d   : > { %765 = vrot.lane.b32.xlu1 %v654_v6, %s3105_s23  ;;  %v702_v52 = vsel %vm558_vm0, %v697_v36, %v701_v32  ;;  %v675_v59 = vshll.u32 %v3315_v37, 16  ;;  %v3335_v3 = vpack.c.b16 %v540_v38, %v540_v38  ;;  %v732_v6 = vrot.slane %v730_v47, 1 }
  0x2e   : > { %753 = vrot.lane.b32.xlu0 %v582_v30, %s3105_s23  ;;  %v690_v62 = vsel %vm558_vm0, %v3323_v43, %v689_v44  ;;  %v672_v8 = vrot.slane %v670_v55, 1  ;;  %v539_v11 = vunpack.c.l.b16 %v281_v48  ;;  %v538_v19 = vunpack.c.l.b16 %v280_v61  ;;  %v3357_v48 = vld [vmem:[%s3162_s22 + $0xb4] sm:$0xff]   ;;  %v2883_v61 = vld [vmem:[%s3162_s22] sm:$0xe] }
  0x2f   : > { %v677_v10 = vrot.slane %v675_v59, 1  ;;  %v3342_v17 = vor.u32 %v732_v6, %v728_v46  ;;  %v735_v18 = vshll.u32 %v3335_v3, 16  ;;  %v706_v32 = vshll.u32 %v3338_v7, 16  ;;  %v2882_v59 = vld [vmem:[%s3162_s22] sm:$0xf0] }
  0x30   : > { %v673_v23 = vor.u32 %v672_v8, %v668_v54  ;;  %v3346_v30 = vpack.c.b16 %v539_v11, %v539_v11  ;;  %v3349_v35 = vpack.c.b16 %v538_v19, %v538_v19  ;;  %v704_v36 = vshrl.u32 %v3338_v7, 16  ;;  %v283_v11 = vld [vmem:[%s3162_s22 + $0xbc] sm:$0x1] }
  0x31   : > { %v737_v33 = vrot.slane %v735_v18, 1  ;;  %v716_v44 = vshrl.u32 %v3318_v39, 16  ;;  %v718_v46 = vshll.u32 %v3318_v39, 16  ;;  %v708_v54 = vrot.slane %v706_v32, 1 }
  0x32   : > { %v678_v38 = vsel %vm558_vm0, %v673_v23, %v677_v10  ;;  %v723_v47 = vshll.u32 %v3346_v30, 16  ;;  %v711_v55 = vshll.u32 %v3349_v35, 16  ;;  %v3011_v10 = vor.u32 %v3010_v13, %v3251_v5 }
  0x33   : > { %v720_v6 = vrot.slane %v718_v46, 1  ;;  %v3370_v18 = vor.u32 %v708_v54, %v704_v36  ;;  %v2884_v32 = vor.u32 %v2883_v61, %v2882_v59  ;;  %v541_v26 = vunpack.c.l.b16 %v283_v11 }
  0x34   : > { %773 = vrot.lane.b32.xlu2 %v702_v52, %s3105_s23  ;;  %v3360_v52 = vld [vmem:[%s3162_s22 + $0xb4] sm:$0xf0]  ;;  %v725_v8 = vrot.slane %v723_v47, 1  ;;  %v713_v19 = vrot.slane %v711_v55, 1  ;;  %v835_v5 = vrot.slane %v3011_v10, 1  ;;  %v833_v13 = vrot.slane %v3196_v28, 1 }
  0x35   : > { %771 = vrot.lane.b32.xlu1 %v690_v62, %s3105_s23  ;;  %v738_v62 = vsel %vm558_vm0, %v3342_v17, %v737_v33  ;;  %v721_v23 = vor.u32 %v720_v6, %v716_v44  ;;  %v3380_v36 = vpack.c.b16 %v541_v26, %v541_v26  ;;  %v2888_v44 = vld [vmem:[%s3162_s22 + $0x30] sm:$0xf0]  ;;  %v832_v47 = vrot.slane %v2884_v32, 1  ;;  %v2886_v26 = vld [vmem:[%s3162_s22 + $0x18] sm:$0xe] }
  0x36   : > { %769 = vrot.lane.b32.xlu0 %v678_v38, %s3105_s23  ;;  %v836_v38 = vrot.slane %v3279_v41, 1  ;;  %v714_v46 = vsel %vm558_vm0, %v3370_v18, %v713_v19  ;;  %v2889_v41 = vld [vmem:[%s3162_s22 + $0x30] sm:$0xe]  ;;  %v740_v54 = vshrl.u32 %v3357_v48, 16  ;;  %v742_v55 = vshll.u32 %v3357_v48, 16 }
  0x37   : > { %v726_v33 = vsel %vm558_vm0, %v721_v23, %v725_v8  ;;  %v747_v59 = vshll.u32 %v3380_v36, 16  ;;  %v2890_v6 = vor.u32 %v2889_v41, %v2888_v44  ;;  %v2885_v8 = vld [vmem:[%s3162_s22 + $0x18] sm:$0xf0]  ;;  %v3016_v10 = vld [vmem:[%s3162_s22 + $0x54] sm:$0xe]  ;;  %v834_v11 = vsel %vm831_vm1, %v832_v47, %v833_v13 }
  0x38   : > { %v837_v61 = vsel %vm831_vm1, %v835_v5, %v836_v38  ;;  %v3014_v23 = vor.u32 %v3013_v45, %v3191_v25  ;;  %v845_v32 = vrot.slane %v3181_v15, 1  ;;  %v3019_v5 = vld [vmem:[%s3162_s22 + $0x3c] sm:$0xe]  ;;  %v842_v13 = vrot.slane %v3218_v49, 1  ;;  %v2891_v45 = vld [vmem:[%s3162_s22 + $0x48] sm:$0xf0] }
  0x39   : > { %v749_v28 = vrot.slane %v747_v59, 1  ;;  %v839_v25 = vrot.slane %v3185_v20, 1  ;;  %v2892_v41 = vld [vmem:[%s3162_s22 + $0x48] sm:$0xe]  ;;  %v3022_v49 = vld [vmem:[%s3162_s22 + $0x6c] sm:$0xe] }
  0x3a   : > { %v841_v44 = vrot.slane %v3014_v23, 1  ;;  %v2893_v59 = vor.u32 %v2892_v41, %v2891_v45  ;;  %v857_v45 = vrot.slane %v3203_v34, 1  ;;  %v2901_v41 = vld [vmem:[%s3162_s22 + $0x90] sm:$0xe] }
  0x3c   : > { %779 = vrot.lane.b32.xlu2 %v738_v62, %s3105_s23  ;;  %v744_v62 = vrot.slane %v742_v55, 1  ;;  %v843_v55 = vsel %vm831_vm1, %v841_v44, %v842_v13 }
  0x3d   : > { %777 = vrot.lane.b32.xlu1 %v726_v33, %s3105_s23  ;;  %v844_v33 = vrot.slane %v2890_v6, 1  ;;  %v3020_v6 = vor.u32 %v3019_v5, %v3224_v51  ;;  %v3025_v51 = vld [vmem:[%s3162_s22 + $0x9c] sm:$0xe] }
  0x3e   : > { %775 = vrot.lane.b32.xlu0 %v714_v46, %s3105_s23  ;;  %v745_v19 = vor.u32 %v744_v62, %v740_v54  ;;  %v2887_v46 = vor.u32 %v2886_v26, %v2885_v8  ;;  %v3017_v54 = vor.u32 %v3016_v10, %v3237_v58  ;;  %v854_v62 = vrot.slane %v3271_v29, 1  ;;  %v2897_v8 = vld [vmem:[%s3162_s22 + $0x78] sm:$0xf0]  ;;  %v2898_v58 = vld [vmem:[%s3162_s22 + $0x78] sm:$0xe] }
  0x3f   : > { %v846_v15 = vsel %vm831_vm1, %v844_v33, %v845_v32  ;;  %v851_v26 = vrot.slane %v3228_v53, 1  ;;  %v2899_v23 = vor.u32 %v2898_v58, %v2897_v8  ;;  %v2894_v32 = vld [vmem:[%s3162_s22 + $0x60] sm:$0xf0]  ;;  %v2895_v29 = vld [vmem:[%s3162_s22 + $0x60] sm:$0xe]  ;;  %v3023_v33 = vor.u32 %v3022_v49, %v3296_v1  ;;  %v3448_v58 = vld [vmem:[%s3162_s22 + $0xc] sm:$0xff]  }
  0x40   : > { %v750_v38 = vsel %vm558_vm0, %v745_v19, %v749_v28  ;;  %v838_v47 = vrot.slane %v2887_v46, 1  ;;  %v853_v20 = vrot.slane %v3017_v54, 1  ;;  %v850_v28 = vrot.slane %v2893_v59, 1  ;;  %v2900_v1 = vld [vmem:[%s3162_s22 + $0x90] sm:$0xf0] }
  0x41   : > { %v848_v19 = vrot.slane %v3255_v12, 1  ;;  %v863_v53 = vrot.slane %v3304_v16, 1  ;;  %v862_v5 = vrot.slane %v2899_v23, 1  ;;  %v2896_v44 = vor.u32 %v2895_v29, %v2894_v32  ;;  %v3028_v12 = vld [vmem:[%s3162_s22 + $0x84] sm:$0xe] }
  0x42   : > { %v855_v10 = vsel %vm831_vm1, %v853_v20, %v854_v62  ;;  %v859_v13 = vrot.slane %v3023_v33, 1  ;;  %v872_v49 = vrot.slane %v3346_v30, 1  ;;  %v869_v20 = vrot.slane %v3349_v35, 1  ;;  %v2903_v30 = vld [vmem:[%s3162_s22 + $0xa8] sm:$0xf0]  ;;  %v3465_v29 = vld [vmem:[%s3162_s22 + $0x24] sm:$0xff]  }
  0x43   : > { %v856_v16 = vrot.slane %v2896_v44, 1  ;;  %v866_v8 = vrot.slane %v3289_v60, 1  ;;  %v875_v32 = vrot.slane %v3335_v3, 1  ;;  %v3476_v3 = vld [vmem:[%s3162_s22 + $0x54] sm:$0xff]   ;;  %v3484_v33 = vld [vmem:[%s3162_s22 + $0x3c] sm:$0xff]  }
  0x44   : > { %882 = vrot.lane.b32.xlu2 %v837_v61, %s3106_s24  ;;  %v840_v61 = vsel %vm831_vm1, %v838_v47, %v839_v25  ;;  %v860_v25 = vrot.slane %v3315_v37, 1  ;;  %v3026_v47 = vor.u32 %v3025_v51, %v3321_v40  ;;  %v3031_v37 = vld [vmem:[%s3162_s22 + $0xb4] sm:$0xe]  ;;  %v3468_v51 = vld [vmem:[%s3162_s22 + $0x24] sm:$0xf0] }
  0x45   : > { %880 = vrot.lane.b32.xlu1 %v834_v11, %s3106_s24  ;;  %v847_v11 = vrot.slane %v3020_v6, 1  ;;  %v858_v59 = vsel %vm831_vm1, %v856_v16, %v857_v45  ;;  %v3497_v44 = vld [vmem:[%s3162_s22 + $0x6c] sm:$0xf0]  ;;  %v3517_v45 = vld [vmem:[%s3162_s22 + $0x84] sm:$0xf0] }
  0x46   : > { %781 = vrot.lane.b32.xlu0 %v750_v38, %s3105_s23  ;;  %v852_v38 = vsel %vm831_vm1, %v850_v28, %v851_v26  ;;  %v861_v54 = vsel %vm831_vm1, %v859_v13, %v860_v25  ;;  %v871_v34 = vrot.slane %v3026_v47, 1  ;;  %v3451_v28 = vld [vmem:[%s3162_s22 + $0xc] sm:$0xf0]  ;;  %v2620_v13 = vld [vmem:[%s3162_s22 + $0x9c] sm:$0xff]   ;;  %v3514_v25 = vld [vmem:[%s3162_s22 + $0x84] sm:$0xff]   ;;  %s2758_s23 = sshll.u32 %s4445_s15, 8 }
  0x47   : > { %v849_v46 = vsel %vm831_vm1, %v847_v11, %v848_v19  ;;  %v878_v19 = vrot.slane %v3380_v36, 1  ;;  %v2628_v16 = vld [vmem:[%s3162_s22 + $0x14] sm:$0x1] }
  0x48   : > { %v873_v62 = vsel %vm831_vm1, %v871_v34, %v872_v49  ;;  %v3528_v47 = vld [vmem:[%s3162_s22 + $0xb4] sm:$0xff]   ;;  %v1040_v34 = vunpack.c.l.b16 %v2628_v16 }
  0x4c   : > { %888 = vrot.lane.b32.xlu2 %v846_v15, %s3106_s24  ;;  %v864_v15 = vsel %vm831_vm1, %v862_v5, %v863_v53  ;;  %v3487_v53 = vld [vmem:[%s3162_s22 + $0x3c] sm:$0xf0]  ;;  %v2612_v5 = vld [vmem:[%s3162_s22 + $0x6c] sm:$0xff]  }
  0x4d   : > { %886 = vrot.lane.b32.xlu1 %v843_v55, %s3106_s24  ;;  %v2902_v55 = vor.u32 %v2901_v41, %v2900_v1  ;;  %v2636_v41 = vld [vmem:[%s3162_s22 + $0x74] sm:$0x1] }
  0x4e   : > { %884 = vrot.lane.b32.xlu0 %v840_v61, %s3106_s24  ;;  %v3029_v61 = vor.u32 %v3028_v12, %v3266_v22  ;;  %v2904_v22 = vld [vmem:[%s3162_s22 + $0xa8] sm:$0xe] }
  0x4f   : > { %v868_v40 = vrot.slane %v2902_v55, 1  ;;  %v2905_v11 = vor.u32 %v2904_v22, %v2903_v30  ;;  %v1048_v55 = vunpack.c.l.b16 %v2636_v41 }
  0x50   : > { %v865_v6 = vrot.slane %v3029_v61, 1 }
  0x51   : > { %v870_v26 = vsel %vm831_vm1, %v868_v40, %v869_v20  ;;  %v874_v23 = vrot.slane %v2905_v11, 1  ;;  %v3542_v40 = vpack.c.b16 %v1048_v55, %v1048_v55  ;;  %v1075_v20 = vshll.u32 %v3448_v58, 16 }
  0x52   : > { %v867_v35 = vsel %vm831_vm1, %v865_v6, %v866_v8  ;;  %v3550_v6 = vld [vmem:[%s3162_s22 + $0xc0] sm:$0xff]   ;;  %v1217_v8 = vshrl.u32 %v2620_v13, 16 }
  0x53   : > { %v876_v36 = vsel %vm831_vm1, %v874_v23, %v875_v32  ;;  %v1176_v11 = vshll.u32 %v3542_v40, 16  ;;  %v3034_v23 = vld [vmem:[%s3162_s22 + $0x9c] sm:$0xe] }
  0x54   : > { %894 = vrot.lane.b32.xlu2 %v855_v10, %s3106_s24  ;;  %v3032_v10 = vor.u32 %v3031_v37, %v3360_v52  ;;  %v1219_v37 = vshll.u32 %v2620_v13, 16 }
  0x55   : > { %892 = vrot.lane.b32.xlu1 %v852_v38, %s3106_s24  ;;  %v3479_v38 = vld [vmem:[%s3162_s22 + $0x54] sm:$0xf0]  ;;  %v1178_v16 = vrot.slane %v1176_v11, 1 }
  0x56   : > { %890 = vrot.lane.b32.xlu0 %v849_v46, %s3106_s24  ;;  %v877_v60 = vrot.slane %v3032_v10, 1  ;;  %v1221_v30 = vrot.slane %v1219_v37, 1  ;;  %v1169_v10 = vshrl.u32 %v2612_v5, 16  ;;  %v2700_v37 = vld [vmem:[%s3162_s22 + $0x80] sm:$0x1] }
  0x58   : > { %v879_v52 = vsel %vm831_vm1, %v877_v60, %v878_v19  ;;  %v1073_v60 = vshrl.u32 %v3448_v58, 16  ;;  %v1077_v19 = vrot.slane %v1075_v20, 1  ;;  %v1222_v32 = vor.u32 %v1221_v30, %v1217_v8 }
  0x5a   : > { %v1078_v55 = vor.u32 %v1077_v19, %v1073_v60  ;;  %v2632_v19 = vld [vmem:[%s3162_s22 + $0x44] sm:$0x1] }
  0x5c   : > { %900 = vrot.lane.b32.xlu2 %v864_v15, %s3106_s24 }
  0x5d   : > { %898 = vrot.lane.b32.xlu1 %v861_v54, %s3106_s24  ;;  %v3531_v54 = vld [vmem:[%s3162_s22 + $0xb4] sm:$0xf0] }
  0x5e   : > { %896 = vrot.lane.b32.xlu0 %v858_v59, %s3106_s24 }
  0x64   : > { %906 = vrot.lane.b32.xlu2 %v873_v62, %s3106_s24 }
  0x65   : > { %904 = vrot.lane.b32.xlu1 %v870_v26, %s3106_s24  ;;  %v3553_v26 = vpack.c.b16 %v1040_v34, %v1040_v34 }
  0x66   : > { %902 = vrot.lane.b32.xlu0 %v867_v35, %s3106_s24 }
  0x6c   : > { %992 = vrot.lane.b32.xlu2 %v3448_v58, %s3107_s25 }
  0x6d   : > { %910 = vrot.lane.b32.xlu1 %v879_v52, %s3106_s24 }
  0x6e   : > { %908 = vrot.lane.b32.xlu0 %v876_v36, %s3106_s24  ;;  %v1080_v36 = vshll.u32 %v3553_v26, 16 }
  0x74   : > { %998 = vrot.lane.b32.xlu2 %v3165_v0, %s3107_s25 }
  0x75   : > { %996 = vrot.lane.b32.xlu1 %v3465_v29, %s3107_s25 }
  0x76   : > { %v3491_v46 = vpop.permute.xlu2 %759  ;;  %994 = vrot.lane.b32.xlu0 %v3169_v2, %s3107_s25  ;;  %v3509_v2 = vld [vmem:[%s3162_s22 + $0x9c] sm:$0xf0] }
  0x77   : > { %v3035_v30 = vor.u32 %v3034_v23, %v3509_v2 }
  0x7c   : > { %1004 = vrot.lane.b32.xlu2 %v3476_v3, %s3107_s25 }
  0x7d   : > { %1002 = vrot.lane.b32.xlu1 %v3209_v42, %s3107_s25  ;;  %v2640_v42 = vld [vmem:[%s3162_s22 + $0xa4] sm:$0x1] }
  0x7e   : > { %v3503_v12 = vpop.permute.xlu2 %767  ;;  %1000 = vrot.lane.b32.xlu0 %v3484_v33, %s3107_s25  ;;  %v1052_v15 = vunpack.c.l.b16 %v2640_v42  ;;  %v2704_v42 = vld [vmem:[%s3162_s22 + $0xb0] sm:$0x1] }
  0x7f   : > { %v1564_v20 = vunpack.c.l.b16 %v2704_v42 }
  0x80   : > { %v3534_v59 = vpack.c.b16 %v1052_v15, %v1052_v15 }
  0x81   : > { %v3580_v11 = vpack.c.b16 %v1564_v20, %v1564_v20 }
  0x82   : > { %v1224_v22 = vshll.u32 %v3534_v59, 16 }
  0x84   : > { %1010 = vrot.lane.b32.xlu2 %v3287_v56, %s3107_s25  ;;  %v1226_v52 = vrot.slane %v1224_v22, 1  ;;  %v1560_v22 = vunpack.c.l.b16 %v2700_v37 }
  0x85   : > { %1008 = vrot.lane.b32.xlu1 %v2612_v5, %s3107_s25 }
  0x86   : > { %v3520_v1 = vpop.permute.xlu2 %761  ;;  %1006 = vrot.lane.b32.xlu0 %v3179_v14, %s3107_s25  ;;  %v1171_v14 = vshll.u32 %v2612_v5, 16  ;;  %v3037_v5 = vld [vmem:[%s3162_s22 + $0x6c] sm:$0xe]  ;;  %v1227_v34 = vsel %vm558_vm0, %v1222_v32, %v1226_v52  ;;  %v1380_v52 = vrot.slane %v3035_v30, 1  ;;  %v3585_v42 = vpack.c.b16 %v1560_v22, %v1560_v22 }
  0x88   : > { %v1173_v35 = vrot.slane %v1171_v14, 1  ;;  %v1082_v14 = vrot.slane %v1080_v36, 1  ;;  %v1381_v36 = vrot.slane %v3534_v59, 1  ;;  %v1688_v59 = vshll.u32 %v3585_v42, 16 }
  0x8a   : > { %v1174_v15 = vor.u32 %v1173_v35, %v1169_v10  ;;  %v1083_v10 = vsel %vm558_vm0, %v1078_v55, %v1082_v14  ;;  %v3038_v35 = vor.u32 %v3037_v5, %v3497_v44  ;;  %v1369_v44 = vrot.slane %v3542_v40, 1 }
  0x8b   : > { %v1736_v5 = vshll.u32 %v3580_v11, 16  ;;  %v1382_v55 = vsel %vm831_vm1, %v1380_v52, %v1381_v36  ;;  %v1123_v40 = vshll.u32 %v3484_v33, 16 }
  0x8c   : > { %1016 = vrot.lane.b32.xlu2 %v2620_v13, %s3107_s25  ;;  %v1179_v8 = vsel %vm558_vm0, %v1174_v15, %v1178_v16  ;;  %v1368_v23 = vrot.slane %v3038_v35, 1  ;;  %v1044_v15 = vunpack.c.l.b16 %v2632_v19  ;;  %v2948_v35 = vld [vmem:[%s3162_s22 + $0xa8] sm:$0xf0] }
  0x8d   : > { %1014 = vrot.lane.b32.xlu1 %v3338_v7, %s3107_s25  ;;  %v1738_v14 = vrot.slane %v1736_v5, 1 }
  0x8e   : > { %v3538_v49 = vpop.permute.xlu2 %773  ;;  %1012 = vrot.lane.b32.xlu0 %v3514_v25, %s3107_s25  ;;  %v3601_v20 = vpack.c.b16 %v1044_v15, %v1044_v15  ;;  %v3040_v15 = vld [vmem:[%s3162_s22 + $0x3c] sm:$0xe] }
  0x8f   : > { %v3540_v61 = vpop.permute.xlu1 %755  ;;  %v1739_v19 = vsel %vm558_vm0, %v3342_v17, %v1738_v14  ;;  %v2696_v14 = vld [vmem:[%s3162_s22 + $0x50] sm:$0x1] }
  0x90   : > { %v3547_v62 = vpop.permute.xlu0 %751  ;;  %v1128_v52 = vshll.u32 %v3601_v20, 16 }
  0x94   : > { %1022 = vrot.lane.b32.xlu2 %v3550_v6, %s3107_s25 }
  0x95   : > { %1020 = vrot.lane.b32.xlu1 %v3528_v47, %s3107_s25 }
  0x96   : > { %v3563_v13 = vpop.permute.xlu2 %779  ;;  %1018 = vrot.lane.b32.xlu0 %v3310_v27, %s3107_s25 }
  0x97   : > { %v3567_v41 = vpop.permute.xlu1 %757 }
  0x98   : > { %v3571_v58 = vpop.permute.xlu0 %763 }
  0x9c   : > { %1288 = vrot.lane.b32.xlu2 %v1227_v34, %s3108_s26  ;;  %v1370_v34 = vsel %vm831_vm1, %v1368_v23, %v1369_v44  ;;  %v2943_v23 = vld [vmem:[%s3162_s22 + $0x78] sm:$0xe] }
  0x9d   : > { %1280 = vrot.lane.b32.xlu1 %v1179_v8, %s3108_s26 }
  0x9e   : > { %v883_v60 = vpop.permute.xlu2 %882  ;;  %1264 = vrot.lane.b32.xlu0 %v1083_v10, %s3108_s26  ;;  %v1690_v10 = vrot.slane %v1688_v59, 1  ;;  %v3043_v59 = vld [vmem:[%s3162_s22 + $0xc] sm:$0xe] }
  0x9f   : > { %v766_v32 = vpop.permute.xlu1 %765 }
  0xa0   : > { %v754_v2 = vpop.permute.xlu0 %753  ;;  %v1691_v44 = vsel %vm558_vm0, %v3323_v43, %v1690_v10  ;;  %v1893_v10 = vrot.slane %v3580_v11, 1  ;;  %v3041_v11 = vor.u32 %v3040_v15, %v3487_v53  ;;  %v2637_v15 = vld [vmem:[%s3162_s22 + $0x80] sm:$0x1] }
  0xa1   : > { %v1940_v16 = vsel %vm1936_vm2, %v3248_v4, %v754_v2  ;;  %v1946_v4 = vsel %vm1936_vm2, %v3165_v0, %v3491_v46  ;;  %v1121_v0 = vshrl.u32 %v3484_v33, 16  ;;  %v1125_v46 = vrot.slane %v1123_v40, 1  ;;  %v2942_v2 = vld [vmem:[%s3162_s22 + $0x78] sm:$0xf0] }
  0xa2   : > { %v3597_v37 = vsel %vm1969_vm3, %v1940_v16, %v883_v60  ;;  %v2949_v60 = vld [vmem:[%s3162_s22 + $0xa8] sm:$0xe]  ;;  %v2944_v33 = vor.u32 %v2943_v23, %v2942_v2  ;;  %v1952_v40 = vsel %vm1936_vm2, %v3234_v57, %v766_v32  ;;  %v1881_v57 = vrot.slane %v3585_v42, 1  ;;  %v2874_v23 = vld [vmem:[%s3162_s22 + $0x18] sm:$0xff]  }
  0xa3   : > { %v2950_v5 = vor.u32 %v2949_v60, %v2948_v35  ;;  %v1126_v16 = vor.u32 %v1125_v46, %v1121_v0  ;;  %v2692_v60 = vld [vmem:[%s3162_s22 + $0x20] sm:$0x1]  ;;  %v1556_v32 = vunpack.c.l.b16 %v2696_v14  ;;  %v1587_v53 = vshll.u32 %v2874_v23, 16 }
  0xa4   : > { %1520 = vrot.lane.b32.xlu2 %v3287_v56, %s3109_s27  ;;  %v1880_v0 = vrot.slane %v2944_v33, 1  ;;  %v3004_v14 = vld [vmem:[%s3162_s22] sm:$0xff]  }
  0xa5   : > { %1416 = vrot.lane.b32.xlu1 %v1382_v55, %s3110_s28  ;;  %v1130_v55 = vrot.slane %v1128_v52, 1  ;;  %v3642_v52 = vld [vmem:[%s3162_s22 + $0x48] sm:$0xff]   ;;  %v3650_v42 = vpack.c.b16 %v1556_v32, %v1556_v32 }
  0xa6   : > { %v889_v8 = vpop.permute.xlu2 %888  ;;  %1408 = vrot.lane.b32.xlu0 %v1370_v34, %s3110_s28 }
  0xa7   : > { %v772_v30 = vpop.permute.xlu1 %771  ;;  %v3608_v22 = vsel %vm1969_vm3, %v1946_v4, %v889_v8  ;;  %v1892_v8 = vrot.slane %v2950_v5, 1  ;;  %v1882_v5 = vsel %vm831_vm1, %v1880_v0, %v1881_v57  ;;  %v1640_v57 = vshll.u32 %v3650_v42, 16 }
  0xa8   : > { %v3617_v36 = vpop.permute.xlu0 %769 }
  0xa9   : > { %v1894_v2 = vsel %vm831_vm1, %v1892_v8, %v1893_v10  ;;  %v1938_v8 = vsel %vm1936_vm2, %v3004_v14, %v3547_v62  ;;  %v1345_v10 = vrot.slane %v3553_v26, 1  ;;  %v2930_v14 = vld [vmem:[%s3162_s22 + $0x18] sm:$0xf0] }
  0xac   : > { %1800 = vrot.lane.b32.xlu2 %v1739_v19, %s3111_s29  ;;  %v1131_v19 = vsel %vm558_vm0, %v1126_v16, %v1130_v55  ;;  %v1635_v16 = vshll.u32 %v3642_v52, 16  ;;  %v1958_v55 = vsel %vm1936_vm2, %v3287_v56, %v772_v30 }
  0xad   : > { %1792 = vrot.lane.b32.xlu1 %v1691_v44, %s3111_s29  ;;  %v1552_v44 = vunpack.c.l.b16 %v2692_v60  ;;  %v1633_v60 = vshrl.u32 %v3642_v52, 16 }
  0xae   : > { %v895_v34 = vpop.permute.xlu2 %894  ;;  %1528 = vrot.lane.b32.xlu0 %v3310_v27, %s3109_s27  ;;  %v3044_v27 = vor.u32 %v3043_v59, %v3451_v28  ;;  %v1357_v28 = vrot.slane %v3601_v20, 1  ;;  %v1637_v0 = vrot.slane %v1635_v16, 1  ;;  %v1049_v20 = vunpack.c.l.b16 %v2637_v15 }
  0xaf   : > { %v3631_v4 = vsel %vm1969_vm3, %v1952_v40, %v895_v34  ;;  %v778_v35 = vpop.permute.xlu1 %777  ;;  %v1356_v34 = vrot.slane %v3041_v11, 1  ;;  %v3661_v59 = vpack.c.b16 %v1552_v44, %v1552_v44  ;;  %v1589_v11 = vrot.slane %v1587_v53, 1 }
  0xb0   : > { %v3639_v46 = vpop.permute.xlu0 %775  ;;  %v1344_v30 = vrot.slane %v3044_v27, 1  ;;  %v1638_v27 = vor.u32 %v1637_v0, %v1633_v60  ;;  %v3677_v16 = vpack.c.b16 %v1049_v20, %v1049_v20  ;;  %v2641_v60 = vld [vmem:[%s3162_s22 + $0xb0] sm:$0x1]  ;;  %v3005_v0 = vld [vmem:[%s3162_s22 + $0x18] sm:$0xff]   ;;  %v3704_v20 = vld [vmem:[%s3162_s22 + $0x84] sm:$0xf0] }
  0xb1   : > { %v1358_v62 = vsel %vm831_vm1, %v1356_v34, %v1357_v28  ;;  %v1592_v44 = vshll.u32 %v3661_v59, 16  ;;  %v1944_v34 = vsel %vm1936_vm2, %v3188_v24, %v3567_v41  ;;  %v1942_v24 = vsel %vm1936_vm2, %v3005_v0, %v3540_v61  ;;  %v2924_v61 = vld [vmem:[%s3162_s22 + $0xa8] sm:$0xf0]  ;;  %v2919_v0 = vld [vmem:[%s3162_s22 + $0x78] sm:$0xe] }
  0xb2   : > { %v1346_v26 = vsel %vm831_vm1, %v1344_v30, %v1345_v10  ;;  %v1188_v30 = vshll.u32 %v3677_v16, 16  ;;  %v2931_v10 = vld [vmem:[%s3162_s22 + $0x18] sm:$0xe] }
  0xb4   : > { %1272 = vrot.lane.b32.xlu2 %v1131_v19, %s3108_s26 }
  0xb5   : > { %1928 = vrot.lane.b32.xlu1 %v1894_v2, %s3112_s30  ;;  %v1585_v2 = vshrl.u32 %v2874_v23, 16 }
  0xb6   : > { %v901_v33 = vpop.permute.xlu2 %900  ;;  %1920 = vrot.lane.b32.xlu0 %v1882_v5, %s3112_s30  ;;  %v1642_v5 = vrot.slane %v1640_v57, 1  ;;  %v3701_v57 = vld [vmem:[%s3162_s22 + $0x84] sm:$0xff]  }
  0xb7   : > { %v3658_v40 = vsel %vm1969_vm3, %v1958_v55, %v901_v33  ;;  %v881_v56 = vpop.permute.xlu1 %880  ;;  %v1964_v55 = vsel %vm1936_vm2, %v3318_v39, %v778_v35  ;;  %v1590_v53 = vor.u32 %v1589_v11, %v1585_v2  ;;  %v2936_v39 = vld [vmem:[%s3162_s22 + $0x48] sm:$0xf0]  ;;  %v2937_v35 = vld [vmem:[%s3162_s22 + $0x48] sm:$0xe] }
  0xb8   : > { %v1971_v19 = vsel %vm1969_vm3, %v1938_v8, %v881_v56  ;;  %v3671_v32 = vpop.permute.xlu0 %781  ;;  %v1643_v56 = vsel %vm558_vm0, %v1638_v27, %v1642_v5  ;;  %v1190_v27 = vrot.slane %v1188_v30, 1  ;;  %v2925_v5 = vld [vmem:[%s3162_s22 + $0xa8] sm:$0xe] }
  0xbc   : > { %1504 = vrot.lane.b32.xlu2 %v2874_v23, %s3109_s27  ;;  %v1594_v23 = vrot.slane %v1592_v44, 1  ;;  %v2932_v44 = vor.u32 %v2931_v10, %v2930_v14  ;;  %v2926_v10 = vor.u32 %v2925_v5, %v2924_v61  ;;  %v3743_v5 = vld [vmem:[%s3162_s22 + $0xb4] sm:$0xff]  }
  0xbd   : > { %1400 = vrot.lane.b32.xlu1 %v1358_v62, %s3110_s28  ;;  %v2938_v62 = vor.u32 %v2937_v35, %v2936_v39  ;;  %v1869_v39 = vrot.slane %v3650_v42, 1 }
  0xbe   : > { %v907_v33 = vpop.permute.xlu2 %906  ;;  %1392 = vrot.lane.b32.xlu0 %v1346_v26, %s3110_s28  ;;  %v1595_v11 = vsel %vm558_vm0, %v1590_v53, %v1594_v23  ;;  %v1053_v26 = vunpack.c.l.b16 %v2641_v60  ;;  %v1856_v14 = vrot.slane %v2932_v44, 1  ;;  %v2918_v60 = vld [vmem:[%s3162_s22 + $0x78] sm:$0xf0] }
  0xbf   : > { %v3683_v15 = vsel %vm1969_vm3, %v1964_v55, %v907_v33  ;;  %v887_v28 = vpop.permute.xlu1 %886  ;;  %v2701_v33 = vld [vmem:[%s3162_s22 + $0x8c] sm:$0x1]  ;;  %v1868_v23 = vrot.slane %v2938_v62, 1  ;;  %v1383_v62 = vrot.slane %v2926_v10, 1 }
  0xc0   : > { %v1977_v8 = vsel %vm1969_vm3, %v1944_v34, %v887_v28  ;;  %v885_v41 = vpop.permute.xlu0 %884  ;;  %v3006_v34 = vld [vmem:[%s3162_s22 + $0x48] sm:$0xff]   ;;  %v1069_v30 = vpack.c.b16 %v1053_v26, %v1053_v26 }
  0xc1   : > { %v3707_v2 = vsel %vm1969_vm3, %v1942_v24, %v885_v41  ;;  %v1950_v28 = vsel %vm1936_vm2, %v3006_v34, %v3571_v58  ;;  %v1561_v24 = vunpack.c.l.b16 %v2701_v33 }
  0xc2   : > { %v1384_v44 = vrot.slane %v1069_v30, 1  ;;  %v1236_v26 = vshll.u32 %v1069_v30, 16 }
  0xc4   : > { %1784 = vrot.lane.b32.xlu2 %v1643_v56, %s3111_s29  ;;  %v1857_v56 = vrot.slane %v3661_v59, 1  ;;  %v1870_v59 = vsel %vm831_vm1, %v1868_v23, %v1869_v39  ;;  %v1385_v39 = vsel %vm831_vm1, %v1383_v62, %v1384_v44  ;;  %v1962_v44 = vsel %vm1936_vm2, %v3338_v7, %v3639_v46  ;;  %v2629_v46 = vld [vmem:[%s3162_s22 + $0x20] sm:$0x1] }
  0xc5   : > { %1776 = vrot.lane.b32.xlu1 %v1595_v11, %s3111_s29  ;;  %v2920_v11 = vor.u32 %v2919_v0, %v2918_v60  ;;  %v3046_v60 = vld [vmem:[%s3162_s22 + $0xb4] sm:$0xe] }
  0xc6   : > { %v993_v55 = vpop.permute.xlu2 %992  ;;  %1512 = vrot.lane.b32.xlu0 %v3642_v52, %s3109_s27  ;;  %v1948_v52 = vsel %vm1936_vm2, %v3221_v50, %v3520_v1  ;;  %v1858_v61 = vsel %vm831_vm1, %v1856_v14, %v1857_v56  ;;  %v3045_v50 = vld [vmem:[%s3162_s22 + $0xb4] sm:$0xf0]  ;;  %v1693_v56 = vshrl.u32 %v3701_v57, 16 }
  0xc7   : > { %v3719_v53 = vsel %vm2002_vm4, %v1971_v19, %v993_v55  ;;  %v893_v35 = vpop.permute.xlu1 %892  ;;  %v1191_v19 = vsel %vm558_vm0, %v3323_v43, %v1190_v27  ;;  %v3739_v43 = vpack.c.b16 %v1561_v24, %v1561_v24  ;;  %v1695_v27 = vshll.u32 %v3701_v57, 16 }
  0xc8   : > { %v1983_v58 = vsel %vm1969_vm3, %v1950_v28, %v893_v35  ;;  %v891_v42 = vpop.permute.xlu0 %890  ;;  %v1956_v55 = vsel %vm1936_vm2, %v3293_v63, %v3617_v36  ;;  %v1371_v34 = vrot.slane %v2920_v11, 1  ;;  %v1372_v28 = vrot.slane %v3677_v16, 1  ;;  %v2705_v36 = vld [vmem:[%s3162_s22 + $0xbc] sm:$0x1] }
  0xc9   : > { %v3734_v41 = vsel %vm1969_vm3, %v1948_v52, %v891_v42  ;;  %v1238_v35 = vrot.slane %v1236_v26, 1  ;;  %v1697_v30 = vrot.slane %v1695_v27, 1  ;;  %v1700_v63 = vshll.u32 %v3739_v43, 16  ;;  %v3049_v52 = vld [vmem:[%s3162_s22 + $0x84] sm:$0xe] }
  0xca   : > { %v1565_v24 = vunpack.c.l.b16 %v2705_v36  ;;  %v1041_v36 = vunpack.c.l.b16 %v2629_v46 }
  0xcb   : > { %v1239_v42 = vsel %vm558_vm0, %v3342_v17, %v1238_v35  ;;  %v1702_v11 = vrot.slane %v1700_v63, 1  ;;  %v2633_v17 = vld [vmem:[%s3162_s22 + $0x50] sm:$0x1]  ;;  %v1741_v35 = vshrl.u32 %v3743_v5, 16 }
  0xcc   : > { %1282 = vrot.lane.b32.xlu2 %v1191_v19, %s3108_s26  ;;  %v1373_v19 = vsel %vm831_vm1, %v1371_v34, %v1372_v28  ;;  %v1581_v27 = vpack.c.b16 %v1565_v24, %v1565_v24  ;;  %v3047_v34 = vor.u32 %v3046_v60, %v3045_v50 }
  0xcd   : > { %1912 = vrot.lane.b32.xlu1 %v1870_v59, %s3112_s30  ;;  %v1698_v59 = vor.u32 %v1697_v30, %v1693_v56 }
  0xce   : > { %v999_v1 = vpop.permute.xlu2 %998  ;;  %1904 = vrot.lane.b32.xlu0 %v1858_v61, %s3112_s30  ;;  %v1743_v61 = vshll.u32 %v3743_v5, 16  ;;  %v1748_v50 = vshll.u32 %v1581_v27, 16  ;;  %v1895_v30 = vrot.slane %v3047_v34, 1  ;;  %v1896_v63 = vrot.slane %v1581_v27, 1  ;;  %v3830_v34 = vld [vmem:[%s3162_s22 + $0x24] sm:$0xff]  }
  0xcf   : > { %v3751_v33 = vsel %vm2002_vm4, %v1977_v8, %v999_v1  ;;  %v899_v23 = vpop.permute.xlu1 %898  ;;  %v3007_v8 = vld [vmem:[%s3162_s22 + $0x60] sm:$0xff]  }
  0xd0   : > { %v1989_v14 = vsel %vm1969_vm3, %v1956_v55, %v899_v23  ;;  %v1954_v10 = vsel %vm1936_vm2, %v3007_v8, %v3503_v12  ;;  %v897_v16 = vpop.permute.xlu0 %896  ;;  %v1703_v55 = vsel %vm558_vm0, %v1698_v59, %v1702_v11  ;;  %v3050_v23 = vor.u32 %v3049_v52, %v3704_v20  ;;  %v2907_v8 = vld [vmem:[%s3162_s22 + $0x18] sm:$0xe]  ;;  %v3008_v11 = vld [vmem:[%s3162_s22 + $0xa8] sm:$0xff]  }
  0xd1   : > { %v3765_v0 = vsel %vm1969_vm3, %v1954_v10, %v897_v16  ;;  %v1745_v56 = vrot.slane %v1743_v61, 1  ;;  %v1884_v16 = vrot.slane %v3739_v43, 1  ;;  %v1750_v52 = vrot.slane %v1748_v50, 1  ;;  %v3825_v61 = vld [vmem:[%s3162_s22 + $0x54] sm:$0xf0] }
  0xd2   : > { %v1883_v20 = vrot.slane %v3050_v23, 1  ;;  %v1057_v43 = vpack.c.b16 %v1041_v36, %v1041_v36  ;;  %v2697_v23 = vld [vmem:[%s3162_s22 + $0x5c] sm:$0x1] }
  0xd3   : > { %v1746_v24 = vor.u32 %v1745_v56, %v1741_v35 }
  0xd4   : > { %1418 = vrot.lane.b32.xlu2 %v1385_v39, %s3110_s28  ;;  %v1045_v39 = vunpack.c.l.b16 %v2633_v17  ;;  %v1348_v17 = vrot.slane %v1057_v43, 1 }
  0xd5   : > { %1410 = vrot.lane.b32.xlu1 %v1373_v19, %s3110_s28  ;;  %v1968_v19 = vsel %vm1936_vm2, %v3357_v48, %v3671_v32  ;;  %v1751_v27 = vsel %vm558_vm0, %v1746_v24, %v1750_v52 }
  0xd6   : > { %v1005_v12 = vpop.permute.xlu2 %1004  ;;  %1290 = vrot.lane.b32.xlu0 %v1239_v42, %s3108_s26  ;;  %v3804_v60 = vpack.c.b16 %v1045_v39, %v1045_v39  ;;  %v1897_v42 = vsel %vm831_vm1, %v1895_v30, %v1896_v63  ;;  %v2693_v30 = vld [vmem:[%s3162_s22 + $0x2c] sm:$0x1]  ;;  %v3052_v63 = vld [vmem:[%s3162_s22 + $0x24] sm:$0xe] }
  0xd7   : > { %v3774_v62 = vsel %vm2002_vm4, %v1983_v58, %v1005_v12  ;;  %v905_v26 = vpop.permute.xlu1 %904  ;;  %v1960_v58 = vsel %vm1936_vm2, %v3263_v21, %v3538_v49  ;;  %v2906_v49 = vld [vmem:[%s3162_s22 + $0x18] sm:$0xf0]  ;;  %v1966_v12 = vsel %vm1936_vm2, %v3008_v11, %v3563_v13 }
  0xd8   : > { %v3783_v1 = vsel %vm1969_vm3, %v1962_v44, %v905_v26  ;;  %v903_v7 = vpop.permute.xlu0 %902  ;;  %v2908_v59 = vor.u32 %v2907_v8, %v2906_v49  ;;  %v1140_v44 = vshll.u32 %v3804_v60, 16  ;;  %v3822_v26 = vld [vmem:[%s3162_s22 + $0x54] sm:$0xff]   ;;  %v2913_v49 = vld [vmem:[%s3162_s22 + $0x48] sm:$0xe]  ;;  %v1557_v8 = vunpack.c.l.b16 %v2697_v23 }
  0xd9   : > { %v3791_v28 = vsel %vm1969_vm3, %v1960_v58, %v903_v7  ;;  %v3051_v58 = vld [vmem:[%s3162_s22 + $0x24] sm:$0xf0]  ;;  %v1647_v52 = vshll.u32 %v3822_v26, 16  ;;  %v1597_v23 = vshrl.u32 %v3830_v34, 16 }
  0xda   : > { %v1347_v13 = vrot.slane %v2908_v59, 1  ;;  %v1142_v46 = vrot.slane %v1140_v44, 1  ;;  %v1599_v59 = vshll.u32 %v3830_v34, 16  ;;  %v1360_v44 = vrot.slane %v3804_v60, 1  ;;  %v2208_v60 = vld [vmem:[%s4430_s1 + $0x20] sm:$0xf] }
  0xdc   : > { %1794 = vrot.lane.b32.xlu2 %v1703_v55, %s3111_s29  ;;  %v1092_v55 = vshll.u32 %v1057_v43, 16  ;;  %v1349_v56 = vsel %vm831_vm1, %v1347_v13, %v1348_v17  ;;  %v1649_v17 = vrot.slane %v1647_v52, 1 }
  0xdd   : > { %1530 = vrot.lane.b32.xlu1 %v3743_v5, %s3109_s27 }
  0xde   : > { %v1011_v21 = vpop.permute.xlu2 %1010  ;;  %1522 = vrot.lane.b32.xlu0 %v3701_v57, %s3109_s27  ;;  %v1885_v57 = vsel %vm831_vm1, %v1883_v20, %v1884_v16  ;;  %v1094_v50 = vrot.slane %v1092_v55, 1  ;;  %v1143_v16 = vsel %vm558_vm0, %v3253_v9, %v1142_v46 }
  0xdf   : > { %v3801_v10 = vsel %vm2002_vm4, %v1989_v14, %v1011_v21  ;;  %v911_v5 = vpop.permute.xlu1 %910  ;;  %v2912_v21 = vld [vmem:[%s3162_s22 + $0x48] sm:$0xf0] }
  0xe0   : > { %v2001_v14 = vsel %vm1969_vm3, %v1968_v19, %v911_v5  ;;  %v909_v48 = vpop.permute.xlu0 %908  ;;  %v1095_v19 = vsel %vm558_vm0, %v3200_v31, %v1094_v50  ;;  %v2914_v5 = vor.u32 %v2913_v49, %v2912_v21  ;;  %v2638_v31 = vld [vmem:[%s3162_s22 + $0x8c] sm:$0x1] }
  0xe1   : > { %v3817_v32 = vsel %vm1969_vm3, %v1966_v12, %v909_v48  ;;  %v3053_v12 = vor.u32 %v3052_v63, %v3051_v58  ;;  %v1243_v63 = vshll.u32 %v3528_v47, 16 }
  0xe4   : > { %1930 = vrot.lane.b32.xlu2 %v1897_v42, %s3112_s30  ;;  %v3858_v42 = vpack.c.b16 %v1557_v8, %v1557_v8 }
  0xe5   : > { %1922 = vrot.lane.b32.xlu1 %v1885_v57, %s3112_s30  ;;  %v1359_v57 = vrot.slane %v2914_v5, 1 }
  0xe6   : > { %v3834_v7 = vpop.permute.xlu2 %1016  ;;  %1802 = vrot.lane.b32.xlu0 %v1751_v27, %s3111_s29  ;;  %v1652_v55 = vshll.u32 %v3858_v42, 16 }
  0xe7   : > { %v997_v39 = vpop.permute.xlu1 %996 }
  0xe8   : > { %v3840_v35 = vsel %vm2002_vm4, %v3707_v2, %v997_v39  ;;  %v995_v36 = vpop.permute.xlu0 %994  ;;  %v1553_v2 = vunpack.c.l.b16 %v2693_v30  ;;  %v1859_v39 = vrot.slane %v3053_v12, 1  ;;  %v2226_v30 = vunpack.c.l.b16 %v2208_v60 }
  0xe9   : > { %v3849_v20 = vsel %vm2002_vm4, %v3597_v37, %v995_v36  ;;  %v2642_v37 = vld [vmem:[%s3162_s22 + $0xbc] sm:$0x1]  ;;  %v1654_v8 = vrot.slane %v1652_v55, 1 }
  0xea   : > { %v1569_v11 = vpack.c.b16 %v1553_v2, %v1553_v2  ;;  %v1054_v27 = vunpack.c.l.b16 %v2642_v37  ;;  %v2231_v2 = vpack.c.b16 %v2226_v30, %v2226_v30  ;;  %v2702_v30 = vld [vmem:[%s3162_s22 + $0x98] sm:$0x1] }
  0xec   : > { %1394 = vrot.lane.b32.xlu2 %v1349_v56, %s3110_s28  ;;  %v1860_v58 = vrot.slane %v1569_v11, 1  ;;  %v1601_v56 = vrot.slane %v1599_v59, 1  ;;  %v1604_v50 = vshll.u32 %v1569_v11, 16  ;;  %v3886_v36 = vpack.c.b16 %v1054_v27, %v1054_v27 }
  0xed   : > { %1274 = vrot.lane.b32.xlu1 %v1143_v16, %s3108_s26  ;;  %v3055_v16 = vld [vmem:[%s3162_s22 + $0x54] sm:$0xe]  ;;  %v1245_v59 = vrot.slane %v1243_v63, 1 }
  0xee   : > { %v1023_v24 = vpop.permute.xlu2 %1022  ;;  %1266 = vrot.lane.b32.xlu0 %v1095_v19, %s3108_s26  ;;  %v1602_v52 = vor.u32 %v1601_v56, %v1597_v23  ;;  %v1606_v37 = vrot.slane %v1604_v50, 1  ;;  %v1248_v11 = vshll.u32 %v3886_v36, 16  ;;  %v3061_v23 = vld [vmem:[%s3162_s22 + $0x84] sm:$0xe]  ;;  %v2761_v56 = vld [vmem:[%s4430_s1 + $0x10] sm:$0xff] }
  0xef   : > { %v3862_v43 = vsel %vm2002_vm4, %v2001_v14, %v1023_v24  ;;  %v1003_v9 = vpop.permute.xlu1 %1002  ;;  %v1645_v14 = vshrl.u32 %v3822_v26, 16  ;;  %v1861_v24 = vsel %vm831_vm1, %v1859_v39, %v1860_v58 }
  0xf0   : > { %v3869_v48 = vsel %vm2002_vm4, %v3734_v41, %v1003_v9  ;;  %v1001_v13 = vpop.permute.xlu0 %1000  ;;  %v1050_v41 = vunpack.c.l.b16 %v2638_v31  ;;  %v1241_v9 = vshrl.u32 %v3528_v47, 16  ;;  %v1250_v58 = vrot.slane %v1248_v11, 1 }
  0xf1   : > { %v3876_v46 = vsel %vm2002_vm4, %v3608_v22, %v1001_v13  ;;  %v1361_v22 = vsel %vm831_vm1, %v1359_v57, %v1360_v44  ;;  %v1650_v49 = vor.u32 %v1649_v17, %v1645_v14  ;;  %v1193_v44 = vshrl.u32 %v3514_v25, 16  ;;  %v2762_v13 = vld [vmem:[%s4430_s1 + $0x18] sm:$0xff]  ;;  %v3058_v14 = vld [vmem:[%s3162_s22 + $0xb4] sm:$0xe] }
  0xf2   : > { %v3894_v19 = vpack.c.b16 %v1050_v41, %v1050_v41  ;;  %v1607_v17 = vsel %vm558_vm0, %v1602_v52, %v1606_v37  ;;  %v1246_v55 = vor.u32 %v1245_v59, %v1241_v9  ;;  %v2706_v41 = vld [vmem:[%s3162_s22 + $0xc8] sm:$0x1]  ;;  %v1255_v52 = vshll.u32 %v3550_v6, 16  ;;  %v2879_v37 = vld [vmem:[%s3162_s22 + $0x90] sm:$0xff]   ;;  %v2630_v59 = vld [vmem:[%s3162_s22 + $0x2c] sm:$0x1] }
  0xf3   : > { %v1655_v31 = vsel %vm558_vm0, %v1650_v49, %v1654_v8  ;;  %v1566_v8 = vunpack.c.l.b16 %v2706_v41  ;;  %v1707_v11 = vshll.u32 %v2879_v37, 16 }
  0xf4   : > { %1514 = vrot.lane.b32.xlu2 %v3822_v26, %s3109_s27  ;;  %v1195_v26 = vshll.u32 %v3514_v25, 16  ;;  %v1200_v47 = vshll.u32 %v3894_v19, 16 }
  0xf5   : > { %1506 = vrot.lane.b32.xlu1 %v3830_v34, %s3109_s27  ;;  %v2271_v34 = vsel %vm2269_vm5, %v2231_v2, 0  ;;  %v3946_v9 = vpack.c.b16 %v1566_v8, %v1566_v8 }
  0xf6   : > { %v3890_v21 = vpop.permute.xlu2 %1288  ;;  %1402 = vrot.lane.b32.xlu0 %v1361_v22, %s3110_s28  ;;  %2955 = vmatpush.bf16.msra.mxu2 %v2271_v34  ;;  %v1197_v27 = vrot.slane %v1195_v26, 1  ;;  %v1202_v39 = vrot.slane %v1200_v47, 1  ;;  %v1251_v22 = vsel %vm558_vm0, %v1246_v55, %v1250_v58  ;;  %v3059_v26 = vor.u32 %v3058_v14, %v3531_v54 }
  0xf7   : > { %v3897_v5 = vpop.permute.xlu1 %1008  ;;  %2956 = vmatpush.bf16.msra.mxu3 %v2271_v34  ;;  %2276 = vmatpush.bf16.msra.mxu0 %v2271_v34  ;;  %v1257_v47 = vrot.slane %v1255_v52, 1  ;;  %v1760_v55 = vshll.u32 %v3946_v9, 16  ;;  %v1042_v58 = vunpack.c.l.b16 %v2630_v59  ;;  %v2634_v59 = vld [vmem:[%s3162_s22 + $0x5c] sm:$0x1] }
  0xf8   : > { %v1007_v12 = vpop.permute.xlu0 %1006  ;;  %2954 = vmatpush.bf16.msra.mxu1 %v2271_v34  ;;  %v1198_v60 = vor.u32 %v1197_v27, %v1193_v44  ;;  %v3062_v34 = vor.u32 %v3061_v23, %v3517_v45  ;;  %v2759_v45 = vld [vmem:[%s4430_s1] sm:$0xff]  ;;  %v1253_v27 = vshrl.u32 %v3550_v6, 16  ;;  %v1705_v23 = vshrl.u32 %v2879_v37, 16 }
  0xf9   : > { %v3905_v57 = vsel %vm2002_vm4, %v3631_v4, %v1007_v12  ;;  %v3056_v4 = vor.u32 %v3055_v16, %v3825_v61  ;;  %v1872_v61 = vrot.slane %v3858_v42, 1  ;;  %v1386_v12 = vrot.slane %v3059_v26, 1  ;;  %v2945_v26 = vld [vmem:[%s3162_s22 + $0x90] sm:$0xf0] }
  0xfa   : > { %2958 = vmatpush.bf16.msra.mxu2 %v2762_v13  ;;  %v1203_v42 = vsel %vm558_vm0, %v1198_v60, %v1202_v39  ;;  %v1374_v14 = vrot.slane %v3062_v34, 1  ;;  %v1709_v60 = vrot.slane %v1707_v11, 1  ;;  %v2946_v34 = vld [vmem:[%s3162_s22 + $0x90] sm:$0xe]  ;;  %v3064_v11 = vld [vmem:[%s3162_s22 + $0x54] sm:$0xe] }
  0xfb   : > { %2959 = vmatpush.bf16.msra.mxu3 %v2762_v13  ;;  %2277 = vmatpush.bf16.msra.mxu0 %v2762_v13  ;;  %v1871_v49 = vrot.slane %v3056_v4, 1 }
  0xfc   : > { %1906 = vrot.lane.b32.xlu2 %v1861_v24, %s3112_s30  ;;  %2957 = vmatpush.bf16.msra.mxu1 %v2762_v13  ;;  %v2760_v24 = vld [vmem:[%s4430_s1 + $0x8] sm:$0xff] }
  0xfd   : > { %1786 = vrot.lane.b32.xlu1 %v1655_v31, %s3111_s29  ;;  %v1387_v31 = vrot.slane %v3886_v36, 1  ;;  %v1375_v36 = vrot.slane %v3894_v19, 1  ;;  %v1099_v19 = vshll.u32 %v3465_v29, 16 }
  0xfe   : > { %v3918_v25 = vpop.permute.xlu2 %1520  ;;  %1778 = vrot.lane.b32.xlu0 %v1607_v17, %s3111_s29  ;;  %2961 = vmatpush.bf16.msra.mxu2 %v2761_v56 }
  0xff   : > { %v1015_v50 = vpop.permute.xlu1 %1014  ;;  %2962 = vmatpush.bf16.msra.mxu3 %v2761_v56  ;;  %2278 = vmatpush.bf16.msra.mxu0 %v2761_v56  ;;  %v1388_v39 = vsel %vm831_vm1, %v1386_v12, %v1387_v31  ;;  %v1101_v52 = vrot.slane %v1099_v19, 1 }
 0x100   : > { %v3929_v63 = vsel %vm2002_vm4, %v3791_v28, %v1015_v50  ;;  %v1013_v16 = vpop.permute.xlu0 %1012  ;;  %v1562_v28 = vunpack.c.l.b16 %v2702_v30  ;;  %2960 = vmatpush.bf16.msra.mxu1 %v2761_v56  ;;  %v3974_v56 = vor.u32 %v1257_v47, %v1253_v27  ;;  %v1376_v50 = vsel %vm831_vm1, %v1374_v14, %v1375_v36  ;;  %v3067_v27 = vld [vmem:[%s3162_s22 + $0x24] sm:$0xe] }
 0x101   : > { %v3934_v2 = vsel %vm2002_vm4, %v3658_v40, %v1013_v16  ;;  %v1873_v40 = vsel %vm831_vm1, %v1871_v49, %v1872_v61  ;;  %v3977_v61 = vpack.c.b16 %v1042_v58, %v1042_v58  ;;  %v2951_v16 = vld [vmem:[%s3162_s22 + $0xc0] sm:$0xf0]  ;;  %v1046_v14 = vunpack.c.l.b16 %v2634_v59 }
 0x102   : > { %2964 = vmatpush.bf16.msra.mxu2 %v2760_v24  ;;  %v3953_v44 = vpack.c.b16 %v1562_v28, %v1562_v28  ;;  %v1899_v58 = vrot.slane %v3946_v9, 1 }
 0x103   : > { %2965 = vmatpush.bf16.msra.mxu3 %v2760_v24  ;;  %2279 = vmatpush.bf16.msra.mxu0 %v2760_v24 }
 0x104   : > { %1292 = vrot.lane.b32.xlu2 %v1251_v22, %s3108_s26  ;;  %2963 = vmatpush.bf16.msra.mxu1 %v2760_v24  ;;  %v1710_v22 = vor.u32 %v1709_v60, %v1705_v23  ;;  %v1097_v24 = vshrl.u32 %v3465_v29, 16  ;;  %v2694_v29 = vld [vmem:[%s3162_s22 + $0x38] sm:$0x1]  ;;  %v1887_v60 = vrot.slane %v3953_v44, 1 }
 0x105   : > { %1284 = vrot.lane.b32.xlu1 %v1203_v42, %s3108_s26  ;;  %v2952_v42 = vld [vmem:[%s3162_s22 + $0xc0] sm:$0xe] }
 0x106   : > { %v3949_v54 = vpop.permute.xlu2 %1800  ;;  %1914 = vrot.lane.b32.xlu0 %v1873_v40, %s3112_s30  ;;  %2967 = vmatpush.bf16.msra.mxu2 %v2759_v45  ;;  %v2953_v31 = vor.u32 %v2952_v42, %v2951_v16  ;;  %v1102_v47 = vor.u32 %v1101_v52, %v1097_v24  ;;  %v3068_v16 = vor.u32 %v3067_v27, %v3468_v51  ;;  %v1145_v24 = vshrl.u32 %v3476_v3, 16 }
 0x107   : > { %v1021_v13 = vpop.permute.xlu1 %1020  ;;  %2968 = vmatpush.bf16.msra.mxu3 %v2759_v45  ;;  %2280 = vmatpush.bf16.msra.mxu0 %v2759_v45 }
 0x108   : > { %v3962_v17 = vsel %vm2002_vm4, %v3817_v32, %v1021_v13  ;;  %v1019_v4 = vpop.permute.xlu0 %1018  ;;  %v1712_v32 = vshll.u32 %v3953_v44, 16  ;;  %2966 = vmatpush.bf16.msra.mxu1 %v2759_v45  ;;  %v2947_v45 = vor.u32 %v2946_v34, %v2945_v26  ;;  %v1350_v51 = vrot.slane %v3068_v16, 1  ;;  %v2933_v16 = vld [vmem:[%s3162_s22 + $0x30] sm:$0xf0] }
 0x109   : > { %v3968_v41 = vsel %vm2002_vm4, %v3683_v15, %v1019_v4  ;;  %v1762_v15 = vrot.slane %v1760_v55, 1  ;;  %v1898_v55 = vrot.slane %v2953_v31, 1  ;;  %v1351_v34 = vrot.slane %v3977_v61, 1 }
 0x10a   : > { %v1714_v49 = vrot.slane %v1712_v32, 1  ;;  %v1886_v23 = vrot.slane %v2947_v45, 1  ;;  %v1147_v32 = vshll.u32 %v3476_v3, 16 }
 0x10b   : > { %v1763_v28 = vsel %vm558_vm0, %v3974_v56, %v1762_v15  ;;  %v3065_v15 = vor.u32 %v3064_v11, %v3479_v38  ;;  %v1900_v9 = vsel %vm831_vm1, %v1898_v55, %v1899_v58  ;;  %v1352_v55 = vsel %vm831_vm1, %v1350_v51, %v1351_v34 }
 0x10c   : > { %1524 = vrot.lane.b32.xlu2 %v2879_v37, %s3109_s27  ;;  %v1104_v37 = vshll.u32 %v3977_v61, 16  ;;  %v1715_v12 = vsel %vm558_vm0, %v1710_v22, %v1714_v49  ;;  %v4012_v22 = vld [vmem:[%s3162_s22 + $0x30] sm:$0xff]   ;;  %v1149_v38 = vrot.slane %v1147_v32, 1  ;;  %v2939_v32 = vld [vmem:[%s3162_s22 + $0x60] sm:$0xf0] }
 0x10d   : > { %1420 = vrot.lane.b32.xlu1 %v1388_v39, %s3110_s28  ;;  %v1554_v39 = vunpack.c.l.b16 %v2694_v29  ;;  %v1611_v26 = vshll.u32 %v4012_v22, 16  ;;  %v1609_v11 = vshrl.u32 %v4012_v22, 16  ;;  %v2020_v29 = vsel %vm2002_vm4, %v3765_v0, %v3897_v5 }
 0x10e   : > { %v3980_v30 = vpop.permute.xlu2 %1272  ;;  %1412 = vrot.lane.b32.xlu0 %v1376_v50, %s3110_s28  ;;  %v1106_v13 = vrot.slane %v1104_v37, 1  ;;  %v1062_v50 = vpack.c.b16 %v1046_v14, %v1046_v14  ;;  %v1150_v45 = vor.u32 %v1149_v38, %v1145_v24 }
 0x10f   : > { %v3983_v8 = vpop.permute.xlu1 %1280  ;;  %v4018_v42 = vpack.c.b16 %v1554_v39, %v1554_v39 }
 0x110   : > { %v3993_v40 = vpop.permute.xlu0 %1264  ;;  %v1107_v19 = vsel %vm558_vm0, %v1102_v47, %v1106_v13  ;;  %v1363_v44 = vrot.slane %v1062_v50, 1  ;;  %v1152_v52 = vshll.u32 %v1062_v50, 16  ;;  %v2028_v47 = vsel %vm2002_vm4, %v3783_v1, %v3834_v7  ;;  %v2698_v13 = vld [vmem:[%s3162_s22 + $0x68] sm:$0x1] }
 0x111   : > { %v1616_v31 = vshll.u32 %v4018_v42, 16  ;;  %v2061_v14 = vsel %vm2035_vm6, %v2028_v47, %v3890_v21  ;;  %v2053_v21 = vsel %vm2035_vm6, %v2020_v29, %v3983_v8  ;;  %v1558_v5 = vunpack.c.l.b16 %v2698_v13  ;;  %v2921_v47 = vld [vmem:[%s3162_s22 + $0x90] sm:$0xf0] }
 0x112   : > { %v1154_v27 = vrot.slane %v1152_v52, 1 }
 0x113   : > { %v1618_v7 = vrot.slane %v1616_v31, 1 }
 0x114   : > { %1804 = vrot.lane.b32.xlu2 %v1763_v28, %s3111_s29  ;;  %v1362_v28 = vrot.slane %v3065_v15, 1  ;;  %v1155_v0 = vsel %vm558_vm0, %v1150_v45, %v1154_v27 }
 0x115   : > { %1796 = vrot.lane.b32.xlu1 %v1715_v12, %s3111_s29  ;;  %v1613_v12 = vrot.slane %v1611_v26, 1 }
 0x116   : > { %v4002_v36 = vpop.permute.xlu2 %1504  ;;  %1532 = vrot.lane.b32.xlu0 %v3550_v6, %s3109_s27  ;;  %v1888_v6 = vsel %vm831_vm1, %v1886_v23, %v1887_v60  ;;  %v1364_v3 = vsel %vm831_vm1, %v1362_v28, %v1363_v44  ;;  %v2877_v23 = vld [vmem:[%s3162_s22 + $0x60] sm:$0xff]   ;;  %v1574_v28 = vpack.c.b16 %v1558_v5, %v1558_v5  ;;  %v4084_v5 = vld [vmem:[%s3162_s22 + $0xcc] sm:$0xff]  }
 0x117   : > { %v1417_v4 = vpop.permute.xlu1 %1416  ;;  %v1614_v1 = vor.u32 %v1613_v12, %v1609_v11  ;;  %v1659_v8 = vshll.u32 %v2877_v23, 16 }
 0x118   : > { %v1409_v49 = vpop.permute.xlu0 %1408  ;;  %v2094_v58 = vsel %vm2068_vm7, %v2061_v14, %v1417_v4  ;;  %v1664_v45 = vshll.u32 %v1574_v28, 16  ;;  %v1863_v14 = vrot.slane %v4018_v42, 1 }
 0x119   : > { %v2086_v39 = vsel %vm2068_vm7, %v2053_v21, %v1409_v49  ;;  %v2934_v49 = vld [vmem:[%s3162_s22 + $0x30] sm:$0xe]  ;;  %v1661_v12 = vrot.slane %v1659_v8, 1 }
 0x11a   : > { %v2119_v44 = vsel %vm2101_vm8, %v2086_v39, %v3918_v25  ;;  %v2935_v34 = vor.u32 %v2934_v49, %v2933_v16  ;;  %v1657_v25 = vshrl.u32 %v2877_v23, 16 }
 0x11c   : > { %1268 = vrot.lane.b32.xlu2 %v1107_v19, %s3108_s26  ;;  %v2940_v19 = vld [vmem:[%s3162_s22 + $0x60] sm:$0xe]  ;;  %v1862_v13 = vrot.slane %v2935_v34, 1 }
 0x11d   : > { %1932 = vrot.lane.b32.xlu1 %v1900_v9, %s3112_s30  ;;  %v1619_v9 = vsel %vm558_vm0, %v1614_v1, %v1618_v7  ;;  %v2941_v24 = vor.u32 %v2940_v19, %v2939_v32  ;;  %v1666_v7 = vrot.slane %v1664_v45, 1 }
 0x11e   : > { %v4023_v37 = vpop.permute.xlu2 %1784  ;;  %1924 = vrot.lane.b32.xlu0 %v1888_v6, %s3112_s30  ;;  %v2643_v6 = vld [vmem:[%s3162_s22 + $0xc8] sm:$0x1] }
 0x11f   : > { %v1793_v59 = vpop.permute.xlu1 %1792  ;;  %v1055_v11 = vunpack.c.l.b16 %v2643_v6  ;;  %v1874_v31 = vrot.slane %v2941_v24, 1  ;;  %v2927_v6 = vld [vmem:[%s3162_s22 + $0xc0] sm:$0xf0] }
 0x120   : > { %v1529_v61 = vpop.permute.xlu0 %1528  ;;  %v2152_v38 = vsel %vm2134_vm9, %v2119_v44, %v1793_v59  ;;  %v2928_v44 = vld [vmem:[%s3162_s22 + $0xc0] sm:$0xe] }
 0x121   : > { %v2127_v60 = vsel %vm2101_vm8, %v2094_v58, %v1529_v61  ;;  %v2922_v61 = vld [vmem:[%s3162_s22 + $0x90] sm:$0xe]  ;;  %v4075_v29 = vpack.c.b16 %v1055_v11, %v1055_v11  ;;  %v2929_v11 = vor.u32 %v2928_v44, %v2927_v6  ;;  %v3073_v44 = vld [vmem:[%s3162_s22 + $0xcc] sm:$0xe] }
 0x122   : > { %v2160_v15 = vsel %vm2134_vm9, %v2127_v60, %v3949_v54  ;;  %v2639_v54 = vld [vmem:[%s3162_s22 + $0x98] sm:$0x1]  ;;  %v2923_v21 = vor.u32 %v2922_v61, %v2921_v47  ;;  %v1767_v47 = vshll.u32 %v4084_v5, 16 }
 0x123   : > { %v1051_v59 = vunpack.c.l.b16 %v2639_v54  ;;  %v1260_v42 = vshll.u32 %v4075_v29, 16  ;;  %v1389_v61 = vrot.slane %v2929_v11, 1 }
 0x124   : > { %1404 = vrot.lane.b32.xlu2 %v1364_v3, %s3110_s28  ;;  %v1875_v3 = vrot.slane %v1574_v28, 1  ;;  %v1377_v32 = vrot.slane %v2923_v21, 1 }
 0x125   : > { %1396 = vrot.lane.b32.xlu1 %v1352_v55, %s3110_s28  ;;  %v1662_v55 = vor.u32 %v1661_v12, %v1657_v25  ;;  %v1262_v16 = vrot.slane %v1260_v42, 1 }
 0x126   : > { %v4049_v4 = vpop.permute.xlu2 %1282  ;;  %1276 = vrot.lane.b32.xlu0 %v1155_v0, %s3108_s26  ;;  %v1876_v1 = vsel %vm831_vm1, %v1874_v31, %v1875_v3  ;;  %v1864_v0 = vsel %vm831_vm1, %v1862_v13, %v1863_v14  ;;  %v2037_v3 = vsel %vm2035_vm6, %v3719_v53, %v3993_v40  ;;  %v1390_v14 = vrot.slane %v4075_v29, 1 }
 0x127   : > { %v1929_v50 = vpop.permute.xlu1 %1928  ;;  %v1667_v39 = vsel %vm558_vm0, %v1662_v55, %v1666_v7  ;;  %v1263_v34 = vsel %vm558_vm0, %v3974_v56, %v1262_v16  ;;  %v2635_v56 = vld [vmem:[%s3162_s22 + $0x68] sm:$0x1]  ;;  %v1769_v29 = vrot.slane %v1767_v47, 1 }
 0x128   : > { %v2193_v26 = vsel %vm2167_vm10, %v2160_v15, %v1929_v50  ;;  %v1921_v52 = vpop.permute.xlu0 %1920  ;;  %v4091_v50 = vld [vmem:[%s3162_s22 + $0x9c] sm:$0xff]   ;;  %v1047_v21 = vunpack.c.l.b16 %v2635_v56 }
 0x129   : > { %2752 = vmatmul.msk.bf16.vlgmr.msra.gmra.mxu3 %vm2236_vm11, %v2193_v26  ;;  %v2185_v51 = vsel %vm2167_vm10, %v2152_v38, %v1921_v52  ;;  %v3069_v15 = vld [vmem:[%s3162_s22 + $0x9c] sm:$0xf0]  ;;  %v2707_v26 = vld [vmem:[%s3162_s22 + $0xd4] sm:$0x1]  ;;  %v2703_v38 = vld [vmem:[%s3162_s22 + $0xa4] sm:$0x1]  ;;  %v2045_v52 = vsel %vm2035_vm6, %v3876_v46, %v3980_v30 }
 0x12a   : > { %2748 = vmatmul.msk.bf16.vlgmr.msra.gmra.mxu2 %vm2236_vm11, %v2185_v51  ;;  %v3070_v51 = vld [vmem:[%s3162_s22 + $0x9c] sm:$0xe]  ;;  %v1567_v25 = vunpack.c.l.b16 %v2707_v26  ;;  %v1563_v31 = vunpack.c.l.b16 %v2703_v38  ;;  %v4144_v6 = vpack.c.b16 %v1047_v21, %v1047_v21  ;;  %v2916_v56 = vld [vmem:[%s3162_s22 + $0x60] sm:$0xe]  ;;  %v2910_v21 = vld [vmem:[%s3162_s22 + $0x30] sm:$0xe] }
 0x12c   : > { %1780 = vrot.lane.b32.xlu2 %v1619_v9, %s3111_s29  ;;  %v4123_v13 = vpack.c.b16 %v1567_v25, %v1567_v25  ;;  %v1579_v55 = vpack.c.b16 %v1563_v31, %v1563_v31  ;;  %v4163_v31 = vld [vmem:[%s3162_s22 + $0x3c] sm:$0xf0] }
 0x12d   : > { %1516 = vrot.lane.b32.xlu1 %v2877_v23, %s3109_s27  ;;  %v1067_v23 = vpack.c.b16 %v1051_v59, %v1051_v59 }
 0x12e   : > { %v4070_v27 = vpop.permute.xlu2 %1418  ;;  %1508 = vrot.lane.b32.xlu0 %v4012_v22, %s3109_s27  ;;  %v4087_v22 = vld [vmem:[%s3162_s22 + $0xcc] sm:$0xf0]  ;;  %v1890_v16 = vrot.slane %v1579_v55, 1 }
 0x12f   : > { %v1401_v58 = vpop.permute.xlu1 %1400  ;;  %v1378_v19 = vrot.slane %v1067_v23, 1  ;;  %v1212_v8 = vshll.u32 %v1067_v23, 16  ;;  %v3071_v23 = vor.u32 %v3070_v51, %v3069_v15 }
 0x130   : > { %v1393_v60 = vpop.permute.xlu0 %1392  ;;  %v2078_v12 = vsel %vm2068_vm7, %v2045_v52, %v1401_v58  ;;  %v2631_v58 = vld [vmem:[%s3162_s22 + $0x38] sm:$0x1] }
 0x131   : > { %v1379_v28 = vsel %vm831_vm1, %v1377_v32, %v1378_v19  ;;  %v1214_v24 = vrot.slane %v1212_v8, 1  ;;  %v2070_v30 = vsel %vm2068_vm7, %v2037_v3, %v1393_v60  ;;  %v1043_v32 = vunpack.c.l.b16 %v2631_v58 }
 0x132   : > { %v1717_v19 = vshrl.u32 %v4091_v50, 16  ;;  %v1889_v15 = vrot.slane %v3071_v23, 1  ;;  %v2909_v23 = vld [vmem:[%s3162_s22 + $0x30] sm:$0xf0] }
 0x133   : > { %v1215_v46 = vsel %vm558_vm0, %v3370_v18, %v1214_v24  ;;  %v1719_v18 = vshll.u32 %v4091_v50, 16  ;;  %v4149_v24 = vpack.c.b16 %v1043_v32, %v1043_v32 }
 0x134   : > { %1916 = vrot.lane.b32.xlu2 %v1876_v1, %s3112_s30  ;;  %v2103_v1 = vsel %vm2101_vm8, %v2070_v30, %v4002_v36  ;;  %v1391_v36 = vsel %vm831_vm1, %v1389_v61, %v1390_v14  ;;  %v2915_v30 = vld [vmem:[%s3162_s22 + $0x60] sm:$0xf0]  ;;  %v4171_v61 = vld [vmem:[%s3162_s22 + $0x6c] sm:$0xff]  }
 0x135   : > { %1908 = vrot.lane.b32.xlu1 %v1864_v0, %s3112_s30  ;;  %v1721_v8 = vrot.slane %v1719_v18, 1  ;;  %v1116_v25 = vshll.u32 %v4149_v24, 16  ;;  %v2695_v18 = vld [vmem:[%s3162_s22 + $0x44] sm:$0x1]  ;;  %v4438_v14 = vld [vmem:[#allocation3_spill] sm:$0xff] }
 0x136   : > { %v4095_v9 = vpop.permute.xlu2 %1794  ;;  %1788 = vrot.lane.b32.xlu0 %v1667_v39, %s3111_s29  ;;  %v1772_v39 = vshll.u32 %v4123_v13, 16 }
 0x137   : > { %v1777_v49 = vpop.permute.xlu1 %1776  ;;  %v1722_v38 = vor.u32 %v1721_v8, %v1717_v19  ;;  %v1118_v47 = vrot.slane %v1116_v25, 1  ;;  %v2911_v8 = vor.u32 %v2910_v21, %v2909_v23 }
 0x138   : > { %v1513_v54 = vpop.permute.xlu0 %1512  ;;  %v2136_v60 = vsel %vm2134_vm9, %v2103_v1, %v1777_v49  ;;  %v1724_v49 = vshll.u32 %v1579_v55, 16  ;;  %v2917_v1 = vor.u32 %v2916_v56, %v2915_v30 }
 0x139   : > { %v2111_v45 = vsel %vm2101_vm8, %v2078_v12, %v1513_v54  ;;  %v1891_v54 = vsel %vm831_vm1, %v1889_v15, %v1890_v16  ;;  %v4160_v12 = vld [vmem:[%s3162_s22 + $0x3c] sm:$0xff]  }
 0x13a   : > { %v2144_v40 = vsel %vm2134_vm9, %v2111_v45, %v4023_v37  ;;  %v1765_v37 = vshrl.u32 %v4084_v5, 16  ;;  %v1726_v51 = vrot.slane %v1724_v49, 1  ;;  %v1365_v19 = vrot.slane %v2917_v1, 1 }
 0x13b   : > { %v1623_v49 = vshll.u32 %v4160_v12, 16 }
 0x13c   : > { %1414 = vrot.lane.b32.xlu2 %v1379_v28, %s3110_s28  ;;  %v1770_v26 = vor.u32 %v1769_v29, %v1765_v37  ;;  %v1774_v28 = vrot.slane %v1772_v39, 1  ;;  %v1727_v3 = vsel %vm558_vm0, %v1722_v38, %v1726_v51  ;;  %v4439_v37 = vld [vmem:[#allocation2_spill] sm:$0xff]  ;;  %v1555_v29 = vunpack.c.l.b16 %v2695_v18  ;;  %v2699_v39 = vld [vmem:[%s3162_s22 + $0x74] sm:$0x1] }
 0x13d   : > { %1294 = vrot.lane.b32.xlu1 %v1263_v34, %s3108_s26  ;;  %v1559_v15 = vunpack.c.l.b16 %v2699_v39  ;;  %v1353_v38 = vrot.slane %v2911_v8, 1  ;;  %v1625_v25 = vrot.slane %v1623_v49, 1 }
 0x13e   : > { %v4120_v59 = vpop.permute.xlu2 %1930  ;;  %1286 = vrot.lane.b32.xlu0 %v1215_v46, %s3108_s26  ;;  %v1775_v11 = vsel %vm558_vm0, %v1770_v26, %v1774_v28  ;;  %v3074_v46 = vor.u32 %v3073_v44, %v4087_v22  ;;  %v1902_v22 = vrot.slane %v4123_v13, 1  ;;  %v1571_v16 = vpack.c.b16 %v1555_v29, %v1555_v29 }
 0x13f   : > { %v1913_v53 = vpop.permute.xlu1 %1912  ;;  %v1671_v28 = vshll.u32 %v4171_v61, 16 }
 0x140   : > { %v2177_v7 = vsel %vm2167_vm10, %v2144_v40, %v1913_v53  ;;  %v1905_v0 = vpop.permute.xlu0 %1904  ;;  %v4174_v53 = vld [vmem:[%s3162_s22 + $0x6c] sm:$0xf0]  ;;  %v1901_v58 = vrot.slane %v3074_v46, 1  ;;  %v1866_v39 = vrot.slane %v1571_v16, 1 }
 0x141   : > { %2744 = vmatmul.msk.bf16.vlgmr.msra.gmra.mxu1 %vm2236_vm11, %v2177_v7  ;;  %v2169_v42 = vsel %vm2167_vm10, %v2136_v60, %v1905_v0  ;;  %v2055_v60 = vsel %vm2035_vm6, %v3801_v10, %v4049_v4  ;;  %v1366_v4 = vrot.slane %v4144_v6, 1  ;;  %v1673_v46 = vrot.slane %v1671_v28, 1 }
 0x142   : > { %2740 = vmatmul.msk.bf16.vlgmr.msra.gmra.mxu0 %vm2236_vm11, %v2169_v42  ;;  %v1119_v42 = vsel %vm558_vm0, %v4439_v37, %v1118_v47 }
 0x144   : > { %1534 = vrot.lane.b32.xlu2 %v4084_v5, %s3109_s27 }
 0x145   : > { %1526 = vrot.lane.b32.xlu1 %v4091_v50, %s3109_s27  ;;  %v1164_v50 = vshll.u32 %v4144_v6, 16  ;;  %v1354_v6 = vrot.slane %v4149_v24, 1  ;;  %v1669_v24 = vshrl.u32 %v4171_v61, 16 }
 0x146   : > { %1422 = vrot.lane.b32.xlu0 %v1391_v36, %s3110_s28  ;;  %v4152_v52 = vpop.permute.xlu2 %1394  ;;  %v1903_v36 = vsel %vm831_vm1, %v1901_v58, %v1902_v22 }
 0x147   : > { %v1411_v5 = vpop.permute.xlu1 %1410  ;;  %v1166_v45 = vrot.slane %v1164_v50, 1  ;;  %v1367_v50 = vsel %vm831_vm1, %v1365_v19, %v1366_v4  ;;  %v1355_v47 = vsel %vm831_vm1, %v1353_v38, %v1354_v6  ;;  %v1674_v18 = vor.u32 %v1673_v46, %v1669_v24 }
 0x148   : > { %v1291_v34 = vpop.permute.xlu0 %1290  ;;  %v2088_v32 = vsel %vm2068_vm7, %v2055_v60, %v1411_v5 }
 0x149   : > { %v1167_v55 = vsel %vm558_vm0, %v4438_v14, %v1166_v45  ;;  %v2063_v10 = vsel %vm2035_vm6, %v3968_v41, %v1291_v34  ;;  %v3076_v45 = vld [vmem:[%s3162_s22 + $0x6c] sm:$0xe] }
 0x14a   : > { %v2096_v41 = vsel %vm2068_vm7, %v2063_v10, %v4070_v27  ;;  %v1628_v27 = vshll.u32 %v1571_v16, 16 }
 0x14c   : > { %1926 = vrot.lane.b32.xlu2 %v1891_v54, %s3112_s30 }
 0x14d   : > { %1806 = vrot.lane.b32.xlu1 %v1775_v11, %s3111_s29  ;;  %v1621_v11 = vshrl.u32 %v4160_v12, 16 }
 0x14e   : > { %1798 = vrot.lane.b32.xlu0 %v1727_v3, %s3111_s29  ;;  %v4186_v0 = vpop.permute.xlu2 %1514 }
 0x14f   : > { %v1531_v40 = vpop.permute.xlu1 %1530 }
 0x150   : > { %v1523_v7 = vpop.permute.xlu0 %1522  ;;  %v2129_v54 = vsel %vm2101_vm8, %v2096_v41, %v1531_v40  ;;  %v3079_v40 = vld [vmem:[%s3162_s22 + $0x3c] sm:$0xe] }
 0x151   : > { %v2121_v13 = vsel %vm2101_vm8, %v2088_v32, %v1523_v7  ;;  %v3077_v7 = vor.u32 %v3076_v45, %v4174_v53  ;;  %v3080_v23 = vor.u32 %v3079_v40, %v4163_v31 }
 0x152   : > { %v2154_v26 = vsel %vm2134_vm9, %v2121_v13, %v4095_v9  ;;  %v1575_v9 = vpack.c.b16 %v1559_v15, %v1559_v15 }
 0x153   : > { %v1877_v60 = vrot.slane %v3077_v7, 1  ;;  %v1865_v29 = vrot.slane %v3080_v23, 1 }
 0x154   : > { %1278 = vrot.lane.b32.xlu2 %v1167_v55, %s3108_s26  ;;  %v1676_v30 = vshll.u32 %v1575_v9, 16  ;;  %v1626_v55 = vor.u32 %v1625_v25, %v1621_v11  ;;  %v1878_v37 = vrot.slane %v1575_v9, 1 }
 0x155   : > { %1270 = vrot.lane.b32.xlu1 %v1119_v42, %s3108_s26  ;;  %v1867_v53 = vsel %vm831_vm1, %v1865_v29, %v1866_v39  ;;  %s4297_s26 = scalar_lea.vmem %s4433_s4, %s2758_s23 }
 0x156   : > { %1934 = vrot.lane.b32.xlu0 %v1903_v36, %s3112_s30  ;;  %v1907_v56 = vpop.permute.xlu2 %1906  ;;  %v1678_v14 = vrot.slane %v1676_v30, 1  ;;  %v1879_v13 = vsel %vm831_vm1, %v1877_v60, %v1878_v37  ;;  %v4287_v37 = vld [vmem:[%s4432_s3] ss:$0 sm:$0xff] }
 0x157   : > { %v1923_v44 = vpop.permute.xlu1 %1922 }
 0x158   : > { %v2187_v5 = vsel %vm2167_vm10, %v2154_v26, %v1923_v44  ;;  %v1803_v51 = vpop.permute.xlu0 %1802 }
 0x159   : > { %2749 = vmatmul.msk.bf16.gmra.mxu2 %vm2236_vm11, %v2187_v5  ;;  %v2162_v34 = vsel %vm2134_vm9, %v2129_v54, %v1803_v51 }
 0x15a   : > { %v2195_v3 = vsel %vm2167_vm10, %v2162_v34, %v4120_v59  ;;  %v1630_v59 = vrot.slane %v1628_v27, 1 }
 0x15b   : > { %2753 = vmatmul.msk.bf16.gmra.mxu3 %vm2236_vm11, %v2195_v3 }
 0x15c   : > { %1510 = vrot.lane.b32.xlu2 %v4160_v12, %s3109_s27  ;;  %v1679_v12 = vsel %vm558_vm0, %v1674_v18, %v1678_v14  ;;  %v1631_v1 = vsel %vm558_vm0, %v1626_v55, %v1630_v59 }
 0x15d   : > { %1406 = vrot.lane.b32.xlu1 %v1367_v50, %s3110_s28 }
 0x15e   : > { %1398 = vrot.lane.b32.xlu0 %v1355_v47, %s3110_s28  ;;  %v1293_v21 = vpop.permute.xlu2 %1292 }
 0x15f   : > { %v1275_v58 = vpop.permute.xlu1 %1274  ;;  %v2065_v51 = vsel %vm2035_vm6, %v3962_v17, %v1293_v21 }
 0x160   : > { %v1267_v22 = vpop.permute.xlu0 %1266  ;;  %v2047_v16 = vsel %vm2035_vm6, %v3869_v48, %v1275_v58 }
 0x161   : > { %v2039_v36 = vsel %vm2035_vm6, %v3849_v20, %v1267_v22 }
 0x164   : > { %1790 = vrot.lane.b32.xlu2 %v1679_v12, %s3111_s29 }
 0x165   : > { %1782 = vrot.lane.b32.xlu1 %v1631_v1, %s3111_s29 }
 0x166   : > { %1518 = vrot.lane.b32.xlu0 %v4171_v61, %s3109_s27  ;;  %v1525_v19 = vpop.permute.xlu2 %1524  ;;  %v2072_v61 = vsel %vm2068_vm7, %v2039_v36, %v4152_v52 }
 0x167   : > { %v1507_v42 = vpop.permute.xlu1 %1506 }
 0x168   : > { %v1403_v32 = vpop.permute.xlu0 %1402  ;;  %v2105_v8 = vsel %vm2101_vm8, %v2072_v61, %v1507_v42 }
 0x169   : > { %v2080_v20 = vsel %vm2068_vm7, %v2047_v16, %v1403_v32 }
 0x16a   : > { %v2113_v44 = vsel %vm2101_vm8, %v2080_v20, %v4186_v0 }
 0x16d   : > { %1918 = vrot.lane.b32.xlu1 %v1879_v13, %s3112_s30 }
 0x16e   : > { %1910 = vrot.lane.b32.xlu0 %v1867_v53, %s3112_s30  ;;  %v1805_v28 = vpop.permute.xlu2 %1804 }
 0x16f   : > { %v1787_v31 = vpop.permute.xlu1 %1786 }
 0x170   : > { %v1779_v10 = vpop.permute.xlu0 %1778  ;;  %v2146_v52 = vsel %vm2134_vm9, %v2113_v44, %v1787_v31 }
 0x171   : > { %v2138_v4 = vsel %vm2134_vm9, %v2105_v8, %v1779_v10 }
 0x172   : > { %v2171_v15 = vsel %vm2167_vm10, %v2138_v4, %v1907_v56 }
 0x173   : > { %2741 = vmatmul.msk.bf16.gmra.mxu0 %vm2236_vm11, %v2171_v15 }
 0x176   : > { %v1269_v6 = vpop.permute.xlu2 %1268 }
 0x177   : > { %v1285_v49 = vpop.permute.xlu1 %1284  ;;  %v2041_v18 = vsel %vm2035_vm6, %v3840_v35, %v1269_v6  ;;  %v4280_v35 = vld [vmem:[%s4431_s2] ss:$0 sm:$0xff] }
 0x178   : > { %v1915_v26 = vpop.permute.xlu0 %1914  ;;  %v2057_v0 = vsel %vm2035_vm6, %v3934_v2, %v1285_v49 }
 0x179   : > { %v2179_v41 = vsel %vm2167_vm10, %v2146_v52, %v1915_v26 }
 0x17a   : > { %2745 = vmatmul.msk.bf16.gmra.mxu1 %vm2236_vm11, %v2179_v41 }
 0x17e   : > { %v1405_v11 = vpop.permute.xlu2 %1404 }
 0x17f   : > { %v1421_v5 = vpop.permute.xlu1 %1420 }
 0x180   : > { %v1413_v38 = vpop.permute.xlu0 %1412  ;;  %v2098_v50 = vsel %vm2068_vm7, %v2065_v51, %v1421_v5 }
 0x181   : > { %v2090_v34 = vsel %vm2068_vm7, %v2057_v0, %v1413_v38 }
 0x182   : > { %v2123_v3 = vsel %vm2101_vm8, %v2090_v34, %v1525_v19 }
 0x186   : > { %v1781_v30 = vpop.permute.xlu2 %1780 }
 0x187   : > { %v1797_v48 = vpop.permute.xlu1 %1796 }
 0x188   : > { %v1533_v54 = vpop.permute.xlu0 %1532  ;;  %v2156_v24 = vsel %vm2134_vm9, %v2123_v3, %v1797_v48 }
 0x189   : > { %v2131_v9 = vsel %vm2101_vm8, %v2098_v50, %v1533_v54 }
 0x18a   : > { %v2164_v27 = vsel %vm2134_vm9, %v2131_v9, %v1805_v28 }
 0x18e   : > { %v1917_v14 = vpop.permute.xlu2 %1916 }
 0x18f   : > { %v1933_v25 = vpop.permute.xlu1 %1932 }
 0x190   : > { %v2197_v45 = vsel %vm2167_vm10, %v2164_v27, %v1933_v25  ;;  %v1925_v17 = vpop.permute.xlu0 %1924 }
 0x191   : > { %2754 = vmatmul.msk.bf16.gmra.mxu3 %vm2236_vm11, %v2197_v45  ;;  %v2189_v46 = vsel %vm2167_vm10, %v2156_v24, %v1925_v17 }
 0x192   : > { %2750 = vmatmul.msk.bf16.gmra.mxu2 %vm2236_vm11, %v2189_v46 }
 0x196   : > { %v1415_v42 = vpop.permute.xlu2 %1414 }
 0x197   : > { %v1397_v2 = vpop.permute.xlu1 %1396 }
 0x198   : > { %v1277_v56 = vpop.permute.xlu0 %1276  ;;  %v2074_v55 = vsel %vm2068_vm7, %v2041_v18, %v1397_v2 }
 0x199   : > { %v2049_v58 = vsel %vm2035_vm6, %v3774_v62, %v1277_v56 }
 0x19a   : > { %v2082_v1 = vsel %vm2068_vm7, %v2049_v58, %v1405_v11 }
 0x19e   : > { %v1535_v15 = vpop.permute.xlu2 %1534 }
 0x19f   : > { %v1517_v47 = vpop.permute.xlu1 %1516 }
 0x1a0   : > { %v1509_v40 = vpop.permute.xlu0 %1508  ;;  %v2115_v23 = vsel %vm2101_vm8, %v2082_v1, %v1517_v47 }
 0x1a1   : > { %v2107_v59 = vsel %vm2101_vm8, %v2074_v55, %v1509_v40 }
 0x1a2   : > { %v2140_v22 = vsel %vm2134_vm9, %v2107_v59, %v1781_v30 }
 0x1a6   : > { %v1927_v54 = vpop.permute.xlu2 %1926 }
 0x1a7   : > { %v1909_v12 = vpop.permute.xlu1 %1908 }
 0x1a8   : > { %v2173_v7 = vsel %vm2167_vm10, %v2140_v22, %v1909_v12  ;;  %v1789_v21 = vpop.permute.xlu0 %1788 }
 0x1a9   : > { %2742 = vmatmul.msk.bf16.gmra.mxu0 %vm2236_vm11, %v2173_v7  ;;  %v2148_v60 = vsel %vm2134_vm9, %v2115_v23, %v1789_v21 }
 0x1aa   : > { %v2181_v62 = vsel %vm2167_vm10, %v2148_v60, %v1917_v14 }
 0x1ab   : > { %2746 = vmatmul.msk.bf16.gmra.mxu1 %vm2236_vm11, %v2181_v62 }
 0x1ac   : > { %v2342_v29 = vpop.f32.mrf.mxu3 }
 0x1ad   : > { %v2390_v39 = vmul.f32 %v4280_v35, %v2342_v29  ;;  %v2322_v32 = vpop.f32.mrf.mxu2 }
 0x1ae   : > { %v2382_v13 = vmul.f32 %v4280_v35, %v2322_v32  ;;  %v1279_v55 = vpop.permute.xlu2 %1278 }
 0x1af   : > { %v2426_v53 = vadd.f32 %v4287_v37, %v2390_v39  ;;  %v1295_v36 = vpop.permute.xlu1 %1294  ;;  %v2051_v62 = vsel %vm2035_vm6, %v3905_v57, %v1279_v55 }
 0x1b0   : > { %v2418_v31 = vadd.f32 %v4287_v37, %v2382_v13  ;;  %v1287_v61 = vpop.permute.xlu0 %1286  ;;  %v2067_v45 = vsel %vm2035_vm6, %v3862_v43, %v1295_v36 }
 0x1b1   : > { %v2458_v19 = vmax.f32 %v2426_v53, 0.0  ;;  %v2059_v5 = vsel %vm2035_vm6, %v3929_v63, %v1287_v61 }
 0x1b2   : > { %v2450_v8 = vmax.f32 %v2418_v31, 0.0  ;;  %v2092_v51 = vsel %vm2068_vm7, %v2059_v5, %v1415_v42 }
 0x1b3   : > { %2490 = vst [vmem:[%s4297_s26 + $0xc0] sm:$0xff] %v2458_v19 }
 0x1b4   : > { %v2344_v10 = vpop.f32.mrf.mxu3  ;;  %2482 = vst [vmem:[%s4297_s26 + $0x80] sm:$0xff] %v2450_v8 }
 0x1b5   : > { %v2391_v4 = vmul.f32 %v4280_v35, %v2344_v10  ;;  %v2324_v16 = vpop.f32.mrf.mxu2 }
 0x1b6   : > { %v2383_v20 = vmul.f32 %v4280_v35, %v2324_v16  ;;  %v1511_v23 = vpop.permute.xlu2 %1510 }
 0x1b7   : > { %v2427_v49 = vadd.f32 %v4287_v37, %v2391_v4  ;;  %v1527_v44 = vpop.permute.xlu1 %1526 }
 0x1b8   : > { %v2419_v52 = vadd.f32 %v4287_v37, %v2383_v20  ;;  %v1423_v28 = vpop.permute.xlu0 %1422  ;;  %v2125_v0 = vsel %vm2101_vm8, %v2092_v51, %v1527_v44 }
 0x1b9   : > { %v2459_v26 = vmax.f32 %v2427_v49, 0.0  ;;  %v2100_v24 = vsel %vm2068_vm7, %v2067_v45, %v1423_v28 }
 0x1ba   : > { %v2451_v41 = vmax.f32 %v2419_v52, 0.0  ;;  %v2133_v56 = vsel %vm2101_vm8, %v2100_v24, %v1535_v15 }
 0x1bb   : > { %2491 = vst [vmem:[%s4297_s26 + $0xc8] sm:$0xff] %v2459_v26 }
 0x1bc   : > { %2483 = vst [vmem:[%s4297_s26 + $0x88] sm:$0xff] %v2451_v41 }
 0x1be   : > { %v2302_v38 = vpop.f32.mrf.mxu1  ;;  %v1791_v32 = vpop.permute.xlu2 %1790 }
 0x1bf   : > { %v2374_v6 = vmul.f32 %v4280_v35, %v2302_v38  ;;  %v1807_v48 = vpop.permute.xlu1 %1806  ;;  %v2282_v50 = vpop.f32.mrf.mxu0 }
 0x1c0   : > { %v2366_v9 = vmul.f32 %v4280_v35, %v2282_v50  ;;  %v1799_v11 = vpop.permute.xlu0 %1798  ;;  %v2166_v40 = vsel %vm2134_vm9, %v2133_v56, %v1807_v48 }
 0x1c1   : > { %v2410_v34 = vadd.f32 %v4287_v37, %v2374_v6  ;;  %v2158_v63 = vsel %vm2134_vm9, %v2125_v0, %v1799_v11 }
 0x1c2   : > { %v2402_v25 = vadd.f32 %v4287_v37, %v2366_v9  ;;  %v2191_v3 = vsel %vm2167_vm10, %v2158_v63, %v1927_v54 }
 0x1c3   : > { %v2442_v27 = vmax.f32 %v2410_v34, 0.0  ;;  %2751 = vmatmul.msk.bf16.gmra.mxu2 %vm2236_vm11, %v2191_v3 }
 0x1c4   : > { %v2434_v17 = vmax.f32 %v2402_v25, 0.0 }
 0x1c5   : > { %2474 = vst [vmem:[%s4297_s26 + $0x40] sm:$0xff] %v2442_v27 }
 0x1c6   : > { %v2304_v46 = vpop.f32.mrf.mxu1  ;;  %2466 = vst [vmem:[%s4297_s26] sm:$0xff] %v2434_v17 }
 0x1c7   : > { %v2375_v2 = vmul.f32 %v4280_v35, %v2304_v46  ;;  %v1271_v30 = vpop.permute.xlu1 %1270  ;;  %v2284_v47 = vpop.f32.mrf.mxu0 }
 0x1c8   : > { %v2367_v43 = vmul.f32 %v4280_v35, %v2284_v47  ;;  %v1935_v14 = vpop.permute.xlu0 %1934  ;;  %v2043_v29 = vsel %vm2035_vm6, %v3751_v33, %v1271_v30 }
 0x1c9   : > { %v2411_v18 = vadd.f32 %v4287_v37, %v2375_v2  ;;  %v2199_v59 = vsel %vm2167_vm10, %v2166_v40, %v1935_v14 }
 0x1ca   : > { %v2403_v58 = vadd.f32 %v4287_v37, %v2367_v43  ;;  %2755 = vmatmul.msk.bf16.gmra.mxu3 %vm2236_vm11, %v2199_v59 }
 0x1cb   : > { %v2443_v12 = vmax.f32 %v2411_v18, 0.0 }
 0x1cc   : > { %v2435_v22 = vmax.f32 %v2403_v58, 0.0 }
 0x1cd   : > { %2475 = vst [vmem:[%s4297_s26 + $0x48] sm:$0xff] %v2443_v12 }
 0x1ce   : > { %2467 = vst [vmem:[%s4297_s26 + $0x8] sm:$0xff] %v2435_v22 }
 0x1cf   : > { %v1407_v1 = vpop.permute.xlu1 %1406 }
 0x1d0   : > { %v1399_v7 = vpop.permute.xlu0 %1398  ;;  %v2084_v42 = vsel %vm2068_vm7, %v2051_v62, %v1407_v1 }
 0x1d1   : > { %v2076_v53 = vsel %vm2068_vm7, %v2043_v29, %v1399_v7 }
 0x1d2   : > { %v2109_v8 = vsel %vm2101_vm8, %v2076_v53, %v1511_v23 }
 0x1d7   : > { %v1783_v21 = vpop.permute.xlu1 %1782 }
 0x1d8   : > { %v1519_v60 = vpop.permute.xlu0 %1518  ;;  %v2142_v4 = vsel %vm2134_vm9, %v2109_v8, %v1783_v21 }
 0x1d9   : > { %v2117_v39 = vsel %vm2101_vm8, %v2084_v42, %v1519_v60 }
 0x1da   : > { %v2150_v31 = vsel %vm2134_vm9, %v2117_v39, %v1791_v32 }
 0x1dc   : > { %v2327_v13 = vpop.f32.mrf.mxu2 }
 0x1dd   : > { %v2384_v36 = vmul.f32 %v4280_v35, %v2327_v13 }
 0x1de   : > { %v2347_v61 = vpop.f32.mrf.mxu3 }
 0x1df   : > { %v2420_v19 = vadd.f32 %v4287_v37, %v2384_v36  ;;  %v1919_v57 = vpop.permute.xlu1 %1918  ;;  %v2392_v33 = vmul.f32 %v4280_v35, %v2347_v61 }
 0x1e0   : > { %v2183_v10 = vsel %vm2167_vm10, %v2150_v31, %v1919_v57  ;;  %v1911_v16 = vpop.permute.xlu0 %1910 }
 0x1e1   : > { %v2452_v15 = vmax.f32 %v2420_v19, 0.0  ;;  %2747 = vmatmul.msk.bf16.gmra.mxu1 %vm2236_vm11, %v2183_v10  ;;  %v2428_v20 = vadd.f32 %v4287_v37, %v2392_v33  ;;  %v2175_v49 = vsel %vm2167_vm10, %v2142_v4, %v1911_v16 }
 0x1e2   : > { %2743 = vmatmul.msk.bf16.gmra.mxu0 %vm2236_vm11, %v2175_v49 }
 0x1e3   : > { %2484 = vst [vmem:[%s4297_s26 + $0x90] sm:$0xff] %v2452_v15  ;;  %v2460_v44 = vmax.f32 %v2428_v20, 0.0 }
 0x1e4   : > { %v2329_v52 = vpop.f32.mrf.mxu2 }
 0x1e5   : > { %v2385_v26 = vmul.f32 %v4280_v35, %v2329_v52  ;;  %2492 = vst [vmem:[%s4297_s26 + $0xd0] sm:$0xff] %v2460_v44 }
 0x1e6   : > { %v2349_v41 = vpop.f32.mrf.mxu3 }
 0x1e7   : > { %v2421_v28 = vadd.f32 %v4287_v37, %v2385_v26  ;;  %v2393_v5 = vmul.f32 %v4280_v35, %v2349_v41 }
 0x1e9   : > { %v2453_v38 = vmax.f32 %v2421_v28, 0.0  ;;  %v2429_v6 = vadd.f32 %v4287_v37, %v2393_v5 }
 0x1eb   : > { %2485 = vst [vmem:[%s4297_s26 + $0x98] sm:$0xff] %v2453_v38  ;;  %v2461_v48 = vmax.f32 %v2429_v6, 0.0 }
 0x1ed   : > { %2493 = vst [vmem:[%s4297_s26 + $0xd8] sm:$0xff] %v2461_v48 }
 0x1f0   : > { %v2287_v54 = vpop.f32.mrf.mxu0 }
 0x1f1   : > { %v2368_v51 = vmul.f32 %v4280_v35, %v2287_v54 }
 0x1f3   : > { %v2404_v50 = vadd.f32 %v4287_v37, %v2368_v51 }
 0x1f5   : > { %v2436_v0 = vmax.f32 %v2404_v50, 0.0 }
 0x1f7   : > { %2468 = vst [vmem:[%s4297_s26 + $0x10] sm:$0xff] %v2436_v0  ;;  %v2307_v9 = vpop.f32.mrf.mxu1 }
 0x1f8   : > { %v2376_v34 = vmul.f32 %v4280_v35, %v2307_v9  ;;  %v2289_v11 = vpop.f32.mrf.mxu0 }
 0x1f9   : > { %v2369_v63 = vmul.f32 %v4280_v35, %v2289_v11 }
 0x1fa   : > { %v2412_v25 = vadd.f32 %v4287_v37, %v2376_v34 }
 0x1fb   : > { %v2405_v27 = vadd.f32 %v4287_v37, %v2369_v63 }
 0x1fc   : > { %v2444_v3 = vmax.f32 %v2412_v25, 0.0 }
 0x1fd   : > { %v2437_v45 = vmax.f32 %v2405_v27, 0.0 }
 0x1fe   : > { %2476 = vst [vmem:[%s4297_s26 + $0x50] sm:$0xff] %v2444_v3 }
 0x1ff   : > { %2469 = vst [vmem:[%s4297_s26 + $0x18] sm:$0xff] %v2437_v45  ;;  %v2309_v24 = vpop.f32.mrf.mxu1 }
 0x200   : > { %v2377_v17 = vmul.f32 %v4280_v35, %v2309_v24 }
 0x202   : > { %v2413_v46 = vadd.f32 %v4287_v37, %v2377_v17 }
 0x204   : > { %v2445_v2 = vmax.f32 %v2413_v46, 0.0 }
 0x206   : > { %2477 = vst [vmem:[%s4297_s26 + $0x58] sm:$0xff] %v2445_v2 }
 0x214   : > { %v2352_v30 = vpop.f32.mrf.mxu3 }
 0x215   : > { %v2394_v56 = vmul.f32 %v4280_v35, %v2352_v30  ;;  %v2332_v47 = vpop.f32.mrf.mxu2 }
 0x216   : > { %v2386_v40 = vmul.f32 %v4280_v35, %v2332_v47 }
 0x217   : > { %v2430_v43 = vadd.f32 %v4287_v37, %v2394_v56 }
 0x218   : > { %v2422_v18 = vadd.f32 %v4287_v37, %v2386_v40 }
 0x219   : > { %v2462_v14 = vmax.f32 %v2430_v43, 0.0 }
 0x21a   : > { %v2454_v55 = vmax.f32 %v2422_v18, 0.0 }
 0x21b   : > { %2494 = vst [vmem:[%s4297_s26 + $0xe0] sm:$0xff] %v2462_v14 }
 0x21c   : > { %v2354_v59 = vpop.f32.mrf.mxu3  ;;  %2486 = vst [vmem:[%s4297_s26 + $0xa0] sm:$0xff] %v2454_v55 }
 0x21d   : > { %v2395_v58 = vmul.f32 %v4280_v35, %v2354_v59  ;;  %v2334_v12 = vpop.f32.mrf.mxu2 }
 0x21e   : > { %v2387_v22 = vmul.f32 %v4280_v35, %v2334_v12 }
 0x21f   : > { %v2431_v1 = vadd.f32 %v4287_v37, %v2395_v58 }
 0x220   : > { %v2423_v7 = vadd.f32 %v4287_v37, %v2387_v22 }
 0x221   : > { %v2463_v23 = vmax.f32 %v2431_v1, 0.0 }
 0x222   : > { %v2455_v21 = vmax.f32 %v2423_v7, 0.0 }
 0x223   : > { %2495 = vst [vmem:[%s4297_s26 + $0xe8] sm:$0xff] %v2463_v23 }
 0x224   : > { %2487 = vst [vmem:[%s4297_s26 + $0xa8] sm:$0xff] %v2455_v21 }
 0x226   : > { %v2292_v60 = vpop.f32.mrf.mxu0 }
 0x227   : > { %v2370_v62 = vmul.f32 %v4280_v35, %v2292_v60 }
 0x228   : > { %v2312_v29 = vpop.f32.mrf.mxu1 }
 0x229   : > { %v2406_v42 = vadd.f32 %v4287_v37, %v2370_v62  ;;  %v2378_v39 = vmul.f32 %v4280_v35, %v2312_v29 }
 0x22b   : > { %v2438_v32 = vmax.f32 %v2406_v42, 0.0  ;;  %v2414_v13 = vadd.f32 %v4287_v37, %v2378_v39 }
 0x22d   : > { %2470 = vst [vmem:[%s4297_s26 + $0x20] sm:$0xff] %v2438_v32  ;;  %v2446_v53 = vmax.f32 %v2414_v13, 0.0 }
 0x22e   : > { %v2294_v36 = vpop.f32.mrf.mxu0 }
 0x22f   : > { %v2371_v31 = vmul.f32 %v4280_v35, %v2294_v36  ;;  %2478 = vst [vmem:[%s4297_s26 + $0x60] sm:$0xff] %v2446_v53 }
 0x230   : > { %v2314_v61 = vpop.f32.mrf.mxu1 }
 0x231   : > { %v2407_v19 = vadd.f32 %v4287_v37, %v2371_v31  ;;  %v2379_v57 = vmul.f32 %v4280_v35, %v2314_v61 }
 0x233   : > { %v2439_v8 = vmax.f32 %v2407_v19, 0.0  ;;  %v2415_v33 = vadd.f32 %v4287_v37, %v2379_v57 }
 0x235   : > { %2471 = vst [vmem:[%s4297_s26 + $0x28] sm:$0xff] %v2439_v8  ;;  %v2447_v10 = vmax.f32 %v2415_v33, 0.0 }
 0x237   : > { %2479 = vst [vmem:[%s4297_s26 + $0x68] sm:$0xff] %v2447_v10 }
 0x246   : > { %v2337_v4 = vpop.f32.mrf.mxu2 }
 0x247   : > { %v2388_v15 = vmul.f32 %v4280_v35, %v2337_v4 }
 0x249   : > { %v2424_v16 = vadd.f32 %v4287_v37, %v2388_v15 }
 0x24b   : > { %v2456_v20 = vmax.f32 %v2424_v16, 0.0 }
 0x24d   : > { %2488 = vst [vmem:[%s4297_s26 + $0xb0] sm:$0xff] %v2456_v20  ;;  %v2357_v49 = vpop.f32.mrf.mxu3 }
 0x24e   : > { %v2396_v44 = vmul.f32 %v4280_v35, %v2357_v49  ;;  %v2339_v52 = vpop.f32.mrf.mxu2 }
 0x24f   : > { %v2389_v26 = vmul.f32 %v4280_v35, %v2339_v52 }
 0x250   : > { %v2432_v28 = vadd.f32 %v4287_v37, %v2396_v44 }
 0x251   : > { %v2425_v41 = vadd.f32 %v4287_v37, %v2389_v26 }
 0x252   : > { %v2464_v5 = vmax.f32 %v2432_v28, 0.0 }
 0x253   : > { %v2457_v38 = vmax.f32 %v2425_v41, 0.0 }
 0x254   : > { %2496 = vst [vmem:[%s4297_s26 + $0xf0] sm:$0xff] %v2464_v5 }
 0x255   : > { %2489 = vst [vmem:[%s4297_s26 + $0xb8] sm:$0xff] %v2457_v38  ;;  %v2359_v6 = vpop.f32.mrf.mxu3 }
 0x256   : > { %v2397_v48 = vmul.f32 %v4280_v35, %v2359_v6 }
 0x258   : > { %v2433_v54 = vadd.f32 %v4287_v37, %v2397_v48 }
 0x25a   : > { %v2465_v51 = vmax.f32 %v2433_v54, 0.0 }
 0x25c   : > { %2497 = vst [vmem:[%s4297_s26 + $0xf8] sm:$0xff] %v2465_v51 }
 0x25e   : > { %v2317_v50 = vpop.f32.mrf.mxu1 }
 0x25f   : > { %v2380_v0 = vmul.f32 %v4280_v35, %v2317_v50  ;;  %v2297_v9 = vpop.f32.mrf.mxu0 }
 0x260   : > { %v2372_v34 = vmul.f32 %v4280_v35, %v2297_v9 }
 0x261   : > { %v2416_v11 = vadd.f32 %v4287_v37, %v2380_v0 }
 0x262   : > { %v2408_v63 = vadd.f32 %v4287_v37, %v2372_v34 }
 0x263   : > { %v2448_v25 = vmax.f32 %v2416_v11, 0.0 }
 0x264   : > { %v2440_v27 = vmax.f32 %v2408_v63, 0.0 }
 0x265   : > { %2480 = vst [vmem:[%s4297_s26 + $0x70] sm:$0xff] %v2448_v25 }
 0x266   : > { %v2319_v3 = vpop.f32.mrf.mxu1  ;;  %2472 = vst [vmem:[%s4297_s26 + $0x30] sm:$0xff] %v2440_v27 }
 0x267   : > { %v2381_v45 = vmul.f32 %v4280_v35, %v2319_v3  ;;  %v2299_v24 = vpop.f32.mrf.mxu0 }
 0x268   : > { %v2373_v17 = vmul.f32 %v4280_v35, %v2299_v24 }
 0x269   : > { %v2417_v46 = vadd.f32 %v4287_v37, %v2381_v45 }
 0x26a   : > { %v2409_v2 = vadd.f32 %v4287_v37, %v2373_v17 }
 0x26b   : > { %v2449_v30 = vmax.f32 %v2417_v46, 0.0 }
 0x26c   : > { %v2441_v56 = vmax.f32 %v2409_v2, 0.0 }
 0x26d   : > { %2481 = vst [vmem:[%s4297_s26 + $0x78] sm:$0xff] %v2449_v30 }
 0x26e   : > { %2473 = vst [vmem:[%s4297_s26 + $0x38] sm:$0xff] %v2441_v56 }
 0x26f PF: > { %s14_s17 = sadd.s32 1, %s3103_s17   ;;  %s4440_s15 = smov %s3099_s16 }
 0x270   : > { %p11_p5 = scmp.ge.s32.totalorder %s14_s17, 4   ;;  %s4441_s16 = smov %s4443_s18 }
 0x272   :  { %13 = sbr.rel (!%p11_p5) target bundleno = 2 (0x2), region = 68 }

</bundles_post_ra>
